<compile_context>
chip_gen: v7x
topology: tpu7x:2x2x1
jax: 0.10.0
libtpu: 0.0.40
codegen_flags: <defaults>
</compile_context>

<pallas_src>
import numpy as np
import jax
import jax.numpy as jnp
from jax import lax
from jax.experimental import pallas as pl
from jax.experimental.pallas import tpu as pltpu


def _round_up(x, m):
    return -(-x // m) * m


def _vmem_capacity_bytes():
    try:
        info = pltpu.get_tpu_info()
        cap = getattr(info, "vmem_capacity_bytes", None)
        if cap:
            return int(cap)
    except Exception:
        pass
    return 64 * 1024 * 1024  # conservative: v7x per-TensorCore VMEM


# ---------------------------------------------------------------------------
# Pass 1: one-shot weight merge (entanglement scale + folded LoRA delta).
# Grid is (N/tn, K/tk); each tile is touched exactly once.
# ---------------------------------------------------------------------------
def _make_merge_kernel(*, num_in, num_out, entangle_out, tn, tk,
                       lora_scaling, merged_dtype):
    def kernel(alphas_ref, betas_ref, in_dims_ref, out_dims_ref,
               w_ref, la_ref, lb_ref, mw_ref):
        n_idx = pl.program_id(0)
        k_idx = pl.program_id(1)

        # Factorized entanglement scale for this (n, k) tile from SMEM scalars.
        col = k_idx * tk + lax.broadcasted_iota(jnp.int32, (1, tk), 1)
        a_col = jnp.zeros((1, tk), jnp.float32)
        for i in range(num_in):
            a_col = a_col + jnp.where(col < in_dims_ref[i],
                                      alphas_ref[i], jnp.float32(0.0))
        if entangle_out:
            row = n_idx * tn + lax.broadcasted_iota(jnp.int32, (tn, 1), 0)
            b_row = jnp.zeros((tn, 1), jnp.float32)
            for j in range(num_out):
                b_row = b_row + jnp.where(row < out_dims_ref[j],
                                          betas_ref[j], jnp.float32(0.0))
            scale = 1.0 + b_row * a_col          # [tn, tk] outer broadcast
        else:
            scale = 1.0 + a_col                  # [1, tk], broadcast over rows

        w = w_ref[...].astype(jnp.float32) * scale
        # Rank-R LoRA delta folded once per weight tile (not per m block).
        w = w + lora_scaling * jnp.dot(lb_ref[...].astype(jnp.float32),
                                       la_ref[...].astype(jnp.float32),
                                       preferred_element_type=jnp.float32)
        mw_ref[...] = w.astype(merged_dtype)

    return kernel


# ---------------------------------------------------------------------------
# Pass 2: plain output-stationary GEMM  out = x @ merged_W.T + mixed_bias.
# ---------------------------------------------------------------------------
def _make_gemm_kernel(*, has_bias, out_dtype):
    def kernel(*refs):
        if has_bias:
            x_ref, w_ref, b_ref, o_ref, acc_ref = refs
        else:
            x_ref, w_ref, o_ref, acc_ref = refs

        k_idx = pl.program_id(2)

        @pl.when(k_idx == 0)
        def _init():
            acc_ref[...] = jnp.zeros_like(acc_ref)

        acc_ref[...] += lax.dot_general(
            x_ref[...], w_ref[...],
            dimension_numbers=(((1,), (1,)), ((), ())),
            preferred_element_type=jnp.float32)

        @pl.when(k_idx == pl.num_programs(2) - 1)
        def _finalize():
            out = acc_ref[...]
            if has_bias:
                out = out + b_ref[...].astype(jnp.float32)
            o_ref[...] = out.astype(out_dtype)

    return kernel


def weight_entangled_lora_linear(x, weight, bias, lora_a, lora_b,
                                 alphas, betas, in_dims, out_dims,
                                 lora_scaling, entangle_out=True,
                                 bf16_compute=False,
                                 tm=512, tn=512, tk=512):
    """x: [B, S, K]; weight: [N, K]; bias: [N] or None; lora_a: [R, K]; lora_b: [N, R]."""
    B, S, K = x.shape
    N = weight.shape[0]
    R = lora_a.shape[0]
    M = B * S

    has_bias = bias is not None
    if betas is None or out_dims is None:
        entangle_out = False
    if not entangle_out:
        betas = jnp.zeros((1,), jnp.float32)
        out_dims = jnp.zeros((1,), jnp.int32)

    alphas = jnp.asarray(alphas, jnp.float32)
    betas = jnp.asarray(betas, jnp.float32)
    in_dims = jnp.asarray(in_dims, jnp.int32)
    out_dims = jnp.asarray(out_dims, jnp.int32)

    out_dtype = x.dtype
    compute_dtype = (jnp.bfloat16
                     if (x.dtype == jnp.bfloat16 or bf16_compute)
                     else jnp.float32)

    # ---- tile selection: pad every dim to a tile multiple (never fall back to
    # a full-extent block, which can silently blow past VMEM on v7x). ----
    tm = max(8, min(tm, _round_up(M, 8)))
    tn = max(128, min(tn, _round_up(N, 128)))
    tk = max(128, min(tk, _round_up(K, 128)))
    Mp = _round_up(M, tm)
    Np = _round_up(N, tn)
    Kp = _round_up(K, tk)

    x2 = x.reshape(M, K)
    if jnp.dtype(compute_dtype) != x2.dtype:
        x2 = x2.astype(compute_dtype)   # one pass; also halves kernel x traffic
    if (Mp, Kp) != (M, K):
        # TODO(synk): a masked ragged tail tile would avoid this extra copy.
        x2 = jnp.pad(x2, ((0, Mp - M), (0, Kp - K)))

    w2, la2, lb2 = weight, lora_a, lora_b
    if (Np, Kp) != (N, K):
        w2 = jnp.pad(w2, ((0, Np - N), (0, Kp - K)))
        la2 = jnp.pad(la2, ((0, 0), (0, Kp - K)))
        lb2 = jnp.pad(lb2, ((0, Np - N), (0, 0)))

    # Bias mixing (N elements) done once in the wrapper.
    if has_bias:
        bias_f32 = jnp.asarray(bias, jnp.float32)
        if entangle_out:
            r = jnp.arange(N, dtype=jnp.int32)
            bfac = jnp.zeros((N,), jnp.float32)
            for j in range(int(out_dims.shape[0])):
                bfac = bfac + jnp.where(r < out_dims[j], betas[j],
                                        jnp.float32(0.0))
            bias_f32 = bias_f32 * (1.0 + bfac)
        b2 = bias_f32.reshape(1, N)
        if Np != N:
            b2 = jnp.pad(b2, ((0, 0), (0, Np - N)))

    # Generation-aware VMEM budget (v7x: 64 MiB physical vs 128 MiB on v5e/v6e).
    cbytes = jnp.dtype(compute_dtype).itemsize
    obytes = jnp.dtype(out_dtype).itemsize
    gemm_vmem_est = (2 * (tm * tk + tn * tk) * cbytes    # double-buffered x, W
                     + 2 * tm * tn * obytes              # double-buffered out
                     + tm * tn * 4                       # f32 accumulator
                     + 2 * tn * 4)                       # bias tile
    cap = _vmem_capacity_bytes()
    vmem_limit = int(min(max(int(gemm_vmem_est * 1.5), 32 * 1024 * 1024),
                         int(cap * 0.75)))

    smem = pl.BlockSpec(memory_space=pltpu.MemorySpace.SMEM)

    # ---------------- pass 1: merged weight ----------------
    merge_kernel = _make_merge_kernel(
        num_in=int(in_dims.shape[0]), num_out=int(out_dims.shape[0]),
        entangle_out=entangle_out, tn=tn, tk=tk,
        lora_scaling=float(lora_scaling), merged_dtype=compute_dtype)

    merged_w = pl.pallas_call(
        merge_kernel,
        out_shape=jax.ShapeDtypeStruct((Np, Kp), compute_dtype),
        grid_spec=pltpu.PrefetchScalarGridSpec(
            num_scalar_prefetch=0,
            grid=(Np // tn, Kp // tk),
            in_specs=[
                smem, smem, smem, smem,                          # alphas, betas, in_dims, out_dims
                pl.BlockSpec((tn, tk), lambda n, k: (n, k)),     # W
                pl.BlockSpec((R, tk), lambda n, k: (0, k)),      # lora A
                pl.BlockSpec((tn, R), lambda n, k: (n, 0)),      # lora B
            ],
            out_specs=pl.BlockSpec((tn, tk), lambda n, k: (n, k)),
        ),
        compiler_params=pltpu.CompilerParams(
            dimension_semantics=("parallel", "parallel"),
            vmem_limit_bytes=vmem_limit),
    )(alphas, betas, in_dims, out_dims, w2, la2, lb2)

    # ---------------- pass 2: tiled GEMM ----------------
    gemm_kernel = _make_gemm_kernel(has_bias=has_bias, out_dtype=out_dtype)
    gemm_in_specs = [
        pl.BlockSpec((tm, tk), lambda m, n, k: (m, k)),          # x
        pl.BlockSpec((tn, tk), lambda m, n, k: (n, k)),          # merged W
    ]
    gemm_args = [x2, merged_w]
    if has_bias:
        gemm_in_specs.append(pl.BlockSpec((1, tn), lambda m, n, k: (0, n)))
        gemm_args.append(b2)

    out2 = pl.pallas_call(
        gemm_kernel,
        out_shape=jax.ShapeDtypeStruct((Mp, Np), out_dtype),
        grid_spec=pltpu.PrefetchScalarGridSpec(
            num_scalar_prefetch=0,
            grid=(Mp // tm, Np // tn, Kp // tk),
            in_specs=gemm_in_specs,
            out_specs=pl.BlockSpec((tm, tn), lambda m, n, k: (m, n)),
            scratch_shapes=[pltpu.VMEM((tm, tn), jnp.float32)],
        ),
        compiler_params=pltpu.CompilerParams(
            dimension_semantics=("parallel", "parallel", "arbitrary"),
            vmem_limit_bytes=vmem_limit),
    )(*gemm_args)

    if (Mp, Np) != (M, N):
        out2 = out2[:M, :N]
    return out2.reshape(B, S, N)


def reference_forward(x, weight, bias, lora_a, lora_b,
                      alphas, betas, in_dims, out_dims, lora_scaling,
                      entangle_out=True):
    """Pure numpy (float64) mirror of the PyTorch module's forward."""
    x = np.asarray(x, np.float64)
    W = np.asarray(weight, np.float64)
    b = np.asarray(bias, np.float64)
    A = np.asarray(lora_a, np.float64)
    Bm = np.asarray(lora_b, np.float64)
    alphas = np.asarray(alphas, np.float64)
    betas = np.asarray(betas, np.float64)

    mixed_w = W.copy()
    if not entangle_out:
        for d_in, a in zip(in_dims, alphas):
            sub = np.zeros_like(W)
            sub[:, :d_in] = W[:, :d_in]
            mixed_w = mixed_w + a * sub
        mixed_b = b.copy()
    else:
        for i, d_in in enumerate(in_dims):
            for j, d_out in enumerate(out_dims):
                sub = np.zeros_like(W)
                sub[:d_out, :d_in] = W[:d_out, :d_in]
                mixed_w = mixed_w + alphas[i] * betas[j] * sub
        mixed_b = b.copy()
        for j, d_out in enumerate(out_dims):
            sub = np.zeros_like(b)
            sub[:d_out] = b[:d_out]
            mixed_b = mixed_b + betas[j] * sub

    base = x @ mixed_w.T + mixed_b
    lora = (x @ A.T) @ Bm.T
    return base + lora_scaling * lora


if __name__ == "__main__":
    # Small shapes consistent with a Linear(in=512, out=512) + rank-8 LoRA.
    B, S, K, N, R = 2, 128, 512, 512, 8
    in_feature_dims = [192, 384, 512]
    out_feature_dims = [256, 512]
    lora_scaling = 2.0  # lora_alpha / r

    key = jax.random.PRNGKey(0)
    kx, kw, kb, ka, kbm, kal, kbe = jax.random.split(key, 7)

    x = jax.random.normal(kx, (B, S, K), jnp.float32)
    weight = jax.random.normal(kw, (N, K), jnp.float32) * 0.1
    bias = jax.random.normal(kb, (N,), jnp.float32) * 0.1
    lora_a = jax.random.normal(ka, (R, K), jnp.float32) * 0.1
    lora_b = jax.random.normal(kbm, (N, R), jnp.float32) * 0.1
    alphas = jax.random.uniform(kal, (len(in_feature_dims),), jnp.float32) * 0.5
    betas = jax.random.uniform(kbe, (len(out_feature_dims),), jnp.float32) * 0.5
    in_dims = jnp.asarray(in_feature_dims, jnp.int32)
    out_dims = jnp.asarray(out_feature_dims, jnp.int32)

    # Case 1: out_feature_dims provided (full in+out entanglement), f32.
    out1 = weight_entangled_lora_linear(
        x, weight, bias, lora_a, lora_b, alphas, betas, in_dims, out_dims,
        lora_scaling, entangle_out=True)
    out1 = jax.block_until_ready(out1)
    ref1 = reference_forward(
        np.asarray(x).reshape(B * S, K), weight, bias, lora_a, lora_b,
        alphas, betas, in_feature_dims, out_feature_dims, lora_scaling,
        entangle_out=True).reshape(B, S, N)
    np.testing.assert_allclose(np.asarray(out1), ref1, rtol=1e-2, atol=1e-2)

    # Case 2: out_feature_dims is None (in-feature entanglement only), f32.
    out2 = weight_entangled_lora_linear(
        x, weight, bias, lora_a, lora_b, alphas, None, in_dims, None,
        lora_scaling, entangle_out=False)
    out2 = jax.block_until_ready(out2)
    ref2 = reference_forward(
        np.asarray(x).reshape(B * S, K), weight, bias, lora_a, lora_b,
        alphas, betas, in_feature_dims, out_feature_dims, lora_scaling,
        entangle_out=False).reshape(B, S, N)
    np.testing.assert_allclose(np.asarray(out2), ref2, rtol=1e-2, atol=1e-2)

    # Case 3: bf16 operands (bf16 x bf16 -> f32-accumulate MXU path).
    xb = x.astype(jnp.bfloat16)
    wb = weight.astype(jnp.bfloat16)
    bb = bias.astype(jnp.bfloat16)
    lab = lora_a.astype(jnp.bfloat16)
    lbb = lora_b.astype(jnp.bfloat16)
    out3 = weight_entangled_lora_linear(
        xb, wb, bb, lab, lbb, alphas, betas, in_dims, out_dims,
        lora_scaling, entangle_out=True)
    out3 = jax.block_until_ready(out3)
    ref3 = reference_forward(
        np.asarray(xb.astype(jnp.float32)).reshape(B * S, K),
        np.asarray(wb.astype(jnp.float32)), np.asarray(bb.astype(jnp.float32)),
        np.asarray(lab.astype(jnp.float32)), np.asarray(lbb.astype(jnp.float32)),
        alphas, betas, in_feature_dims, out_feature_dims, lora_scaling,
        entangle_out=True).reshape(B, S, N)
    np.testing.assert_allclose(np.asarray(out3.astype(jnp.float32)), ref3,
                               rtol=5e-2, atol=5e-2)

    # Case 4: ragged (non-tile-divisible) M / K / N exercise the padding path.
    B4, S4, K4, N4 = 2, 40, 300, 320
    in_dims4 = [100, 200, 300]
    out_dims4 = [160, 320]
    k4 = jax.random.split(jax.random.PRNGKey(1), 5)
    x4 = jax.random.normal(k4[0], (B4, S4, K4), jnp.float32)
    w4 = jax.random.normal(k4[1], (N4, K4), jnp.float32) * 0.1
    b4 = jax.random.normal(k4[2], (N4,), jnp.float32) * 0.1
    la4 = jax.random.normal(k4[3], (R, K4), jnp.float32) * 0.1
    lb4 = jax.random.normal(k4[4], (N4, R), jnp.float32) * 0.1
    out4 = weight_entangled_lora_linear(
        x4, w4, b4, la4, lb4, alphas, betas,
        jnp.asarray(in_dims4, jnp.int32), jnp.asarray(out_dims4, jnp.int32),
        lora_scaling, entangle_out=True)
    out4 = jax.block_until_ready(out4)
    ref4 = reference_forward(
        np.asarray(x4).reshape(B4 * S4, K4), w4, b4, la4, lb4,
        alphas, betas, in_dims4, out_dims4, lora_scaling,
        entangle_out=True).reshape(B4, S4, N4)
    np.testing.assert_allclose(np.asarray(out4), ref4, rtol=1e-2, atol=1e-2)

    # Case 5: f32 inputs with the opt-in bf16 compute policy (MXU-friendly).
    out5 = weight_entangled_lora_linear(
        x, weight, bias, lora_a, lora_b, alphas, betas, in_dims, out_dims,
        lora_scaling, entangle_out=True, bf16_compute=True)
    out5 = jax.block_until_ready(out5)
    np.testing.assert_allclose(np.asarray(out5), ref1, rtol=5e-2, atol=5e-2)

    print("KERNEL_OK")
</pallas_src>

<mosaic_0001>
module attributes {stable_mosaic.version = 11 : i64} {
  func.func @kernel(%arg0: i32, %arg1: i32, %arg2: memref<3xf32, #tpu.memory_space<smem>>, %arg3: memref<2xf32, #tpu.memory_space<smem>>, %arg4: memref<3xi32, #tpu.memory_space<smem>>, %arg5: memref<2xi32, #tpu.memory_space<smem>>, %arg6: memref<512x512xf32, #tpu.memory_space<vmem>>, %arg7: memref<8x512xf32, #tpu.memory_space<vmem>>, %arg8: memref<512x8xf32, #tpu.memory_space<vmem>>, %arg9: memref<512x512xf32, #tpu.memory_space<vmem>>) attributes {dimension_semantics = [#tpu.dimension_semantics<parallel>, #tpu.dimension_semantics<parallel>], iteration_bounds = array<i64: 1, 1>, scalar_prefetch = 0 : i64, scratch_operands = 0 : i64, tpu.core_type = #tpu.core_type<tc>, window_params = [{transform_indices = @transform_0, window_bounds = array<i64: 3>}, {transform_indices = @transform_1, window_bounds = array<i64: 2>}, {transform_indices = @transform_2, window_bounds = array<i64: 3>}, {transform_indices = @transform_3, window_bounds = array<i64: 2>}, {transform_indices = @transform_4, window_bounds = array<i64: 512, 512>}, {transform_indices = @transform_5, window_bounds = array<i64: 8, 512>}, {transform_indices = @transform_6, window_bounds = array<i64: 512, 8>}, {transform_indices = @transform_7, window_bounds = array<i64: 512, 512>}]} {
    %c512_i32 = arith.constant 512 : i32
    %0 = arith.muli %arg1, %c512_i32 : i32
    %1 = tpu.iota {dimensions = array<i32: 1>} : vector<1x512xi32>
    %2 = vector.broadcast %0 : i32 to vector<1x512xi32>
    %3 = arith.addi %2, %1 : vector<1x512xi32>
    %cst = arith.constant 0.000000e+00 : f32
    %4 = vector.broadcast %cst : f32 to vector<1x512xf32>
    %c0 = arith.constant 0 : index
    %5 = memref.load %arg4[%c0] : memref<3xi32, #tpu.memory_space<smem>>
    %6 = vector.broadcast %5 : i32 to vector<1x512xi32>
    %7 = arith.cmpi slt, %3, %6 : vector<1x512xi32>
    %c0_0 = arith.constant 0 : index
    %8 = memref.load %arg2[%c0_0] : memref<3xf32, #tpu.memory_space<smem>>
    %cst_1 = arith.constant 0.000000e+00 : f32
    %9 = vector.broadcast %8 : f32 to vector<1x512xf32>
    %10 = vector.broadcast %cst_1 : f32 to vector<1x512xf32>
    %11 = arith.select %7, %9, %10 : vector<1x512xi1>, vector<1x512xf32>
    %12 = arith.addf %4, %11 : vector<1x512xf32>
    %c1 = arith.constant 1 : index
    %13 = memref.load %arg4[%c1] : memref<3xi32, #tpu.memory_space<smem>>
    %14 = vector.broadcast %13 : i32 to vector<1x512xi32>
    %15 = arith.cmpi slt, %3, %14 : vector<1x512xi32>
    %c1_2 = arith.constant 1 : index
    %16 = memref.load %arg2[%c1_2] : memref<3xf32, #tpu.memory_space<smem>>
    %cst_3 = arith.constant 0.000000e+00 : f32
    %17 = vector.broadcast %16 : f32 to vector<1x512xf32>
    %18 = vector.broadcast %cst_3 : f32 to vector<1x512xf32>
    %19 = arith.select %15, %17, %18 : vector<1x512xi1>, vector<1x512xf32>
    %20 = arith.addf %12, %19 : vector<1x512xf32>
    %c2 = arith.constant 2 : index
    %21 = memref.load %arg4[%c2] : memref<3xi32, #tpu.memory_space<smem>>
    %22 = vector.broadcast %21 : i32 to vector<1x512xi32>
    %23 = arith.cmpi slt, %3, %22 : vector<1x512xi32>
    %c2_4 = arith.constant 2 : index
    %24 = memref.load %arg2[%c2_4] : memref<3xf32, #tpu.memory_space<smem>>
    %cst_5 = arith.constant 0.000000e+00 : f32
    %25 = vector.broadcast %24 : f32 to vector<1x512xf32>
    %26 = vector.broadcast %cst_5 : f32 to vector<1x512xf32>
    %27 = arith.select %23, %25, %26 : vector<1x512xi1>, vector<1x512xf32>
    %28 = arith.addf %20, %27 : vector<1x512xf32>
    %c512_i32_6 = arith.constant 512 : i32
    %29 = arith.muli %arg0, %c512_i32_6 : i32
    %30 = tpu.iota {dimensions = array<i32: 0>} : vector<512x1xi32>
    %31 = vector.broadcast %29 : i32 to vector<512x1xi32>
    %32 = arith.addi %31, %30 : vector<512x1xi32>
    %cst_7 = arith.constant 0.000000e+00 : f32
    %33 = vector.broadcast %cst_7 : f32 to vector<512x1xf32>
    %c0_8 = arith.constant 0 : index
    %34 = memref.load %arg5[%c0_8] : memref<2xi32, #tpu.memory_space<smem>>
    %35 = vector.broadcast %34 : i32 to vector<512x1xi32>
    %36 = arith.cmpi slt, %32, %35 : vector<512x1xi32>
    %c0_9 = arith.constant 0 : index
    %37 = memref.load %arg3[%c0_9] : memref<2xf32, #tpu.memory_space<smem>>
    %cst_10 = arith.constant 0.000000e+00 : f32
    %38 = vector.broadcast %37 : f32 to vector<512x1xf32>
    %39 = vector.broadcast %cst_10 : f32 to vector<512x1xf32>
    %40 = arith.select %36, %38, %39 : vector<512x1xi1>, vector<512x1xf32>
    %41 = arith.addf %33, %40 : vector<512x1xf32>
    %c1_11 = arith.constant 1 : index
    %42 = memref.load %arg5[%c1_11] : memref<2xi32, #tpu.memory_space<smem>>
    %43 = vector.broadcast %42 : i32 to vector<512x1xi32>
    %44 = arith.cmpi slt, %32, %43 : vector<512x1xi32>
    %c1_12 = arith.constant 1 : index
    %45 = memref.load %arg3[%c1_12] : memref<2xf32, #tpu.memory_space<smem>>
    %cst_13 = arith.constant 0.000000e+00 : f32
    %46 = vector.broadcast %45 : f32 to vector<512x1xf32>
    %47 = vector.broadcast %cst_13 : f32 to vector<512x1xf32>
    %48 = arith.select %44, %46, %47 : vector<512x1xi1>, vector<512x1xf32>
    %49 = arith.addf %41, %48 : vector<512x1xf32>
    %50 = vector.broadcast %49 : vector<512x1xf32> to vector<512x512xf32>
    %51 = vector.broadcast %28 : vector<1x512xf32> to vector<512x512xf32>
    %52 = arith.mulf %50, %51 : vector<512x512xf32>
    %cst_14 = arith.constant 1.000000e+00 : f32
    %53 = vector.broadcast %cst_14 : f32 to vector<512x512xf32>
    %54 = arith.addf %53, %52 : vector<512x512xf32>
    %c0_15 = arith.constant 0 : index
    %c0_16 = arith.constant 0 : index
    %55 = vector.load %arg6[%c0_15, %c0_16] : memref<512x512xf32, #tpu.memory_space<vmem>>, vector<512x512xf32>
    %56 = arith.mulf %55, %54 : vector<512x512xf32>
    %c0_17 = arith.constant 0 : index
    %c0_18 = arith.constant 0 : index
    %57 = vector.load %arg8[%c0_17, %c0_18] : memref<512x8xf32, #tpu.memory_space<vmem>>, vector<512x8xf32>
    %c0_19 = arith.constant 0 : index
    %c0_20 = arith.constant 0 : index
    %58 = vector.load %arg7[%c0_19, %c0_20] : memref<8x512xf32, #tpu.memory_space<vmem>>, vector<8x512xf32>
    %cst_21 = arith.constant dense<0.000000e+00> : vector<512x512xf32>
    %59 = tpu.matmul %57, %58, %cst_21 {dimension_numbers = #tpu.dot_dimension_numbers<[1], [0], [0], [1], [0, 0, 1, 1], [], []>} : vector<512x8xf32>, vector<8x512xf32>, vector<512x512xf32> -> vector<512x512xf32>
    %cst_22 = arith.constant 2.000000e+00 : f32
    %60 = vector.broadcast %cst_22 : f32 to vector<512x512xf32>
    %61 = arith.mulf %60, %59 : vector<512x512xf32>
    %62 = arith.addf %56, %61 : vector<512x512xf32>
    %c0_23 = arith.constant 0 : index
    %c0_24 = arith.constant 0 : index
    %63 = vector.load %arg9[%c0_23, %c0_24] : memref<512x512xf32, #tpu.memory_space<vmem>>, vector<512x512xf32>
    tpu.vector_store %arg9[%c0_23, %c0_24], %62 {strides = array<i32>} : memref<512x512xf32, #tpu.memory_space<vmem>>, vector<512x512xf32>,
    return
  }
  func.func @transform_0(%arg0: i32, %arg1: i32) -> i32 {
    %c0_i32 = arith.constant 0 : i32
    %c0_i32_0 = arith.constant 0 : i32
    return %c0_i32 : i32
  }
  func.func @transform_1(%arg0: i32, %arg1: i32) -> i32 {
    %c0_i32 = arith.constant 0 : i32
    %c0_i32_0 = arith.constant 0 : i32
    return %c0_i32 : i32
  }
  func.func @transform_2(%arg0: i32, %arg1: i32) -> i32 {
    %c0_i32 = arith.constant 0 : i32
    %c0_i32_0 = arith.constant 0 : i32
    return %c0_i32 : i32
  }
  func.func @transform_3(%arg0: i32, %arg1: i32) -> i32 {
    %c0_i32 = arith.constant 0 : i32
    %c0_i32_0 = arith.constant 0 : i32
    return %c0_i32 : i32
  }
  func.func @transform_4(%arg0: i32, %arg1: i32) -> (i32, i32) {
    %c0_i32 = arith.constant 0 : i32
    return %arg0, %arg1 : i32, i32
  }
  func.func @transform_5(%arg0: i32, %arg1: i32) -> (i32, i32) {
    %c0_i32 = arith.constant 0 : i32
    %c0_i32_0 = arith.constant 0 : i32
    return %c0_i32, %arg1 : i32, i32
  }
  func.func @transform_6(%arg0: i32, %arg1: i32) -> (i32, i32) {
    %c0_i32 = arith.constant 0 : i32
    %c0_i32_0 = arith.constant 0 : i32
    return %arg0, %c0_i32 : i32, i32
  }
  func.func @transform_7(%arg0: i32, %arg1: i32) -> (i32, i32) {
    %c0_i32 = arith.constant 0 : i32
    return %arg0, %arg1 : i32, i32
  }
}

</mosaic_0001>

<bundles_post_ra>
// kernel: tpu_custom_call.1
= control target key start
LH: loop header
LB: loop body
LE: loop exit
PB: predicated region body
PF: predicated region fallthrough
CT: control target
= control target key end

     0   :  { %12 = vsyncpa [#allocation5], 0  ;;  %s6030_s0 = inlined_call_operand.vmem [shape: f32[3], index: 0, kind: input, shape index: {}]   ;;  %s6031_s1 = inlined_call_operand.vmem [shape: f32[2], index: 1, kind: input, shape index: {}]   ;;  %s6032_s2 = inlined_call_operand.vmem [shape: s32[3], index: 2, kind: input, shape index: {}]   ;;  %s6033_s3 = inlined_call_operand.vmem [shape: s32[2], index: 3, kind: input, shape index: {}]   ;;  %s6034_s4 = inlined_call_operand.hbm [shape: f32[512,512], index: 4, kind: input, shape index: {}]   ;;  %s6035_s5 = inlined_call_operand.vmem [shape: f32[8,512], index: 5, kind: input, shape index: {}]   ;;  %s6036_s6 = inlined_call_operand.vmem [shape: f32[512,8], index: 6, kind: input, shape index: {}]   ;;  %s6037_s7 = inlined_call_operand.hbm [shape: f32[512,512], index: 7, kind: output, shape index: {}]  }
   0x1   :  { %13 = vsyncpa [#allocation7], 0 }
   0x2   :  { %14 = vsyncpa [#allocation10], 0 }
   0x3   :  { %15 = vsyncpa [#allocation3], 0  ;;  %s33_s26 = sshll.u32 %s6031_s1, 4  ;;  %s34_s26 = int_to_ptr.vmem [resolvable:$true] %s33_s26 }
   0x4   :  { %16 = vsyncpa [#allocation4], 0  ;;  %s23_s29 = sshll.u32 %s6030_s0, 4  ;;  %s3785_s30 = scalar_lea.vmem %s34_s26, 16  ;;  %s24_s29 = int_to_ptr.vmem [resolvable:$true] %s23_s29 }
   0x5   :  { %p3786_p0 = scmp.ne.s32.totalorder %s34_s26, %s3785_s30  ;;  %p3790_p1 = scmp.lt.s32.totalorder %s34_s26, %s34_s26 }
   0x6   :  { %p3791_p2 = scmp.lt.s32.totalorder %s3785_s30, %s3785_s30 }
   0x8   :  { %p3792_p3 = por %p3791_p2, %p3790_p1 }
   0xa   :  { %p3793_p4 = pnand %p3792_p3, %p3786_p0 }
   0xc   :  { %3796 = shalt.err (!%p3793_p4)
}
   0xd   :  { %s3887_s8 = smov [#allocation6]   ;;  %s3797_s9 = scalar_lea.vmem %s24_s29, 16 }
   0xe   :  { %36 = dma.vmem_to_smem %s34_s26, 16, %s3887_s8, [#allocation7]  }
   0xf   :  { %p3798_p5 = scmp.ne.s32.totalorder %s24_s29, %s3797_s9  ;;  %p3802_p6 = scmp.lt.s32.totalorder %s24_s29, %s24_s29 }
  0x10   :  { %p3803_p7 = scmp.lt.s32.totalorder %s3797_s9, %s3797_s9 }
  0x12   :  { %p3804_p8 = por %p3803_p7, %p3802_p6 }
  0x14   :  { %p3805_p9 = pnand %p3804_p8, %p3798_p5 }
  0x16   :  { %3808 = shalt.err (!%p3805_p9)
}
  0x17   :  { %s3888_s1 = smov [#allocation2]   ;;  %s43_s11 = sshll.u32 %s6032_s2, 4  ;;  %s44_s11 = int_to_ptr.vmem [resolvable:$true] %s43_s11 }
  0x18   :  { %26 = dma.vmem_to_smem %s24_s29, 16, %s3888_s1, [#allocation5]  }
  0x19   :  { %s53_s14 = sshll.u32 %s6033_s3, 4  ;;  %s3809_s15 = scalar_lea.vmem %s44_s11, 16  ;;  %s54_s14 = int_to_ptr.vmem [resolvable:$true] %s53_s14 }
  0x1a   :  { %p3810_p10 = scmp.ne.s32.totalorder %s44_s11, %s3809_s15  ;;  %p3814_p11 = scmp.lt.s32.totalorder %s44_s11, %s44_s11 }
  0x1b   :  { %p3815_p12 = scmp.lt.s32.totalorder %s3809_s15, %s3809_s15 }
  0x1d   :  { %p3816_p13 = por %p3815_p12, %p3814_p11 }
  0x1f   :  { %p3817_p0 = pnand %p3816_p13, %p3810_p10 }
  0x21   :  { %3820 = shalt.err (!%p3817_p0)
}
  0x22   :  { %s3889_s16 = smov [#allocation8]   ;;  %s3821_s17 = scalar_lea.vmem %s54_s14, 16 }
  0x23   :  { %46 = dma.vmem_to_smem %s44_s11, 16, %s3889_s16, [#allocation7]  }
  0x24   :  { %p3822_p1 = scmp.ne.s32.totalorder %s54_s14, %s3821_s17  ;;  %p3826_p2 = scmp.lt.s32.totalorder %s54_s14, %s54_s14 }
  0x25   :  { %p3827_p3 = scmp.lt.s32.totalorder %s3821_s17, %s3821_s17 }
  0x27   :  { %p3828_p4 = por %p3827_p3, %p3826_p2 }
  0x29   :  { %p3829_p5 = pnand %p3828_p4, %p3822_p1 }
  0x2b   :  { %3832 = shalt.err (!%p3829_p5)
}
  0x2c   :  { %s3890_s2 = smov [#allocation9]   ;;  %s3891_s3 = smov [#allocation11]  }
  0x2d   :  { %56 = dma.vmem_to_smem %s54_s14, 16, %s3890_s2, [#allocation10]  }
  0x2e   :  { %s62_s18 = sshll.u32 %s3891_s3, 4  ;;  %s3833_s21 = scalar_lea.hbm %s6034_s4, 32768  ;;  %s63_s18 = int_to_ptr.vmem [resolvable:$true] %s62_s18 }
  0x2f   :  { %p3834_p6 = scmp.ne.s32.totalorder %s6034_s4, %s3833_s21  ;;  %p3837_p7 = scmp.lt.u32.totalorder %s3833_s21, %s6034_s4 }
  0x31   :  { %p3839_p8 = pnand %p3837_p7, %p3834_p6 }
  0x33   :  { %3842 = shalt.err (!%p3839_p8)
}
  0x34   :  { %s3843_s26 = scalar_lea.vmem %s63_s18, 32768  ;;  %p3848_p10 = scmp.lt.s32.totalorder %s63_s18, %s63_s18 }
  0x35   :  { %p3844_p9 = scmp.ne.s32.totalorder %s63_s18, %s3843_s26  ;;  %p3849_p11 = scmp.lt.s32.totalorder %s3843_s26, %s3843_s26 }
  0x37   :  { %p3850_p12 = por %p3849_p11, %p3848_p10 }
  0x39   :  { %p3851_p13 = pnand %p3850_p12, %p3844_p9 }
  0x3b   :  { %3854 = shalt.err (!%p3851_p13)
}
  0x3c   :  { %s3892_s27 = smov 512   ;;  %s3893_s28 = smov 32  }
  0x3d   :  { %68 = dma.hbm_to_vmem [thread:$0]  %s6034_s4, 32768, %s63_s18, [#allocation3], %s3892_s27, %s3892_s27, %s3893_s28  }
  0x3e   :  { %3877 = dma.done.wait [#allocation5], 16  }
  0x3f   :  { %3878 = vsyncadd [#allocation5], 4294967280 }
  0x40   :  { %3879 = dma.done.wait [#allocation7], 32  }
  0x41   :  { %3880 = vsyncadd [#allocation7], 4294967264 }
  0x42   :  { %3881 = dma.done.wait [#allocation10], 16  }
  0x43   :  { %3882 = vsyncadd [#allocation10], 4294967280 }
  0x44   :  { %3883 = dma.done.wait [#allocation3], 32768  }
  0x45   :  { %3884 = vsyncadd [#allocation3], 4294934528 }
  0x46   :  { %88 = sfence }
  0x47   :  { %v1760_v0 = vld [vmem:[%s6035_s5 + $0x8] sm:$0xff]  ;;  %v1762_v1 = vld [vmem:[%s6035_s5 + $0x18] sm:$0xff]  ;;  %v1759_v2 = vld [vmem:[%s6035_s5] sm:$0xff]  ;;  %vm1763_vm0 = vcmask 64512   ;;  %v6038_v5 = vmov 0.0   ;;  %s100_s19 = sld [smem:[#allocation8]]  ;;  %v90_v23 = vlaneseq }
  0x48   :  { %1956 = vmatprep.subr.mxu0 %v1760_v0  ;;  %2405 = vmatprep.subr.mxu1 %v1762_v1  ;;  %v1761_v3 = vld [vmem:[%s6035_s5 + $0x10] sm:$0xff]  ;;  %v1695_v4 = vld [vmem:[%s6036_s6] sm:$0xff]  ;;  %v1696_v6 = vld [vmem:[%s6036_s6 + $0x8] sm:$0xff]  ;;  %s3642_s20 = sld [smem:[#allocation8 + $0x1]]  ;;  %s106_s21 = sld [smem:[#allocation2]] }
  0x49   :  { %1957 = vmatpush1.msra.mxu0 %v1759_v2  ;;  %2020 = vmatprep.mubr.f32.mxu0 %v6038_v5  ;;  %v1697_v7 = vld [vmem:[%s6036_s6 + $0x10] sm:$0xff]  ;;  %v1698_v8 = vld [vmem:[%s6036_s6 + $0x18] sm:$0xff]  ;;  %v1699_v9 = vld [vmem:[%s6036_s6 + $0x20] sm:$0xff]  ;;  %s3643_s22 = sld [smem:[#allocation2 + $0x1]]  ;;  %s3644_s25 = sld [smem:[#allocation8 + $0x2]]  ;;  %v91_v25 = vand.u32 127, %v90_v23 }
  0x4a   :  { %2406 = vmatpush1.msra.mxu1 %v1761_v3  ;;  %2469 = vmatprep.mubr.f32.mxu1 %v6038_v5  ;;  %v1700_v10 = vld [vmem:[%s6036_s6 + $0x28] sm:$0xff]  ;;  %v1701_v11 = vld [vmem:[%s6036_s6 + $0x30] sm:$0xff]  ;;  %v1702_v12 = vld [vmem:[%s6036_s6 + $0x38] sm:$0xff]  ;;  %s279_s26 = sld [smem:[#allocation9]]  ;;  %s3645_s29 = sld [smem:[#allocation2 + $0x2]]  ;;  %v4124_v37 = vshrl.u32 %v90_v23, 7 }
  0x4b   :  { %3648 = vmatmul.mubr.msk.f32.vlgmr.msra.gmra.mrb[0].mxu0 %vm1763_vm0, %v1695_v4  ;;  %3712 = vmatmul.mubr.msk.f32.vlgmr.msra.gmra.mrb[0].mxu1 %vm1763_vm0, %v1695_v4  ;;  %v1703_v13 = vld [vmem:[%s6036_s6 + $0x40] sm:$0xff]  ;;  %v1704_v14 = vld [vmem:[%s6036_s6 + $0x48] sm:$0xff]  ;;  %v1705_v15 = vld [vmem:[%s6036_s6 + $0x50] sm:$0xff]  ;;  %s4106_s30 = sld [smem:[#allocation6]]  ;;  %s4108_s8 = sld [smem:[#allocation9 + $0x1]]  ;;  %v93_v26 = vadd.s32 256, %v91_v25 }
  0x4c   :  { %2026 = vmatprep.mubr.f32.mxu0 %v6038_v5  ;;  %2475 = vmatprep.mubr.f32.mxu1 %v6038_v5  ;;  %v1706_v16 = vld [vmem:[%s6036_s6 + $0x58] sm:$0xff]  ;;  %v1707_v17 = vld [vmem:[%s6036_s6 + $0x60] sm:$0xff]  ;;  %v1708_v18 = vld [vmem:[%s6036_s6 + $0x68] sm:$0xff]  ;;  %s4110_s9 = sld [smem:[#allocation6 + $0x1]]  ;;  %v92_v30 = vadd.s32 128, %v91_v25  ;;  %v4121_v31 = vadd.s32 384, %v91_v25 }
  0x4d   :  { %v1709_v19 = vld [vmem:[%s6036_s6 + $0x70] sm:$0xff]  ;;  %v1710_v20 = vld [vmem:[%s6036_s6 + $0x78] sm:$0xff]  ;;  %v1711_v21 = vld [vmem:[%s6036_s6 + $0x80] sm:$0xff]  ;;  %v101_v28 = vstv %s100_s19  ;;  %6042 = vst [vmem:[#allocation18_spill] sm:$0xff] %v4124_v37  ;;  %v151_v55 = vadd.s32 8, %v4124_v37 }
  0x4e   :  { %v1712_v22 = vld [vmem:[%s6036_s6 + $0x88] sm:$0xff]  ;;  %v1713_v24 = vld [vmem:[%s6036_s6 + $0x90] sm:$0xff]  ;;  %v1714_v27 = vld [vmem:[%s6036_s6 + $0x98] sm:$0xff]  ;;  %v4119_v29 = vstv %s3642_s20  ;;  %vm102_vm1 = vcmp.lt.s32.totalorder %v91_v25, %v101_v28  ;;  %vm104_vm6 = vcmp.lt.s32.totalorder %v93_v26, %v101_v28  ;;  %vm103_vm9 = vcmp.lt.s32.totalorder %v92_v30, %v101_v28 }
  0x4f   :  { %3649 = vmatmul.mubr.msk.f32.gmra.mrb[2].mxu0 %vm1763_vm0, %v1696_v6  ;;  %3713 = vmatmul.mubr.msk.f32.gmra.mrb[2].mxu1 %vm1763_vm0, %v1696_v6  ;;  %v107_v32 = vstv %s106_s21  ;;  %vm118_vm2 = vcmp.lt.s32.totalorder %v91_v25, %v4119_v29  ;;  %v123_v33 = vstv %s3643_s22  ;;  %v133_v36 = vstv %s3644_s25  ;;  %v1715_v41 = vld [vmem:[%s6036_s6 + $0xa0] sm:$0xff] }
  0x50   :  { %2032 = vmatprep.mubr.f32.mxu0 %v6038_v5  ;;  %2481 = vmatprep.mubr.f32.mxu1 %v6038_v5  ;;  %v108_v34 = vsel %vm102_vm1, %v107_v32, 0.0  ;;  %v124_v35 = vsel %vm118_vm2, %v123_v33, 0.0  ;;  %vm134_vm3 = vcmp.lt.s32.totalorder %v91_v25, %v133_v36  ;;  %v139_v39 = vstv %s3645_s29  ;;  %v1716_v53 = vld [vmem:[%s6036_s6 + $0xa8] sm:$0xff]  ;;  %v1717_v63 = vld [vmem:[%s6036_s6 + $0xb0] sm:$0xff]  ;;  %v1186_v25 = vld [vmem:[#allocation11 + $0x18] sm:$0xff] }
  0x51   :  { %v128_v38 = vadd.f32 %v124_v35, %v108_v34  ;;  %v4128_v40 = vstv %s279_s26  ;;  %v140_v42 = vsel %vm134_vm3, %v139_v39, 0.0  ;;  %v4138_v43 = vstv %s4106_s30  ;;  %v1188_v34 = vld [vmem:[#allocation11 + $0x28] sm:$0xff] }
  0x52   :  { %vm281_vm4 = vcmp.lt.s32.totalorder %v4124_v37, %v4128_v40  ;;  %v4141_v44 = vstv %s4108_s8  ;;  %v4149_v47 = vstv %s4110_s9  ;;  %vm120_vm7 = vcmp.lt.s32.totalorder %v93_v26, %v4119_v29 }
  0x53   :  { %3650 = vmatmul.mubr.msk.f32.gmra.mrb[4].mxu0 %vm1763_vm0, %v1697_v7  ;;  %3714 = vmatmul.mubr.msk.f32.gmra.mrb[4].mxu1 %vm1763_vm0, %v1697_v7  ;;  %v4143_v45 = vadd.f32 %v140_v42, %v128_v38  ;;  %v347_v46 = vsel %vm281_vm4, %v4138_v43, 0.0  ;;  %vm477_vm5 = vcmp.lt.s32.totalorder %v4124_v37, %v4141_v44  ;;  %vm136_vm8 = vcmp.lt.s32.totalorder %v93_v26, %v133_v36  ;;  %v1187_v26 = vld [vmem:[#allocation11 + $0x20] sm:$0xff] }
  0x54   :  { %2038 = vmatprep.mubr.f32.mxu0 %v6038_v5  ;;  %2487 = vmatprep.mubr.f32.mxu1 %v6038_v5  ;;  %v543_v48 = vsel %vm477_vm5, %v4149_v47, 0.0  ;;  %v110_v50 = vsel %vm104_vm6, %v107_v32, 0.0  ;;  %v126_v51 = vsel %vm120_vm7, %v123_v33, 0.0  ;;  %v142_v52 = vsel %vm136_vm8, %v139_v39, 0.0 }
  0x55   :  { %v607_v49 = vadd.f32 %v543_v48, %v347_v46  ;;  %v130_v54 = vadd.f32 %v126_v51, %v110_v50  ;;  %vm119_vm10 = vcmp.lt.s32.totalorder %v92_v30, %v4119_v29  ;;  %v109_v57 = vsel %vm103_vm9, %v107_v32, 0.0 }
  0x56   :  { %v125_v58 = vsel %vm119_vm10, %v123_v33, 0.0  ;;  %vm135_vm11 = vcmp.lt.s32.totalorder %v92_v30, %v133_v36  ;;  %vm105_vm12 = vcmp.lt.s32.totalorder %v4121_v31, %v101_v28  ;;  %vm121_vm13 = vcmp.lt.s32.totalorder %v4121_v31, %v4119_v29 }
  0x57   :  { %3651 = vmatmul.mubr.msk.f32.gmra.mrb[6].mxu0 %vm1763_vm0, %v1698_v8  ;;  %3715 = vmatmul.mubr.msk.f32.gmra.mrb[6].mxu1 %vm1763_vm0, %v1698_v8  ;;  %v671_v56 = vmul.f32 %v607_v49, %v4143_v45  ;;  %v4163_v59 = vadd.f32 %v142_v52, %v130_v54  ;;  %v129_v60 = vadd.f32 %v125_v58, %v109_v57  ;;  %v141_v61 = vsel %vm135_vm11, %v139_v39, 0.0 }
  0x58   :  { %2044 = vmatprep.mubr.f32.mxu0 %v6038_v5  ;;  %2493 = vmatprep.mubr.f32.mxu1 %v6038_v5  ;;  %v111_v62 = vsel %vm105_vm12, %v107_v32, 0.0  ;;  %vm137_vm14 = vcmp.lt.s32.totalorder %v4121_v31, %v133_v36  ;;  %v127_v2 = vsel %vm121_vm13, %v123_v33, 0.0  ;;  %vm282_vm15 = vcmp.lt.s32.totalorder %v151_v55, %v4128_v40  ;;  %v1189_v31 = vld [vmem:[#allocation11 + $0x30] sm:$0xff]  ;;  %v1719_v33 = vld [vmem:[%s6036_s6 + $0xc0] sm:$0xff]  ;;  %v1190_v36 = vld [vmem:[#allocation11 + $0x38] sm:$0xff] }
  0x59   :  { %v673_v0 = vmul.f32 %v607_v49, %v4163_v59  ;;  %v4177_v1 = vadd.f32 %v141_v61, %v129_v60  ;;  %v143_v3 = vsel %vm137_vm14, %v139_v39, 0.0  ;;  %v131_v4 = vadd.f32 %v127_v2, %v111_v62  ;;  %v1191_v62 = vld [vmem:[#allocation11 + $0x40] sm:$0xff] }
  0x5a   :  { %vm478_vm1 = vcmp.lt.s32.totalorder %v151_v55, %v4141_v44  ;;  %v927_v6 = vadd.f32 1.0, %v671_v56  ;;  %v348_v8 = vsel %vm282_vm15, %v4138_v43, 0.0  ;;  %v154_v55 = vadd.s32 32, %v4124_v37  ;;  %v1720_v56 = vld [vmem:[%s6036_s6 + $0xc8] sm:$0xff] }
  0x5b   :  { %3652 = vmatmul.mubr.msk.f32.gmra.mrb[8].mxu0 %vm1763_vm0, %v1699_v9  ;;  %3716 = vmatmul.mubr.msk.f32.gmra.mrb[8].mxu1 %vm1763_vm0, %v1699_v9  ;;  %v672_v7 = vmul.f32 %v607_v49, %v4177_v1  ;;  %v544_v9 = vsel %vm478_vm1, %v4149_v47, 0.0  ;;  %v155_v61 = vadd.s32 40, %v4124_v37 }
  0x5c   :  { %2050 = vmatprep.mubr.f32.mxu0 %v6038_v5  ;;  %2499 = vmatprep.mubr.f32.mxu1 %v6038_v5  ;;  %vm285_vm6 = vcmp.lt.s32.totalorder %v154_v55, %v4128_v40  ;;  %vm481_vm7 = vcmp.lt.s32.totalorder %v154_v55, %v4141_v44  ;;  %v1200_v55 = vld [vmem:[#allocation11 + $0x88] sm:$0xff] }
  0x5d   :  { %vm286_vm8 = vcmp.lt.s32.totalorder %v155_v61, %v4128_v40  ;;  %vm482_vm9 = vcmp.lt.s32.totalorder %v155_v61, %v4141_v44  ;;  %v1723_v61 = vld [vmem:[%s6036_s6 + $0xe0] sm:$0xff] }
  0x5f   :  { %3653 = vmatmul.mubr.msk.f32.gmra.mrb[10].mxu0 %vm1763_vm0, %v1700_v10  ;;  %3717 = vmatmul.mubr.msk.f32.gmra.mrb[10].mxu1 %vm1763_vm0, %v1700_v10  ;;  %v1183_v10 = vld [vmem:[#allocation11] sm:$0xff] }
  0x60   :  { %2056 = vmatprep.mubr.f32.mxu0 %v6038_v5  ;;  %2505 = vmatprep.mubr.f32.mxu1 %v6038_v5  ;;  %v4199_v23 = vmul.f32 %v1183_v10, %v927_v6  ;;  %v1721_v10 = vld [vmem:[%s6036_s6 + $0xd0] sm:$0xff] }
  0x63   :  { %3654 = vmatmul.mubr.msk.f32.gmra.mrb[12].mxu0 %vm1763_vm0, %v1701_v11  ;;  %3718 = vmatmul.mubr.msk.f32.gmra.mrb[12].mxu1 %vm1763_vm0, %v1701_v11  ;;  %v4186_v11 = vadd.f32 %v143_v3, %v131_v4 }
  0x64   :  { %2062 = vmatprep.mubr.f32.mxu0 %v6038_v5  ;;  %2511 = vmatprep.mubr.f32.mxu1 %v6038_v5 }
  0x67   :  { %3655 = vmatmul.mubr.msk.f32.gmra.mrb[14].mxu0 %vm1763_vm0, %v1702_v12  ;;  %3719 = vmatmul.mubr.msk.f32.gmra.mrb[14].mxu1 %vm1763_vm0, %v1702_v12  ;;  %v608_v12 = vadd.f32 %v544_v9, %v348_v8  ;;  %v1194_v8 = vld [vmem:[#allocation11 + $0x58] sm:$0xff]  ;;  %v351_v9 = vsel %vm285_vm6, %v4138_v43, 0.0 }
  0x68   :  { %2068 = vmatprep.mubr.f32.mxu0 %v6038_v5  ;;  %2517 = vmatprep.mubr.f32.mxu1 %v6038_v5 }
  0x6b   :  { %3656 = vmatmul.mubr.msk.f32.gmra.mrb[16].mxu0 %vm1763_vm0, %v1703_v13  ;;  %3720 = vmatmul.mubr.msk.f32.gmra.mrb[16].mxu1 %vm1763_vm0, %v1703_v13  ;;  %v152_v13 = vadd.s32 16, %v4124_v37 }
  0x6c   :  { %2074 = vmatprep.mubr.f32.mxu0 %v6038_v5  ;;  %2523 = vmatprep.mubr.f32.mxu1 %v6038_v5 }
  0x6d   :  { %vm283_vm2 = vcmp.lt.s32.totalorder %v152_v13, %v4128_v40  ;;  %vm479_vm3 = vcmp.lt.s32.totalorder %v152_v13, %v4141_v44 }
  0x6e   :  { %v349_v38 = vsel %vm283_vm2, %v4138_v43, 0.0  ;;  %v545_v39 = vsel %vm479_vm3, %v4149_v47, 0.0 }
  0x6f   :  { %3657 = vmatmul.mubr.msk.f32.gmra.mrb[18].mxu0 %vm1763_vm0, %v1704_v14  ;;  %3721 = vmatmul.mubr.msk.f32.gmra.mrb[18].mxu1 %vm1763_vm0, %v1704_v14  ;;  %v1718_v14 = vld [vmem:[%s6036_s6 + $0xb8] sm:$0xff]  ;;  %v609_v50 = vadd.f32 %v545_v39, %v349_v38 }
  0x70   :  { %2080 = vmatprep.mubr.f32.mxu0 %v6038_v5  ;;  %2529 = vmatprep.mubr.f32.mxu1 %v6038_v5 }
  0x71   :  { %v679_v57 = vmul.f32 %v609_v50, %v4143_v45  ;;  %v681_v58 = vmul.f32 %v609_v50, %v4163_v59  ;;  %v680_v60 = vmul.f32 %v609_v50, %v4177_v1  ;;  %v682_v2 = vmul.f32 %v609_v50, %v4186_v11 }
  0x73   :  { %3658 = vmatmul.mubr.msk.f32.gmra.mrb[20].mxu0 %vm1763_vm0, %v1705_v15  ;;  %3722 = vmatmul.mubr.msk.f32.gmra.mrb[20].mxu1 %vm1763_vm0, %v1705_v15  ;;  %v929_v15 = vadd.f32 1.0, %v673_v0  ;;  %v1192_v0 = vld [vmem:[#allocation11 + $0x48] sm:$0xff]  ;;  %v935_v4 = vadd.f32 1.0, %v679_v57  ;;  %v937_v6 = vadd.f32 1.0, %v681_v58  ;;  %v548_v57 = vsel %vm482_vm9, %v4149_v47, 0.0 }
  0x74   :  { %2086 = vmatprep.mubr.f32.mxu0 %v6038_v5  ;;  %2535 = vmatprep.mubr.f32.mxu1 %v6038_v5  ;;  %v156_v58 = vadd.s32 48, %v4124_v37 }
  0x76   :  { %vm287_vm10 = vcmp.lt.s32.totalorder %v156_v58, %v4128_v40  ;;  %vm483_vm11 = vcmp.lt.s32.totalorder %v156_v58, %v4141_v44 }
  0x77   :  { %3659 = vmatmul.mubr.msk.f32.gmra.mrb[22].mxu0 %vm1763_vm0, %v1706_v16  ;;  %3723 = vmatmul.mubr.msk.f32.gmra.mrb[22].mxu1 %vm1763_vm0, %v1706_v16  ;;  %v928_v16 = vadd.f32 1.0, %v672_v7  ;;  %v936_v7 = vadd.f32 1.0, %v680_v60  ;;  %v157_v60 = vadd.s32 56, %v4124_v37 }
  0x78   :  { %2092 = vmatprep.mubr.f32.mxu0 %v6038_v5  ;;  %2541 = vmatprep.mubr.f32.mxu1 %v6038_v5 }
  0x79   :  { %vm288_vm12 = vcmp.lt.s32.totalorder %v157_v60, %v4128_v40  ;;  %vm484_vm13 = vcmp.lt.s32.totalorder %v157_v60, %v4141_v44 }
  0x7b   :  { %3660 = vmatmul.mubr.msk.f32.gmra.mrb[24].mxu0 %vm1763_vm0, %v1707_v17  ;;  %3724 = vmatmul.mubr.msk.f32.gmra.mrb[24].mxu1 %vm1763_vm0, %v1707_v17  ;;  %v153_v17 = vadd.s32 24, %v4124_v37 }
  0x7c   :  { %2098 = vmatprep.mubr.f32.mxu0 %v6038_v5  ;;  %2547 = vmatprep.mubr.f32.mxu1 %v6038_v5 }
  0x7d   :  { %vm284_vm4 = vcmp.lt.s32.totalorder %v153_v17, %v4128_v40  ;;  %vm480_vm5 = vcmp.lt.s32.totalorder %v153_v17, %v4141_v44 }
  0x7e   :  { %v350_v51 = vsel %vm284_vm4, %v4138_v43, 0.0  ;;  %v546_v54 = vsel %vm480_vm5, %v4149_v47, 0.0 }
  0x7f   :  { %3661 = vmatmul.mubr.msk.f32.gmra.mrb[26].mxu0 %vm1763_vm0, %v1708_v18  ;;  %3725 = vmatmul.mubr.msk.f32.gmra.mrb[26].mxu1 %vm1763_vm0, %v1708_v18  ;;  %v1185_v18 = vld [vmem:[#allocation11 + $0x10] sm:$0xff]  ;;  %v610_v3 = vadd.f32 %v546_v54, %v350_v51  ;;  %v1199_v51 = vld [vmem:[#allocation11 + $0x80] sm:$0xff] }
  0x80   :  { %2104 = vmatprep.mubr.f32.mxu0 %v6038_v5  ;;  %2553 = vmatprep.mubr.f32.mxu1 %v6038_v5  ;;  %v1201_v54 = vld [vmem:[#allocation11 + $0x90] sm:$0xff] }
  0x81   :  { %v683_v13 = vmul.f32 %v610_v3, %v4143_v45 }
  0x83   :  { %3662 = vmatmul.mubr.msk.f32.gmra.mrb[28].mxu0 %vm1763_vm0, %v1709_v19  ;;  %3726 = vmatmul.mubr.msk.f32.gmra.mrb[28].mxu1 %vm1763_vm0, %v1709_v19  ;;  %v674_v19 = vmul.f32 %v607_v49, %v4186_v11 }
  0x84   :  { %2110 = vmatprep.mubr.f32.mxu0 %v6038_v5  ;;  %2559 = vmatprep.mubr.f32.mxu1 %v6038_v5 }
  0x85   :  { %v930_v28 = vadd.f32 1.0, %v674_v19  ;;  %v1195_v19 = vld [vmem:[#allocation11 + $0x60] sm:$0xff] }
  0x87   :  { %3663 = vmatmul.mubr.msk.f32.gmra.mrb[30].mxu0 %vm1763_vm0, %v1710_v20  ;;  %3727 = vmatmul.mubr.msk.f32.gmra.mrb[30].mxu1 %vm1763_vm0, %v1710_v20  ;;  %v675_v20 = vmul.f32 %v608_v12, %v4143_v45  ;;  %v4218_v46 = vmul.f32 %v1186_v25, %v930_v28  ;;  %v939_v25 = vadd.f32 1.0, %v683_v13  ;;  %v686_v28 = vmul.f32 %v610_v3, %v4186_v11 }
  0x88   :  { %2116 = vmatprep.mubr.f32.mxu0 %v6038_v5  ;;  %2565 = vmatprep.mubr.f32.mxu1 %v6038_v5 }
  0x89   :  { %v931_v29 = vadd.f32 1.0, %v675_v20  ;;  %v1197_v20 = vld [vmem:[#allocation11 + $0x70] sm:$0xff] }
  0x8b   :  { %3664 = vmatmul.mubr.msk.f32.gmra.mrb[32].mxu0 %vm1763_vm0, %v1711_v21  ;;  %3728 = vmatmul.mubr.msk.f32.gmra.mrb[32].mxu1 %vm1763_vm0, %v1711_v21  ;;  %v677_v21 = vmul.f32 %v608_v12, %v4163_v59  ;;  %v4220_v48 = vmul.f32 %v1187_v26, %v931_v29 }
  0x8c   :  { %2122 = vmatprep.mubr.f32.mxu0 %v6038_v5  ;;  %2571 = vmatprep.mubr.f32.mxu1 %v6038_v5 }
  0x8d   :  { %v933_v30 = vadd.f32 1.0, %v677_v21  ;;  %v1196_v21 = vld [vmem:[#allocation11 + $0x68] sm:$0xff] }
  0x8f   :  { %3665 = vmatmul.mubr.msk.f32.gmra.mrb[34].mxu0 %vm1763_vm0, %v1712_v22  ;;  %3729 = vmatmul.mubr.msk.f32.gmra.mrb[34].mxu1 %vm1763_vm0, %v1712_v22  ;;  %v676_v22 = vmul.f32 %v608_v12, %v4177_v1  ;;  %v4222_v49 = vmul.f32 %v1189_v31, %v933_v30  ;;  %v4273_v30 = vmul.f32 %v1195_v19, %v939_v25  ;;  %v1203_v19 = vld [vmem:[#allocation11 + $0xa0] sm:$0xff]  ;;  %v549_v25 = vsel %vm483_vm11, %v4149_v47, 0.0 }
  0x90   :  { %2128 = vmatprep.mubr.f32.mxu0 %v6038_v5  ;;  %2577 = vmatprep.mubr.f32.mxu1 %v6038_v5 }
  0x91   :  { %v932_v32 = vadd.f32 1.0, %v676_v22  ;;  %v547_v22 = vsel %vm481_vm7, %v4149_v47, 0.0 }
  0x92   :  { %v611_v29 = vadd.f32 %v547_v22, %v351_v9 }
  0x93   :  { %3666 = vmatmul.mubr.msk.f32.gmra.mrb[36].mxu0 %vm1763_vm0, %v1713_v24  ;;  %3730 = vmatmul.mubr.msk.f32.gmra.mrb[36].mxu1 %vm1763_vm0, %v1713_v24  ;;  %v1184_v24 = vld [vmem:[#allocation11 + $0x8] sm:$0xff]  ;;  %v4228_v52 = vmul.f32 %v1188_v34, %v932_v32  ;;  %v352_v34 = vsel %vm286_vm8, %v4138_v43, 0.0 }
  0x94   :  { %2134 = vmatprep.mubr.f32.mxu0 %v6038_v5  ;;  %2583 = vmatprep.mubr.f32.mxu1 %v6038_v5  ;;  %v4216_v42 = vmul.f32 %v1184_v24, %v928_v16  ;;  %v4257_v16 = vmul.f32 %v1191_v62, %v935_v4  ;;  %v687_v38 = vmul.f32 %v611_v29, %v4143_v45 }
  0x95   :  { %v689_v39 = vmul.f32 %v611_v29, %v4163_v59  ;;  %v688_v50 = vmul.f32 %v611_v29, %v4177_v1 }
  0x97   :  { %3667 = vmatmul.mubr.msk.f32.gmra.mrb[38].mxu0 %vm1763_vm0, %v1714_v27  ;;  %3731 = vmatmul.mubr.msk.f32.gmra.mrb[38].mxu1 %vm1763_vm0, %v1714_v27  ;;  %v678_v27 = vmul.f32 %v608_v12, %v4186_v11  ;;  %v938_v12 = vadd.f32 1.0, %v682_v2  ;;  %v944_v2 = vadd.f32 1.0, %v688_v50 }
  0x98   :  { %2140 = vmatprep.mubr.f32.mxu0 %v6038_v5  ;;  %2589 = vmatprep.mubr.f32.mxu1 %v6038_v5 }
  0x99   :  { %v934_v35 = vadd.f32 1.0, %v678_v27  ;;  %v4266_v24 = vmul.f32 %v1194_v8, %v938_v12  ;;  %v4309_v9 = vmul.f32 %v1200_v55, %v944_v2  ;;  %v1209_v2 = vld [vmem:[#allocation11 + $0xd0] sm:$0xff] }
  0x9b   :  { %3668 = vmatmul.mubr.msk.f32.gmra.mrb[40].mxu0 %vm1763_vm0, %v1715_v41  ;;  %3732 = vmatmul.mubr.msk.f32.gmra.mrb[40].mxu1 %vm1763_vm0, %v1715_v41  ;;  %v4214_v41 = vmul.f32 %v1185_v18, %v929_v15  ;;  %v684_v15 = vmul.f32 %v610_v3, %v4177_v1  ;;  %v4261_v18 = vmul.f32 %v1192_v0, %v936_v7  ;;  %v945_v0 = vadd.f32 1.0, %v689_v39 }
  0x9c   :  { %2146 = vmatprep.mubr.f32.mxu0 %v6038_v5  ;;  %2595 = vmatprep.mubr.f32.mxu1 %v6038_v5  ;;  %v158_v39 = vadd.s32 64, %v4124_v37 }
  0x9d   :  { %v940_v27 = vadd.f32 1.0, %v684_v15  ;;  %v4307_v8 = vmul.f32 %v1201_v54, %v945_v0 }
  0x9e   :  { %vm289_vm14 = vcmp.lt.s32.totalorder %v158_v39, %v4128_v40  ;;  %vm485_vm15 = vcmp.lt.s32.totalorder %v158_v39, %v4141_v44 }
  0x9f   :  { %3669 = vmatmul.mubr.msk.f32.gmra.mrb[42].mxu0 %vm1763_vm0, %v1716_v53  ;;  %3733 = vmatmul.mubr.msk.f32.gmra.mrb[42].mxu1 %vm1763_vm0, %v1716_v53  ;;  %v4230_v53 = vmul.f32 %v1190_v36, %v934_v35  ;;  %v4277_v32 = vmul.f32 %v1196_v21, %v940_v27  ;;  %v1722_v35 = vld [vmem:[%s6036_s6 + $0xd8] sm:$0xff]  ;;  %v942_v36 = vadd.f32 1.0, %v686_v28  ;;  %v1204_v21 = vld [vmem:[#allocation11 + $0xa8] sm:$0xff] }
  0xa0   :  { %2152 = vmatprep.mubr.f32.mxu0 %v6038_v5  ;;  %2601 = vmatprep.mubr.f32.mxu1 %v6038_v5 }
  0xa3   :  { %3670 = vmatmul.mubr.msk.f32.gmra.mrb[44].mxu0 %vm1763_vm0, %v1717_v63  ;;  %3734 = vmatmul.mubr.msk.f32.gmra.mrb[44].mxu1 %vm1763_vm0, %v1717_v63  ;;  %v1193_v63 = vld [vmem:[#allocation11 + $0x50] sm:$0xff] }
  0xa4   :  { %2158 = vmatprep.mubr.f32.mxu0 %v6038_v5  ;;  %2607 = vmatprep.mubr.f32.mxu1 %v6038_v5  ;;  %v4259_v17 = vmul.f32 %v1193_v63, %v937_v6  ;;  %v943_v63 = vadd.f32 1.0, %v687_v38  ;;  %v612_v6 = vadd.f32 %v548_v57, %v352_v34  ;;  %v1724_v34 = vld [vmem:[%s6036_s6 + $0xe8] sm:$0xff]  ;;  %v550_v38 = vsel %vm484_vm13, %v4149_v47, 0.0  ;;  %v1207_v57 = vld [vmem:[#allocation11 + $0xc0] sm:$0xff] }
  0xa6   :  { %v4305_v7 = vmul.f32 %v1199_v51, %v943_v63  ;;  %v691_v13 = vmul.f32 %v612_v6, %v4143_v45  ;;  %v692_v15 = vmul.f32 %v612_v6, %v4177_v1  ;;  %v694_v22 = vmul.f32 %v612_v6, %v4186_v11 }
  0xa7   :  { %3671 = vmatmul.mubr.msk.f32.gmra.mrb[46].mxu0 %vm1763_vm0, %v1718_v14  ;;  %3735 = vmatmul.mubr.msk.f32.gmra.mrb[46].mxu1 %vm1763_vm0, %v1718_v14  ;;  %v685_v14 = vmul.f32 %v610_v3, %v4163_v59  ;;  %v1202_v3 = vld [vmem:[#allocation11 + $0x98] sm:$0xff] }
  0xa8   :  { %2164 = vmatprep.mubr.f32.mxu0 %v6038_v5  ;;  %2613 = vmatprep.mubr.f32.mxu1 %v6038_v5  ;;  %v948_v28 = vadd.f32 1.0, %v692_v15  ;;  %v355_v15 = vsel %vm289_vm14, %v4138_v43, 0.0 }
  0xa9   :  { %v941_v26 = vadd.f32 1.0, %v685_v14  ;;  %v693_v14 = vmul.f32 %v612_v6, %v4163_v59 }
  0xaa   :  { %v4337_v54 = vmul.f32 %v1204_v21, %v948_v28  ;;  %v1211_v28 = vld [vmem:[#allocation11 + $0xe0] sm:$0xff] }
  0xab   :  { %3672 = vmatmul.mubr.msk.f32.gmra.mrb[48].mxu0 %vm1763_vm0, %v1719_v33  ;;  %3736 = vmatmul.mubr.msk.f32.gmra.mrb[48].mxu1 %vm1763_vm0, %v1719_v33  ;;  %v4275_v31 = vmul.f32 %v1197_v20, %v941_v26  ;;  %v1198_v33 = vld [vmem:[#allocation11 + $0x78] sm:$0xff]  ;;  %v1205_v20 = vld [vmem:[#allocation11 + $0xb0] sm:$0xff]  ;;  %v947_v26 = vadd.f32 1.0, %v691_v13  ;;  %v949_v27 = vadd.f32 1.0, %v693_v14 }
  0xac   :  { %2170 = vmatprep.mubr.f32.mxu0 %v6038_v5  ;;  %2619 = vmatprep.mubr.f32.mxu1 %v6038_v5  ;;  %v4294_v62 = vmul.f32 %v1198_v33, %v942_v36  ;;  %v354_v36 = vsel %vm288_vm12, %v4138_v43, 0.0  ;;  %6044 = vst [vmem:[#allocation20_spill] sm:$0xff] %v4337_v54 }
  0xad   :  { %v4333_v50 = vmul.f32 %v1203_v19, %v947_v26  ;;  %v4335_v51 = vmul.f32 %v1205_v20, %v949_v27  ;;  %v614_v6 = vadd.f32 %v550_v38, %v354_v36 }
  0xaf   :  { %3673 = vmatmul.mubr.msk.f32.gmra.mrb[50].mxu0 %vm1763_vm0, %v1720_v56  ;;  %3737 = vmatmul.mubr.msk.f32.gmra.mrb[50].mxu1 %vm1763_vm0, %v1720_v56  ;;  %v690_v56 = vmul.f32 %v611_v29, %v4186_v11  ;;  %v1206_v29 = vld [vmem:[#allocation11 + $0xb8] sm:$0xff]  ;;  %6043 = vst [vmem:[#allocation19_spill] sm:$0xff] %v4335_v51  ;;  %v699_v20 = vmul.f32 %v614_v6, %v4143_v45 }
  0xb0   :  { %2176 = vmatprep.mubr.f32.mxu0 %v6038_v5  ;;  %2625 = vmatprep.mubr.f32.mxu1 %v6038_v5  ;;  %v701_v21 = vmul.f32 %v614_v6, %v4163_v59  ;;  %v1262_v51 = vld [vmem:[#allocation11 + $0x278] sm:$0xff] }
  0xb1   :  { %v946_v4 = vadd.f32 1.0, %v690_v56 }
  0xb2   :  { %v957_v36 = vadd.f32 1.0, %v701_v21  ;;  %v1216_v21 = vld [vmem:[#allocation11 + $0x108] sm:$0xff] }
  0xb3   :  { %3674 = vmatmul.mubr.msk.f32.gmra.mrb[52].mxu0 %vm1763_vm0, %v1721_v10  ;;  %3738 = vmatmul.mubr.msk.f32.gmra.mrb[52].mxu1 %vm1763_vm0, %v1721_v10  ;;  %v353_v10 = vsel %vm287_vm10, %v4138_v43, 0.0  ;;  %v4312_v12 = vmul.f32 %v1202_v3, %v946_v4  ;;  %v1208_v3 = vld [vmem:[#allocation11 + $0xc8] sm:$0xff]  ;;  %v1210_v4 = vld [vmem:[#allocation11 + $0xd8] sm:$0xff] }
  0xb4   :  { %2182 = vmatprep.mubr.f32.mxu0 %v6038_v5  ;;  %2631 = vmatprep.mubr.f32.mxu1 %v6038_v5  ;;  %v613_v33 = vadd.f32 %v549_v25, %v353_v10 }
  0xb6   :  { %v695_v55 = vmul.f32 %v613_v33, %v4143_v45  ;;  %v697_v58 = vmul.f32 %v613_v33, %v4163_v59  ;;  %v696_v60 = vmul.f32 %v613_v33, %v4177_v1  ;;  %v698_v63 = vmul.f32 %v613_v33, %v4186_v11  ;;  %v1212_v33 = vld [vmem:[#allocation11 + $0xe8] sm:$0xff] }
  0xb7   :  { %3675 = vmatmul.mubr.msk.f32.gmra.mrb[54].mxu0 %vm1763_vm0, %v1722_v35  ;;  %3739 = vmatmul.mubr.msk.f32.gmra.mrb[54].mxu1 %vm1763_vm0, %v1722_v35  ;;  %v950_v35 = vadd.f32 1.0, %v694_v22  ;;  %v700_v22 = vmul.f32 %v614_v6, %v4177_v1 }
  0xb8   :  { %2188 = vmatprep.mubr.f32.mxu0 %v6038_v5  ;;  %2637 = vmatprep.mubr.f32.mxu1 %v6038_v5  ;;  %v951_v0 = vadd.f32 1.0, %v695_v55  ;;  %v953_v10 = vadd.f32 1.0, %v697_v58  ;;  %v952_v13 = vadd.f32 1.0, %v696_v60  ;;  %v954_v14 = vadd.f32 1.0, %v698_v63  ;;  %v1214_v55 = vld [vmem:[#allocation11 + $0xf8] sm:$0xff] }
  0xb9   :  { %v4340_v56 = vmul.f32 %v1206_v29, %v950_v35  ;;  %v1213_v29 = vld [vmem:[#allocation11 + $0xf0] sm:$0xff]  ;;  %v955_v35 = vadd.f32 1.0, %v699_v20  ;;  %v956_v38 = vadd.f32 1.0, %v700_v22  ;;  %v1726_v58 = vld [vmem:[%s6036_s6 + $0xf8] sm:$0xff] }
  0xba   :  { %v4355_v19 = vmul.f32 %v1207_v57, %v951_v0  ;;  %v4360_v25 = vmul.f32 %v1209_v2, %v953_v10  ;;  %v4362_v26 = vmul.f32 %v1208_v3, %v952_v13  ;;  %v4364_v27 = vmul.f32 %v1210_v4, %v954_v14  ;;  %v1217_v20 = vld [vmem:[#allocation11 + $0x110] sm:$0xff] }
  0xbb   :  { %3676 = vmatmul.mubr.msk.f32.gmra.mrb[56].mxu0 %vm1763_vm0, %v1723_v61  ;;  %3740 = vmatmul.mubr.msk.f32.gmra.mrb[56].mxu1 %vm1763_vm0, %v1723_v61  ;;  %6045 = vst [vmem:[#allocation21_spill] sm:$0xff] %v4340_v56  ;;  %v1725_v61 = vld [vmem:[%s6036_s6 + $0xf0] sm:$0xff]  ;;  %v551_v57 = vsel %vm485_vm15, %v4149_v47, 0.0  ;;  %v159_v0 = vadd.s32 72, %v4124_v37  ;;  %v160_v2 = vadd.s32 80, %v4124_v37  ;;  %v4379_v3 = vmul.f32 %v1211_v28, %v955_v35 }
  0xbc   :  { %2194 = vmatprep.mubr.f32.mxu0 %v6038_v5  ;;  %2643 = vmatprep.mubr.f32.mxu1 %v6038_v5  ;;  %6046 = vst [vmem:[#allocation22_spill] sm:$0xff] %v4355_v19  ;;  %6047 = vst [vmem:[#allocation23_spill] sm:$0xff] %v4360_v25  ;;  %v615_v63 = vadd.f32 %v551_v57, %v355_v15  ;;  %v4381_v4 = vmul.f32 %v1213_v29, %v957_v36  ;;  %v1215_v15 = vld [vmem:[#allocation11 + $0x100] sm:$0xff]  ;;  %v4397_v28 = vadd.s32 96, %v4124_v37  ;;  %v1218_v36 = vld [vmem:[#allocation11 + $0x118] sm:$0xff] }
  0xbd   :  { %6048 = vst [vmem:[#allocation24_spill] sm:$0xff] %v4362_v26  ;;  %6049 = vst [vmem:[#allocation25_spill] sm:$0xff] %v4364_v27  ;;  %v4383_v39 = vmul.f32 %v1212_v33, %v956_v38  ;;  %vm290_vm1 = vcmp.lt.s32.totalorder %v159_v0, %v4128_v40  ;;  %vm486_vm2 = vcmp.lt.s32.totalorder %v159_v0, %v4141_v44  ;;  %v1727_v29 = vld [vmem:[%s6036_s6 + $0x100] sm:$0xff]  ;;  %v1254_v25 = vld [vmem:[#allocation11 + $0x238] sm:$0xff] }
  0xbe   :  { %6050 = vst [vmem:[#allocation26_spill] sm:$0xff] %v4379_v3  ;;  %6051 = vst [vmem:[#allocation27_spill] sm:$0xff] %v4381_v4  ;;  %v703_v10 = vmul.f32 %v615_v63, %v4143_v45  ;;  %v705_v13 = vmul.f32 %v615_v63, %v4163_v59  ;;  %v704_v14 = vmul.f32 %v615_v63, %v4177_v1  ;;  %v356_v38 = vsel %vm290_vm1, %v4138_v43, 0.0 }
  0xbf   :  { %3677 = vmatmul.mubr.msk.f32.gmra.mrb[58].mxu0 %vm1763_vm0, %v1724_v34  ;;  %3741 = vmatmul.mubr.msk.f32.gmra.mrb[58].mxu1 %vm1763_vm0, %v1724_v34  ;;  %v702_v34 = vmul.f32 %v614_v6, %v4186_v11  ;;  %6052 = vst [vmem:[#allocation28_spill] sm:$0xff] %v4383_v39  ;;  %v161_v6 = vadd.s32 88, %v4124_v37  ;;  %v706_v22 = vmul.f32 %v615_v63, %v4186_v11  ;;  %v552_v57 = vsel %vm486_vm2, %v4149_v47, 0.0 }
  0xc0   :  { %2200 = vmatprep.mubr.f32.mxu0 %v6038_v5  ;;  %2649 = vmatprep.mubr.f32.mxu1 %v6038_v5  ;;  %v959_v33 = vadd.f32 1.0, %v703_v10  ;;  %v960_v35 = vadd.f32 1.0, %v704_v14  ;;  %vm291_vm3 = vcmp.lt.s32.totalorder %v160_v2, %v4128_v40  ;;  %vm487_vm4 = vcmp.lt.s32.totalorder %v160_v2, %v4141_v44  ;;  %v1728_v2 = vld [vmem:[%s6036_s6 + $0x108] sm:$0xff] }
  0xc1   :  { %v958_v60 = vadd.f32 1.0, %v702_v34  ;;  %v961_v34 = vadd.f32 1.0, %v705_v13  ;;  %v616_v0 = vadd.f32 %v552_v57, %v356_v38  ;;  %v357_v13 = vsel %vm291_vm3, %v4138_v43, 0.0 }
  0xc2   :  { %v4412_v63 = vmul.f32 %v1216_v21, %v960_v35  ;;  %v553_v14 = vsel %vm487_vm4, %v4149_v47, 0.0  ;;  %vm292_vm5 = vcmp.lt.s32.totalorder %v161_v6, %v4128_v40  ;;  %vm488_vm6 = vcmp.lt.s32.totalorder %v161_v6, %v4141_v44 }
  0xc3   :  { %3678 = vmatmul.mubr.msk.f32.gmra.mrb[60].mxu0 %vm1763_vm0, %v1725_v61  ;;  %3742 = vmatmul.mubr.msk.f32.gmra.mrb[60].mxu1 %vm1763_vm0, %v1725_v61  ;;  %v4386_v61 = vmul.f32 %v1214_v55, %v958_v60  ;;  %v962_v55 = vadd.f32 1.0, %v706_v22  ;;  %v4410_v60 = vmul.f32 %v1217_v20, %v961_v34  ;;  %v709_v20 = vmul.f32 %v616_v0, %v4163_v59  ;;  %v1220_v34 = vld [vmem:[#allocation11 + $0x128] sm:$0xff] }
  0xc4   :  { %2206 = vmatprep.mubr.f32.mxu0 %v6038_v5  ;;  %2655 = vmatprep.mubr.f32.mxu1 %v6038_v5  ;;  %6056 = vst [vmem:[#allocation32_spill] sm:$0xff] %v4412_v63  ;;  %v708_v21 = vmul.f32 %v616_v0, %v4177_v1  ;;  %v358_v22 = vsel %vm292_vm5, %v4138_v43, 0.0  ;;  %v710_v35 = vmul.f32 %v616_v0, %v4186_v11 }
  0xc5   :  { %6053 = vst [vmem:[#allocation29_spill] sm:$0xff] %v4386_v61  ;;  %6055 = vst [vmem:[#allocation31_spill] sm:$0xff] %v4410_v60  ;;  %v4416_v10 = vmul.f32 %v1218_v36, %v962_v55  ;;  %v617_v36 = vadd.f32 %v553_v14, %v357_v13  ;;  %vm293_vm7 = vcmp.lt.s32.totalorder %v4397_v28, %v4128_v40  ;;  %v965_v55 = vadd.f32 1.0, %v709_v20  ;;  %v1223_v60 = vld [vmem:[#allocation11 + $0x140] sm:$0xff]  ;;  %v1224_v61 = vld [vmem:[#allocation11 + $0x148] sm:$0xff] }
  0xc6   :  { %v964_v57 = vadd.f32 1.0, %v708_v21  ;;  %v966_v13 = vadd.f32 1.0, %v710_v35  ;;  %v6058_v20 = vmov 0.0   ;;  %v359_v35 = vsel %vm293_vm7, %v4138_v43, 0.0 }
  0xc7   :  { %3679 = vmatmul.mubr.msk.f32.gmra.mrb[62].mxu0 %vm1763_vm0, %v1726_v58  ;;  %3743 = vmatmul.mubr.msk.f32.gmra.mrb[62].mxu1 %vm1763_vm0, %v1726_v58  ;;  %v4408_v58 = vmul.f32 %v1215_v15, %v959_v33  ;;  %6057 = vst [vmem:[#allocation33_spill] sm:$0xff] %v4416_v10  ;;  %v707_v15 = vmul.f32 %v616_v0, %v4143_v45  ;;  %v1221_v33 = vld [vmem:[#allocation11 + $0x130] sm:$0xff]  ;;  %v554_v10 = vsel %vm488_vm6, %v4149_v47, 0.0 }
  0xc8   :  { %2212 = vmatprep.mubr.f32.mxu0 %v6038_v5  ;;  %2661 = vmatprep.mubr.f32.mxu1 %v6038_v5  ;;  %v1729_v0 = vld [vmem:[%s6036_s6 + $0x110] sm:$0xff]  ;;  %v711_v6 = vmul.f32 %v617_v36, %v4143_v45  ;;  %v713_v14 = vmul.f32 %v617_v36, %v4163_v59  ;;  %v4447_v63 = vmul.f32 %v1221_v33, %v965_v55  ;;  %v163_v33 = vadd.s32 104, %v4124_v37 }
  0xc9   :  { %6054 = vst [vmem:[#allocation30_spill] sm:$0xff] %v4408_v58  ;;  %v963_v38 = vadd.f32 1.0, %v707_v15  ;;  %v712_v15 = vmul.f32 %v617_v36, %v4177_v1  ;;  %v1225_v58 = vld [vmem:[#allocation11 + $0x150] sm:$0xff]  ;;  %vm489_vm8 = vcmp.lt.s32.totalorder %v4397_v28, %v4141_v44  ;;  %v1730_v28 = vld [vmem:[%s6036_s6 + $0x118] sm:$0xff] }
  0xca   :  { %6060 = vst [vmem:[#allocation35_spill] sm:$0xff] %v4447_v63  ;;  %v967_v4 = vadd.f32 1.0, %v711_v6  ;;  %v969_v3 = vadd.f32 1.0, %v713_v14  ;;  %vm294_vm9 = vcmp.lt.s32.totalorder %v163_v33, %v4128_v40  ;;  %vm490_vm10 = vcmp.lt.s32.totalorder %v163_v33, %v4141_v44  ;;  %v1732_v33 = vld [vmem:[%s6036_s6 + $0x128] sm:$0xff] }
  0xcb   :  { %3680 = vmatmul.mubr.msk.f32.gmra.mrb[64].mxu0 %vm1763_vm0, %v1727_v29  ;;  %3744 = vmatmul.mubr.msk.f32.gmra.mrb[64].mxu1 %vm1763_vm0, %v1727_v29  ;;  %v1219_v29 = vld [vmem:[#allocation11 + $0x120] sm:$0xff]  ;;  %v968_v27 = vadd.f32 1.0, %v712_v15 }
  0xcc   :  { %2218 = vmatprep.mubr.f32.mxu0 %v6038_v5  ;;  %2667 = vmatprep.mubr.f32.mxu1 %v6038_v5  ;;  %v1222_v5 = vld [vmem:[#allocation11 + $0x138] sm:$0xff]  ;;  %v4445_v21 = vmul.f32 %v1219_v29, %v963_v38  ;;  %v714_v29 = vmul.f32 %v617_v36, %v4186_v11  ;;  %v618_v38 = vadd.f32 %v554_v10, %v358_v22 }
  0xcd   :  { %v4455_v39 = vmul.f32 %v1222_v5, %v966_v13  ;;  %v4465_v55 = vmul.f32 %v1225_v58, %v969_v3  ;;  %v4467_v5 = vmul.f32 %v1224_v61, %v968_v27  ;;  %v555_v13 = vsel %vm489_vm8, %v4149_v47, 0.0  ;;  %v1227_v27 = vld [vmem:[#allocation11 + $0x160] sm:$0xff]  ;;  %v1229_v61 = vld [vmem:[#allocation11 + $0x170] sm:$0xff]  ;;  %v1228_v58 = vld [vmem:[#allocation11 + $0x168] sm:$0xff] }
  0xce   :  { %6059 = vst [vmem:[#allocation34_spill] sm:$0xff] %v4445_v21  ;;  %v970_v10 = vadd.f32 1.0, %v714_v29  ;;  %v715_v22 = vmul.f32 %v618_v38, %v4143_v45  ;;  %v716_v3 = vmul.f32 %v618_v38, %v4177_v1  ;;  %v619_v36 = vadd.f32 %v555_v13, %v359_v35  ;;  %v1230_v29 = vld [vmem:[#allocation11 + $0x178] sm:$0xff]  ;;  %v1239_v21 = vld [vmem:[#allocation11 + $0x1c0] sm:$0xff] }
  0xcf   :  { %3681 = vmatmul.mubr.msk.f32.gmra.mrb[66].mxu0 %vm1763_vm0, %v1728_v2  ;;  %3745 = vmatmul.mubr.msk.f32.gmra.mrb[66].mxu1 %vm1763_vm0, %v1728_v2  ;;  %v4449_v2 = vmul.f32 %v1220_v34, %v964_v57  ;;  %6062 = vst [vmem:[#allocation37_spill] sm:$0xff] %v4455_v39  ;;  %v4463_v34 = vmul.f32 %v1223_v60, %v967_v4  ;;  %6064 = vst [vmem:[#allocation39_spill] sm:$0xff] %v4465_v55  ;;  %v1226_v57 = vld [vmem:[#allocation11 + $0x158] sm:$0xff] }
  0xd0   :  { %2224 = vmatprep.mubr.f32.mxu0 %v6058_v20  ;;  %2673 = vmatprep.mubr.f32.mxu1 %v6058_v20  ;;  %6065 = vst [vmem:[#allocation40_spill] sm:$0xff] %v4467_v5  ;;  %v717_v4 = vmul.f32 %v618_v38, %v4163_v59  ;;  %v718_v60 = vmul.f32 %v618_v38, %v4186_v11  ;;  %v971_v6 = vadd.f32 1.0, %v715_v22  ;;  %v972_v15 = vadd.f32 1.0, %v716_v3  ;;  %v1731_v5 = vld [vmem:[%s6036_s6 + $0x120] sm:$0xff]  ;;  %v1233_v3 = vld [vmem:[#allocation11 + $0x190] sm:$0xff] }
  0xd1   :  { %6061 = vst [vmem:[#allocation36_spill] sm:$0xff] %v4449_v2  ;;  %6063 = vst [vmem:[#allocation38_spill] sm:$0xff] %v4463_v34  ;;  %v719_v35 = vmul.f32 %v619_v36, %v4143_v45  ;;  %v721_v13 = vmul.f32 %v619_v36, %v4163_v59  ;;  %v722_v63 = vmul.f32 %v619_v36, %v4186_v11 }
  0xd2   :  { %v973_v14 = vadd.f32 1.0, %v717_v4  ;;  %v974_v38 = vadd.f32 1.0, %v718_v60  ;;  %v1231_v4 = vld [vmem:[#allocation11 + $0x180] sm:$0xff]  ;;  %v360_v60 = vsel %vm294_vm9, %v4138_v43, 0.0 }
  0xd3   :  { %3682 = vmatmul.mubr.msk.f32.gmra.mrb[68].mxu0 %vm1763_vm0, %v1729_v0  ;;  %3746 = vmatmul.mubr.msk.f32.gmra.mrb[68].mxu1 %vm1763_vm0, %v1729_v0  ;;  %v4481_v0 = vmul.f32 %v1226_v57, %v970_v10  ;;  %v720_v57 = vmul.f32 %v619_v36, %v4177_v1  ;;  %v4493_v10 = vmul.f32 %v1227_v27, %v971_v6  ;;  %v975_v34 = vadd.f32 1.0, %v719_v35  ;;  %v1234_v35 = vld [vmem:[#allocation11 + $0x198] sm:$0xff] }
  0xd4   :  { %2230 = vmatprep.mubr.f32.mxu0 %v6058_v20  ;;  %2679 = vmatprep.mubr.f32.mxu1 %v6058_v20  ;;  %v4495_v22 = vmul.f32 %v1229_v61, %v973_v14  ;;  %v4502_v55 = vmul.f32 %v1230_v29, %v974_v38  ;;  %v977_v39 = vadd.f32 1.0, %v721_v13  ;;  %v556_v27 = vsel %vm490_vm10, %v4149_v47, 0.0  ;;  %v1235_v13 = vld [vmem:[#allocation11 + $0x1a0] sm:$0xff] }
  0xd5   :  { %6066 = vst [vmem:[#allocation41_spill] sm:$0xff] %v4481_v0  ;;  %6067 = vst [vmem:[#allocation42_spill] sm:$0xff] %v4493_v10  ;;  %v1232_v0 = vld [vmem:[#allocation11 + $0x188] sm:$0xff]  ;;  %v976_v2 = vadd.f32 1.0, %v720_v57  ;;  %v164_v61 = vadd.s32 112, %v4124_v37  ;;  %v4512_v6 = vmul.f32 %v1231_v4, %v975_v34  ;;  %v620_v36 = vadd.f32 %v556_v27, %v360_v60  ;;  %v1237_v57 = vld [vmem:[#allocation11 + $0x1b0] sm:$0xff] }
  0xd6   :  { %6068 = vst [vmem:[#allocation43_spill] sm:$0xff] %v4495_v22  ;;  %6070 = vst [vmem:[#allocation45_spill] sm:$0xff] %v4502_v55  ;;  %v4514_v14 = vmul.f32 %v1233_v3, %v977_v39  ;;  %v4526_v34 = vadd.s32 128, %v4124_v37  ;;  %v1733_v27 = vld [vmem:[%s6036_s6 + $0x130] sm:$0xff]  ;;  %v1238_v10 = vld [vmem:[#allocation11 + $0x1b8] sm:$0xff] }
  0xd7   :  { %3683 = vmatmul.mubr.msk.f32.gmra.mrb[70].mxu0 %vm1763_vm0, %v1730_v28  ;;  %3747 = vmatmul.mubr.msk.f32.gmra.mrb[70].mxu1 %vm1763_vm0, %v1730_v28  ;;  %v4497_v28 = vmul.f32 %v1228_v58, %v972_v15  ;;  %v165_v58 = vadd.s32 120, %v4124_v37  ;;  %6071 = vst [vmem:[#allocation46_spill] sm:$0xff] %v4512_v6  ;;  %v4516_v15 = vmul.f32 %v1232_v0, %v976_v2 }
  0xd8   :  { %2236 = vmatprep.mubr.f32.mxu0 %v6058_v20  ;;  %2685 = vmatprep.mubr.f32.mxu1 %v6058_v20  ;;  %6072 = vst [vmem:[#allocation47_spill] sm:$0xff] %v4514_v14  ;;  %vm295_vm11 = vcmp.lt.s32.totalorder %v164_v61, %v4128_v40  ;;  %vm491_vm12 = vcmp.lt.s32.totalorder %v164_v61, %v4141_v44 }
  0xd9   :  { %6069 = vst [vmem:[#allocation44_spill] sm:$0xff] %v4497_v28  ;;  %6073 = vst [vmem:[#allocation48_spill] sm:$0xff] %v4516_v15  ;;  %v361_v39 = vsel %vm295_vm11, %v4138_v43, 0.0  ;;  %v557_v2 = vsel %vm491_vm12, %v4149_v47, 0.0  ;;  %vm296_vm13 = vcmp.lt.s32.totalorder %v165_v58, %v4128_v40  ;;  %vm492_vm14 = vcmp.lt.s32.totalorder %v165_v58, %v4141_v44  ;;  %v1236_v15 = vld [vmem:[#allocation11 + $0x1a8] sm:$0xff] }
  0xda   :  { %v723_v0 = vmul.f32 %v620_v36, %v4143_v45  ;;  %v725_v29 = vmul.f32 %v620_v36, %v4163_v59  ;;  %v724_v38 = vmul.f32 %v620_v36, %v4177_v1  ;;  %v726_v4 = vmul.f32 %v620_v36, %v4186_v11 }
  0xdb   :  { %3684 = vmatmul.mubr.msk.f32.gmra.mrb[72].mxu0 %vm1763_vm0, %v1731_v5  ;;  %3748 = vmatmul.mubr.msk.f32.gmra.mrb[72].mxu1 %vm1763_vm0, %v1731_v5  ;;  %v978_v5 = vadd.f32 1.0, %v722_v63  ;;  %v621_v3 = vadd.f32 %v557_v2, %v361_v39  ;;  %v362_v60 = vsel %vm296_vm13, %v4138_v43, 0.0  ;;  %v558_v63 = vsel %vm492_vm14, %v4149_v47, 0.0 }
  0xdc   :  { %2242 = vmatprep.mubr.f32.mxu0 %v6058_v20  ;;  %2691 = vmatprep.mubr.f32.mxu1 %v6058_v20  ;;  %v979_v61 = vadd.f32 1.0, %v723_v0  ;;  %v981_v58 = vadd.f32 1.0, %v725_v29  ;;  %v622_v14 = vadd.f32 %v558_v63, %v362_v60  ;;  %v982_v6 = vadd.f32 1.0, %v726_v4  ;;  %v1241_v0 = vld [vmem:[#allocation11 + $0x1d0] sm:$0xff] }
  0xdd   :  { %v727_v36 = vmul.f32 %v621_v3, %v4143_v45  ;;  %v729_v39 = vmul.f32 %v621_v3, %v4163_v59  ;;  %v728_v2 = vmul.f32 %v621_v3, %v4177_v1  ;;  %v4548_v55 = vmul.f32 %v1234_v35, %v978_v5  ;;  %v1240_v5 = vld [vmem:[#allocation11 + $0x1c8] sm:$0xff]  ;;  %v1734_v35 = vld [vmem:[%s6036_s6 + $0x138] sm:$0xff] }
  0xde   :  { %v4550_v28 = vmul.f32 %v1235_v13, %v979_v61  ;;  %v4552_v22 = vmul.f32 %v1237_v57, %v981_v58  ;;  %v730_v29 = vmul.f32 %v621_v3, %v4186_v11  ;;  %v731_v57 = vmul.f32 %v622_v14, %v4143_v45 }
  0xdf   :  { %3685 = vmatmul.mubr.msk.f32.gmra.mrb[74].mxu0 %vm1763_vm0, %v1732_v33  ;;  %3749 = vmatmul.mubr.msk.f32.gmra.mrb[74].mxu1 %vm1763_vm0, %v1732_v33  ;;  %v980_v33 = vadd.f32 1.0, %v724_v38  ;;  %6074 = vst [vmem:[#allocation49_spill] sm:$0xff] %v4548_v55  ;;  %v983_v4 = vadd.f32 1.0, %v727_v36  ;;  %v985_v60 = vadd.f32 1.0, %v729_v39  ;;  %v984_v63 = vadd.f32 1.0, %v728_v2  ;;  %v1243_v36 = vld [vmem:[#allocation11 + $0x1e0] sm:$0xff] }
  0xe0   :  { %2248 = vmatprep.mubr.f32.mxu0 %v6058_v20  ;;  %2697 = vmatprep.mubr.f32.mxu1 %v6058_v20  ;;  %6075 = vst [vmem:[#allocation50_spill] sm:$0xff] %v4550_v28  ;;  %6076 = vst [vmem:[#allocation51_spill] sm:$0xff] %v4552_v22  ;;  %v986_v13 = vadd.f32 1.0, %v730_v29  ;;  %v733_v3 = vmul.f32 %v622_v14, %v4163_v59  ;;  %v1245_v39 = vld [vmem:[#allocation11 + $0x1f0] sm:$0xff]  ;;  %v734_v2 = vmul.f32 %v622_v14, %v4186_v11  ;;  %v1244_v55 = vld [vmem:[#allocation11 + $0x1e8] sm:$0xff] }
  0xe1   :  { %v4557_v38 = vmul.f32 %v1236_v15, %v980_v33  ;;  %v732_v15 = vmul.f32 %v622_v14, %v4177_v1  ;;  %v4569_v61 = vmul.f32 %v1239_v21, %v983_v4  ;;  %v4571_v58 = vmul.f32 %v1241_v0, %v985_v60  ;;  %v1242_v33 = vld [vmem:[#allocation11 + $0x1d8] sm:$0xff]  ;;  %v1735_v14 = vld [vmem:[%s6036_s6 + $0x140] sm:$0xff] }
  0xe2   :  { %v987_v29 = vadd.f32 1.0, %v731_v57  ;;  %v989_v22 = vadd.f32 1.0, %v733_v3  ;;  %v1246_v21 = vld [vmem:[#allocation11 + $0x1f8] sm:$0xff]  ;;  %vm297_vm15 = vcmp.lt.s32.totalorder %v4526_v34, %v4128_v40  ;;  %vm493_vm1 = vcmp.lt.s32.totalorder %v4526_v34, %v4141_v44 }
  0xe3   :  { %3686 = vmatmul.mubr.msk.f32.gmra.mrb[76].mxu0 %vm1763_vm0, %v1733_v27  ;;  %3750 = vmatmul.mubr.msk.f32.gmra.mrb[76].mxu1 %vm1763_vm0, %v1733_v27  ;;  %6077 = vst [vmem:[#allocation52_spill] sm:$0xff] %v4557_v38  ;;  %v4567_v27 = vmul.f32 %v1238_v10, %v982_v6  ;;  %6079 = vst [vmem:[#allocation54_spill] sm:$0xff] %v4569_v61  ;;  %v4574_v38 = vmul.f32 %v1240_v5, %v984_v63  ;;  %v988_v28 = vadd.f32 1.0, %v732_v15 }
  0xe4   :  { %2254 = vmatprep.mubr.f32.mxu0 %v6058_v20  ;;  %2703 = vmatprep.mubr.f32.mxu1 %v6058_v20  ;;  %6080 = vst [vmem:[#allocation55_spill] sm:$0xff] %v4571_v58  ;;  %v990_v10 = vadd.f32 1.0, %v734_v2  ;;  %v167_v6 = vadd.s32 136, %v4124_v37  ;;  %v4588_v0 = vmul.f32 %v1242_v33, %v986_v13  ;;  %v4590_v4 = vmul.f32 %v1243_v36, %v987_v29  ;;  %v1736_v33 = vld [vmem:[%s6036_s6 + $0x148] sm:$0xff] }
  0xe5   :  { %6078 = vst [vmem:[#allocation53_spill] sm:$0xff] %v4567_v27  ;;  %6081 = vst [vmem:[#allocation56_spill] sm:$0xff] %v4574_v38  ;;  %v4592_v60 = vmul.f32 %v1245_v39, %v989_v22  ;;  %v363_v63 = vsel %vm297_vm15, %v4138_v43, 0.0  ;;  %v4595_v5 = vmul.f32 %v1244_v55, %v988_v28  ;;  %v559_v34 = vsel %vm493_vm1, %v4149_v47, 0.0  ;;  %v1247_v39 = vld [vmem:[#allocation11 + $0x200] sm:$0xff]  ;;  %v1252_v38 = vld [vmem:[#allocation11 + $0x228] sm:$0xff] }
  0xe6   :  { %6082 = vst [vmem:[#allocation57_spill] sm:$0xff] %v4588_v0  ;;  %6083 = vst [vmem:[#allocation58_spill] sm:$0xff] %v4590_v4  ;;  %vm298_vm2 = vcmp.lt.s32.totalorder %v167_v6, %v4128_v40  ;;  %vm494_vm3 = vcmp.lt.s32.totalorder %v167_v6, %v4141_v44  ;;  %v623_v57 = vadd.f32 %v559_v34, %v363_v63  ;;  %v168_v55 = vadd.s32 144, %v4124_v37  ;;  %v1248_v6 = vld [vmem:[#allocation11 + $0x208] sm:$0xff]  ;;  %v1250_v63 = vld [vmem:[#allocation11 + $0x218] sm:$0xff] }
  0xe7   :  { %3687 = vmatmul.mubr.msk.f32.gmra.mrb[78].mxu0 %vm1763_vm0, %v1734_v35  ;;  %3751 = vmatmul.mubr.msk.f32.gmra.mrb[78].mxu1 %vm1763_vm0, %v1734_v35  ;;  %6084 = vst [vmem:[#allocation59_spill] sm:$0xff] %v4592_v60  ;;  %6085 = vst [vmem:[#allocation60_spill] sm:$0xff] %v4595_v5  ;;  %v4600_v35 = vmul.f32 %v1246_v21, %v990_v10  ;;  %v364_v13 = vsel %vm298_vm2, %v4138_v43, 0.0  ;;  %v560_v3 = vsel %vm494_vm3, %v4149_v47, 0.0  ;;  %v169_v28 = vadd.s32 152, %v4124_v37  ;;  %v1249_v21 = vld [vmem:[#allocation11 + $0x210] sm:$0xff] }
  0xe8   :  { %2260 = vmatprep.mubr.f32.mxu0 %v6058_v20  ;;  %2709 = vmatprep.mubr.f32.mxu1 %v6058_v20  ;;  %v624_v22 = vadd.f32 %v560_v3, %v364_v13  ;;  %v170_v15 = vadd.s32 160, %v4124_v37  ;;  %v735_v36 = vmul.f32 %v623_v57, %v4143_v45  ;;  %v737_v2 = vmul.f32 %v623_v57, %v4163_v59  ;;  %v1251_v4 = vld [vmem:[#allocation11 + $0x220] sm:$0xff]  ;;  %v1253_v0 = vld [vmem:[#allocation11 + $0x230] sm:$0xff] }
  0xe9   :  { %6086 = vst [vmem:[#allocation61_spill] sm:$0xff] %v4600_v35  ;;  %v736_v29 = vmul.f32 %v623_v57, %v4177_v1  ;;  %v4618_v10 = vadd.s32 168, %v4124_v37  ;;  %vm299_vm4 = vcmp.lt.s32.totalorder %v168_v55, %v4128_v40  ;;  %vm495_vm5 = vcmp.lt.s32.totalorder %v168_v55, %v4141_v44  ;;  %v1255_v55 = vld [vmem:[#allocation11 + $0x240] sm:$0xff] }
  0xea   :  { %v739_v34 = vmul.f32 %v624_v22, %v4143_v45  ;;  %v741_v13 = vmul.f32 %v624_v22, %v4163_v59  ;;  %v740_v3 = vmul.f32 %v624_v22, %v4177_v1  ;;  %v991_v35 = vadd.f32 1.0, %v735_v36  ;;  %v1737_v36 = vld [vmem:[%s6036_s6 + $0x150] sm:$0xff] }
  0xeb   :  { %3688 = vmatmul.mubr.msk.f32.gmra.mrb[80].mxu0 %vm1763_vm0, %v1735_v14  ;;  %3752 = vmatmul.mubr.msk.f32.gmra.mrb[80].mxu1 %vm1763_vm0, %v1735_v14  ;;  %v738_v14 = vmul.f32 %v623_v57, %v4186_v11  ;;  %v993_v5 = vadd.f32 1.0, %v737_v2  ;;  %v992_v60 = vadd.f32 1.0, %v736_v29  ;;  %v742_v58 = vmul.f32 %v624_v22, %v4186_v11 }
  0xec   :  { %2266 = vmatprep.mubr.f32.mxu0 %v6058_v20  ;;  %2715 = vmatprep.mubr.f32.mxu1 %v6058_v20  ;;  %v995_v61 = vadd.f32 1.0, %v739_v34  ;;  %v997_v27 = vadd.f32 1.0, %v741_v13  ;;  %v996_v26 = vadd.f32 1.0, %v740_v3  ;;  %v4632_v2 = vmul.f32 %v1247_v39, %v991_v35  ;;  %v1257_v39 = vld [vmem:[#allocation11 + $0x250] sm:$0xff] }
  0xed   :  { %v994_v57 = vadd.f32 1.0, %v738_v14  ;;  %v4634_v22 = vmul.f32 %v1249_v21, %v993_v5  ;;  %v4636_v29 = vmul.f32 %v1248_v6, %v992_v60  ;;  %vm300_vm6 = vcmp.lt.s32.totalorder %v169_v28, %v4128_v40  ;;  %v1739_v5 = vld [vmem:[%s6036_s6 + $0x160] sm:$0xff]  ;;  %v1256_v6 = vld [vmem:[#allocation11 + $0x248] sm:$0xff] }
  0xee   :  { %6087 = vst [vmem:[#allocation62_spill] sm:$0xff] %v4632_v2  ;;  %v4640_v34 = vmul.f32 %v1251_v4, %v995_v61  ;;  %v4642_v13 = vmul.f32 %v1253_v0, %v997_v27  ;;  %v4644_v3 = vmul.f32 %v1252_v38, %v996_v26  ;;  %v561_v61 = vsel %vm495_vm5, %v4149_v47, 0.0 }
  0xef   :  { %3689 = vmatmul.mubr.msk.f32.gmra.mrb[82].mxu0 %vm1763_vm0, %v1736_v33  ;;  %3753 = vmatmul.mubr.msk.f32.gmra.mrb[82].mxu1 %vm1763_vm0, %v1736_v33  ;;  %6088 = vst [vmem:[#allocation63_spill] sm:$0xff] %v4634_v22  ;;  %6089 = vst [vmem:[#allocation64_spill] sm:$0xff] %v4636_v29  ;;  %v998_v33 = vadd.f32 1.0, %v742_v58  ;;  %v4638_v14 = vmul.f32 %v1250_v63, %v994_v57  ;;  %v365_v58 = vsel %vm299_vm4, %v4138_v43, 0.0  ;;  %v366_v27 = vsel %vm300_vm6, %v4138_v43, 0.0  ;;  %v1258_v63 = vld [vmem:[#allocation11 + $0x258] sm:$0xff] }
  0xf0   :  { %2272 = vmatprep.mubr.f32.mxu0 %v6058_v20  ;;  %2721 = vmatprep.mubr.f32.mxu1 %v6058_v20  ;;  %6091 = vst [vmem:[#allocation66_spill] sm:$0xff] %v4640_v34  ;;  %6092 = vst [vmem:[#allocation67_spill] sm:$0xff] %v4642_v13  ;;  %vm496_vm7 = vcmp.lt.s32.totalorder %v169_v28, %v4141_v44  ;;  %v625_v26 = vadd.f32 %v561_v61, %v365_v58 }
  0xf1   :  { %6090 = vst [vmem:[#allocation65_spill] sm:$0xff] %v4638_v14  ;;  %6093 = vst [vmem:[#allocation68_spill] sm:$0xff] %v4644_v3  ;;  %v4646_v19 = vmul.f32 %v1254_v25, %v998_v33  ;;  %v1738_v25 = vld [vmem:[%s6036_s6 + $0x158] sm:$0xff]  ;;  %v562_v38 = vsel %vm496_vm7, %v4149_v47, 0.0  ;;  %vm301_vm8 = vcmp.lt.s32.totalorder %v170_v15, %v4128_v40  ;;  %vm497_vm9 = vcmp.lt.s32.totalorder %v170_v15, %v4141_v44  ;;  %v1260_v3 = vld [vmem:[#allocation11 + $0x268] sm:$0xff] }
  0xf2   :  { %v626_v0 = vadd.f32 %v562_v38, %v366_v27  ;;  %v367_v4 = vsel %vm301_vm8, %v4138_v43, 0.0  ;;  %v563_v60 = vsel %vm497_vm9, %v4149_v47, 0.0  ;;  %vm302_vm10 = vcmp.lt.s32.totalorder %v4618_v10, %v4128_v40 }
  0xf3   :  { %6094 = vst [vmem:[#allocation69_spill] sm:$0xff] %v4646_v19  ;;  %3690 = vmatmul.mubr.msk.f32.gmra.mrb[84].mxu0 %vm1763_vm0, %v1737_v36  ;;  %3754 = vmatmul.mubr.msk.f32.gmra.mrb[84].mxu1 %vm1763_vm0, %v1737_v36  ;;  %v743_v35 = vmul.f32 %v625_v26, %v4143_v45  ;;  %v745_v28 = vmul.f32 %v625_v26, %v4163_v59  ;;  %v1259_v36 = vld [vmem:[#allocation11 + $0x260] sm:$0xff]  ;;  %v368_v61 = vsel %vm302_vm10, %v4138_v43, 0.0  ;;  %v1261_v19 = vld [vmem:[#allocation11 + $0x270] sm:$0xff] }
  0xf4   :  { %2278 = vmatprep.mubr.f32.mxu0 %v6058_v20  ;;  %2727 = vmatprep.mubr.f32.mxu1 %v6058_v20  ;;  %v744_v15 = vmul.f32 %v625_v26, %v4177_v1  ;;  %v746_v21 = vmul.f32 %v625_v26, %v4186_v11  ;;  %v747_v57 = vmul.f32 %v626_v0, %v4143_v45 }
  0xf5   :  { %v749_v33 = vmul.f32 %v626_v0, %v4163_v59  ;;  %v748_v58 = vmul.f32 %v626_v0, %v4177_v1  ;;  %v999_v27 = vadd.f32 1.0, %v743_v35  ;;  %v750_v29 = vmul.f32 %v626_v0, %v4186_v11 }
  0xf6   :  { %v1000_v26 = vadd.f32 1.0, %v744_v15  ;;  %v1002_v38 = vadd.f32 1.0, %v746_v21  ;;  %v1003_v13 = vadd.f32 1.0, %v747_v57  ;;  %vm498_vm11 = vcmp.lt.s32.totalorder %v4618_v10, %v4141_v44 }
  0xf7   :  { %3691 = vmatmul.mubr.msk.f32.gmra.mrb[86].mxu0 %vm1763_vm0, %v1738_v25  ;;  %3755 = vmatmul.mubr.msk.f32.gmra.mrb[86].mxu1 %vm1763_vm0, %v1738_v25  ;;  %v1001_v25 = vadd.f32 1.0, %v745_v28  ;;  %v1005_v34 = vadd.f32 1.0, %v749_v33  ;;  %v1004_v14 = vadd.f32 1.0, %v748_v58  ;;  %v4688_v22 = vmul.f32 %v1255_v55, %v999_v27  ;;  %v1740_v55 = vld [vmem:[%s6036_s6 + $0x168] sm:$0xff]  ;;  %v1741_v33 = vld [vmem:[%s6036_s6 + $0x170] sm:$0xff] }
  0xf8   :  { %2284 = vmatprep.mubr.f32.mxu0 %v6058_v20  ;;  %2733 = vmatprep.mubr.f32.mxu1 %v6058_v20  ;;  %v4692_v56 = vmul.f32 %v1256_v6, %v1000_v26  ;;  %v4694_v54 = vmul.f32 %v1258_v63, %v1002_v38  ;;  %v4698_v35 = vmul.f32 %v1259_v36, %v1003_v13  ;;  %v1006_v0 = vadd.f32 1.0, %v750_v29  ;;  %v1264_v6 = vld [vmem:[#allocation11 + $0x288] sm:$0xff]  ;;  %v1266_v63 = vld [vmem:[#allocation11 + $0x298] sm:$0xff]  ;;  %v1267_v38 = vld [vmem:[#allocation11 + $0x2a0] sm:$0xff] }
  0xf9   :  { %6095 = vst [vmem:[#allocation70_spill] sm:$0xff] %v4688_v22  ;;  %v4690_v2 = vmul.f32 %v1257_v39, %v1001_v25  ;;  %v4700_v28 = vmul.f32 %v1261_v19, %v1005_v34  ;;  %v4702_v15 = vmul.f32 %v1260_v3, %v1004_v14  ;;  %v627_v39 = vadd.f32 %v563_v60, %v367_v4  ;;  %v1263_v4 = vld [vmem:[#allocation11 + $0x280] sm:$0xff] }
  0xfa   :  { %6097 = vst [vmem:[#allocation72_spill] sm:$0xff] %v4692_v56  ;;  %6098 = vst [vmem:[#allocation73_spill] sm:$0xff] %v4694_v54  ;;  %v172_v13 = vadd.s32 176, %v4124_v37  ;;  %v173_v19 = vadd.s32 184, %v4124_v37  ;;  %v4713_v34 = vmul.f32 %v1262_v51, %v1006_v0  ;;  %v564_v29 = vsel %vm498_vm11, %v4149_v47, 0.0  ;;  %v1265_v51 = vld [vmem:[#allocation11 + $0x290] sm:$0xff] }
  0xfb   :  { %6096 = vst [vmem:[#allocation71_spill] sm:$0xff] %v4690_v2  ;;  %3692 = vmatmul.mubr.msk.f32.gmra.mrb[88].mxu0 %vm1763_vm0, %v1739_v5  ;;  %3756 = vmatmul.mubr.msk.f32.gmra.mrb[88].mxu1 %vm1763_vm0, %v1739_v5  ;;  %6099 = vst [vmem:[#allocation74_spill] sm:$0xff] %v4698_v35  ;;  %v4717_v14 = vadd.s32 192, %v4124_v37  ;;  %v4720_v3 = vadd.s32 200, %v4124_v37  ;;  %v751_v5 = vmul.f32 %v627_v39, %v4143_v45  ;;  %v4731_v36 = vadd.s32 208, %v4124_v37 }
  0xfc   :  { %6100 = vst [vmem:[#allocation75_spill] sm:$0xff] %v4700_v28  ;;  %6101 = vst [vmem:[#allocation76_spill] sm:$0xff] %v4702_v15  ;;  %2290 = vmatprep.mubr.f32.mxu0 %v6058_v20  ;;  %2739 = vmatprep.mubr.f32.mxu1 %v6058_v20  ;;  %v753_v60 = vmul.f32 %v627_v39, %v4163_v59  ;;  %v752_v10 = vmul.f32 %v627_v39, %v4177_v1 }
  0xfd   :  { %6102 = vst [vmem:[#allocation77_spill] sm:$0xff] %v4713_v34  ;;  %v754_v21 = vmul.f32 %v627_v39, %v4186_v11  ;;  %v628_v57 = vadd.f32 %v564_v29, %v368_v61  ;;  %vm303_vm12 = vcmp.lt.s32.totalorder %v172_v13, %v4128_v40  ;;  %vm499_vm13 = vcmp.lt.s32.totalorder %v172_v13, %v4141_v44 }
  0xfe   :  { %v1007_v58 = vadd.f32 1.0, %v751_v5  ;;  %v1009_v27 = vadd.f32 1.0, %v753_v60  ;;  %v1008_v25 = vadd.f32 1.0, %v752_v10  ;;  %v1269_v5 = vld [vmem:[#allocation11 + $0x2b0] sm:$0xff]  ;;  %v1268_v60 = vld [vmem:[#allocation11 + $0x2a8] sm:$0xff]  ;;  %v1270_v10 = vld [vmem:[#allocation11 + $0x2b8] sm:$0xff]  ;;  %vm304_vm14 = vcmp.lt.s32.totalorder %v173_v19, %v4128_v40 }
  0xff   :  { %3693 = vmatmul.mubr.msk.f32.gmra.mrb[90].mxu0 %vm1763_vm0, %v1740_v55  ;;  %3757 = vmatmul.mubr.msk.f32.gmra.mrb[90].mxu1 %vm1763_vm0, %v1740_v55  ;;  %v1010_v26 = vadd.f32 1.0, %v754_v21  ;;  %v755_v61 = vmul.f32 %v628_v57, %v4143_v45  ;;  %v757_v0 = vmul.f32 %v628_v57, %v4163_v59  ;;  %v756_v55 = vmul.f32 %v628_v57, %v4177_v1 }
 0x100   :  { %2296 = vmatprep.mubr.f32.mxu0 %v6058_v20  ;;  %2745 = vmatprep.mubr.f32.mxu1 %v6058_v20  ;;  %v758_v39 = vmul.f32 %v628_v57, %v4186_v11  ;;  %v4742_v29 = vmul.f32 %v1263_v4, %v1007_v58  ;;  %v4744_v34 = vmul.f32 %v1265_v51, %v1009_v27  ;;  %v1742_v4 = vld [vmem:[%s6036_s6 + $0x178] sm:$0xff]  ;;  %v369_v51 = vsel %vm303_vm12, %v4138_v43, 0.0 }
 0x101   :  { %v4746_v15 = vmul.f32 %v1264_v6, %v1008_v25  ;;  %v4748_v28 = vmul.f32 %v1266_v63, %v1010_v26  ;;  %v1011_v21 = vadd.f32 1.0, %v755_v61  ;;  %v1013_v35 = vadd.f32 1.0, %v757_v0  ;;  %v1273_v0 = vld [vmem:[#allocation11 + $0x2d0] sm:$0xff] }
 0x102   :  { %6103 = vst [vmem:[#allocation78_spill] sm:$0xff] %v4742_v29  ;;  %6104 = vst [vmem:[#allocation79_spill] sm:$0xff] %v4744_v34  ;;  %v1012_v54 = vadd.f32 1.0, %v756_v55  ;;  %v1014_v56 = vadd.f32 1.0, %v758_v39  ;;  %v565_v6 = vsel %vm499_vm13, %v4149_v47, 0.0  ;;  %vm500_vm15 = vcmp.lt.s32.totalorder %v173_v19, %v4141_v44  ;;  %v1271_v19 = vld [vmem:[#allocation11 + $0x2c0] sm:$0xff] }
 0x103   :  { %6105 = vst [vmem:[#allocation80_spill] sm:$0xff] %v4746_v15  ;;  %6106 = vst [vmem:[#allocation81_spill] sm:$0xff] %v4748_v28  ;;  %3694 = vmatmul.mubr.msk.f32.gmra.mrb[92].mxu0 %vm1763_vm0, %v1741_v33  ;;  %3758 = vmatmul.mubr.msk.f32.gmra.mrb[92].mxu1 %vm1763_vm0, %v1741_v33  ;;  %v4765_v63 = vmul.f32 %v1267_v38, %v1011_v21  ;;  %v4767_v57 = vmul.f32 %v1269_v5, %v1013_v35  ;;  %v370_v25 = vsel %vm304_vm14, %v4138_v43, 0.0  ;;  %v1272_v55 = vld [vmem:[#allocation11 + $0x2c8] sm:$0xff]  ;;  %v1274_v5 = vld [vmem:[#allocation11 + $0x2d8] sm:$0xff] }
 0x104   :  { %2302 = vmatprep.mubr.f32.mxu0 %v6058_v20  ;;  %2751 = vmatprep.mubr.f32.mxu1 %v6058_v20  ;;  %v4769_v33 = vmul.f32 %v1268_v60, %v1012_v54  ;;  %v4771_v58 = vmul.f32 %v1270_v10, %v1014_v56  ;;  %v629_v27 = vadd.f32 %v565_v6, %v369_v51  ;;  %v566_v26 = vsel %vm500_vm15, %v4149_v47, 0.0  ;;  %v1743_v54 = vld [vmem:[%s6036_s6 + $0x180] sm:$0xff]  ;;  %v1278_v15 = vld [vmem:[#allocation11 + $0x2f8] sm:$0xff] }
 0x105   :  { %6107 = vst [vmem:[#allocation82_spill] sm:$0xff] %v4765_v63  ;;  %6108 = vst [vmem:[#allocation83_spill] sm:$0xff] %v4767_v57  ;;  %vm305_vm1 = vcmp.lt.s32.totalorder %v4717_v14, %v4128_v40  ;;  %v630_v13 = vadd.f32 %v566_v26, %v370_v25  ;;  %vm501_vm2 = vcmp.lt.s32.totalorder %v4717_v14, %v4141_v44  ;;  %v1275_v25 = vld [vmem:[#allocation11 + $0x2e0] sm:$0xff]  ;;  %v1277_v26 = vld [vmem:[#allocation11 + $0x2f0] sm:$0xff] }
 0x106   :  { %6109 = vst [vmem:[#allocation84_spill] sm:$0xff] %v4769_v33  ;;  %6110 = vst [vmem:[#allocation85_spill] sm:$0xff] %v4771_v58  ;;  %v371_v35 = vsel %vm305_vm1, %v4138_v43, 0.0  ;;  %vm306_vm3 = vcmp.lt.s32.totalorder %v4720_v3, %v4128_v40  ;;  %v759_v56 = vmul.f32 %v629_v27, %v4143_v45  ;;  %v761_v61 = vmul.f32 %v629_v27, %v4163_v59  ;;  %v1276_v58 = vld [vmem:[#allocation11 + $0x2e8] sm:$0xff] }
 0x107   :  { %3695 = vmatmul.mubr.msk.f32.gmra.mrb[94].mxu0 %vm1763_vm0, %v1742_v4  ;;  %3759 = vmatmul.mubr.msk.f32.gmra.mrb[94].mxu1 %vm1763_vm0, %v1742_v4  ;;  %v760_v38 = vmul.f32 %v629_v27, %v4177_v1  ;;  %v567_v14 = vsel %vm501_vm2, %v4149_v47, 0.0  ;;  %v762_v39 = vmul.f32 %v629_v27, %v4186_v11  ;;  %v763_v60 = vmul.f32 %v630_v13, %v4143_v45 }
 0x108   :  { %2308 = vmatprep.mubr.f32.mxu0 %v6058_v20  ;;  %2757 = vmatprep.mubr.f32.mxu1 %v6058_v20  ;;  %v765_v10 = vmul.f32 %v630_v13, %v4163_v59  ;;  %v764_v21 = vmul.f32 %v630_v13, %v4177_v1  ;;  %v1015_v4 = vadd.f32 1.0, %v759_v56  ;;  %v1017_v51 = vadd.f32 1.0, %v761_v61  ;;  %v1744_v56 = vld [vmem:[%s6036_s6 + $0x188] sm:$0xff] }
 0x109   :  { %v1016_v6 = vadd.f32 1.0, %v760_v38  ;;  %v766_v33 = vmul.f32 %v630_v13, %v4186_v11  ;;  %v1018_v27 = vadd.f32 1.0, %v762_v39  ;;  %v1019_v57 = vadd.f32 1.0, %v763_v60 }
 0x10a   :  { %v1021_v63 = vadd.f32 1.0, %v765_v10  ;;  %v1020_v28 = vadd.f32 1.0, %v764_v21  ;;  %v4805_v61 = vmul.f32 %v1271_v19, %v1015_v4  ;;  %v4807_v13 = vmul.f32 %v1273_v0, %v1017_v51 }
 0x10b   :  { %3696 = vmatmul.mubr.msk.f32.gmra.mrb[96].mxu0 %vm1763_vm0, %v1743_v54  ;;  %3760 = vmatmul.mubr.msk.f32.gmra.mrb[96].mxu1 %vm1763_vm0, %v1743_v54  ;;  %v4809_v38 = vmul.f32 %v1272_v55, %v1016_v6  ;;  %v1022_v54 = vadd.f32 1.0, %v766_v33  ;;  %v4811_v39 = vmul.f32 %v1274_v5, %v1018_v27  ;;  %v4813_v60 = vmul.f32 %v1275_v25, %v1019_v57  ;;  %v1282_v25 = vld [vmem:[#allocation11 + $0x318] sm:$0xff] }
 0x10c   :  { %2314 = vmatprep.mubr.f32.mxu0 %v6058_v20  ;;  %2763 = vmatprep.mubr.f32.mxu1 %v6058_v20  ;;  %6111 = vst [vmem:[#allocation86_spill] sm:$0xff] %v4805_v61  ;;  %6112 = vst [vmem:[#allocation87_spill] sm:$0xff] %v4807_v13  ;;  %v4815_v10 = vmul.f32 %v1277_v26, %v1021_v63  ;;  %v4817_v21 = vmul.f32 %v1276_v58, %v1020_v28  ;;  %v372_v19 = vsel %vm306_vm3, %v4138_v43, 0.0  ;;  %v1746_v27 = vld [vmem:[%s6036_s6 + $0x198] sm:$0xff] }
 0x10d   :  { %6113 = vst [vmem:[#allocation88_spill] sm:$0xff] %v4809_v38  ;;  %6114 = vst [vmem:[#allocation89_spill] sm:$0xff] %v4811_v39  ;;  %v4819_v34 = vmul.f32 %v1278_v15, %v1022_v54  ;;  %v631_v29 = vadd.f32 %v567_v14, %v371_v35  ;;  %vm502_vm4 = vcmp.lt.s32.totalorder %v4720_v3, %v4141_v44  ;;  %v4835_v28 = vadd.s32 216, %v4124_v37  ;;  %v1745_v15 = vld [vmem:[%s6036_s6 + $0x190] sm:$0xff]  ;;  %v1280_v14 = vld [vmem:[#allocation11 + $0x308] sm:$0xff] }
 0x10e   :  { %6115 = vst [vmem:[#allocation90_spill] sm:$0xff] %v4813_v60  ;;  %6116 = vst [vmem:[#allocation91_spill] sm:$0xff] %v4815_v10  ;;  %v568_v63 = vsel %vm502_vm4, %v4149_v47, 0.0  ;;  %vm307_vm5 = vcmp.lt.s32.totalorder %v4731_v36, %v4128_v40  ;;  %vm503_vm6 = vcmp.lt.s32.totalorder %v4731_v36, %v4141_v44  ;;  %v1279_v36 = vld [vmem:[#allocation11 + $0x300] sm:$0xff]  ;;  %v1281_v35 = vld [vmem:[#allocation11 + $0x310] sm:$0xff] }
 0x10f   :  { %6117 = vst [vmem:[#allocation92_spill] sm:$0xff] %v4817_v21  ;;  %6118 = vst [vmem:[#allocation93_spill] sm:$0xff] %v4819_v34  ;;  %3697 = vmatmul.mubr.msk.f32.gmra.mrb[98].mxu0 %vm1763_vm0, %v1744_v56  ;;  %3761 = vmatmul.mubr.msk.f32.gmra.mrb[98].mxu1 %vm1763_vm0, %v1744_v56  ;;  %v767_v3 = vmul.f32 %v631_v29, %v4143_v45  ;;  %v769_v57 = vmul.f32 %v631_v29, %v4163_v59  ;;  %v373_v58 = vsel %vm307_vm5, %v4138_v43, 0.0 }
 0x110   :  { %2320 = vmatprep.mubr.f32.mxu0 %v6058_v20  ;;  %2769 = vmatprep.mubr.f32.mxu1 %v6058_v20  ;;  %v768_v33 = vmul.f32 %v631_v29, %v4177_v1  ;;  %v770_v0 = vmul.f32 %v631_v29, %v4186_v11  ;;  %v632_v55 = vadd.f32 %v568_v63, %v372_v19  ;;  %v569_v5 = vsel %vm503_vm6, %v4149_v47, 0.0 }
 0x111   :  { %vm308_vm7 = vcmp.lt.s32.totalorder %v4835_v28, %v4128_v40  ;;  %v1023_v4 = vadd.f32 1.0, %v767_v3  ;;  %v1025_v51 = vadd.f32 1.0, %v769_v57  ;;  %v633_v26 = vadd.f32 %v569_v5, %v373_v58  ;;  %v1283_v57 = vld [vmem:[#allocation11 + $0x320] sm:$0xff]  ;;  %v1284_v58 = vld [vmem:[#allocation11 + $0x328] sm:$0xff] }
 0x112   :  { %v1024_v6 = vadd.f32 1.0, %v768_v33  ;;  %v1026_v29 = vadd.f32 1.0, %v770_v0  ;;  %v771_v56 = vmul.f32 %v632_v55, %v4143_v45  ;;  %v773_v54 = vmul.f32 %v632_v55, %v4163_v59  ;;  %v1285_v33 = vld [vmem:[#allocation11 + $0x330] sm:$0xff] }
 0x113   :  { %3698 = vmatmul.mubr.msk.f32.gmra.mrb[100].mxu0 %vm1763_vm0, %v1745_v15  ;;  %3762 = vmatmul.mubr.msk.f32.gmra.mrb[100].mxu1 %vm1763_vm0, %v1745_v15  ;;  %v772_v19 = vmul.f32 %v632_v55, %v4177_v1  ;;  %v4860_v63 = vmul.f32 %v1279_v36, %v1023_v4  ;;  %v4862_v3 = vmul.f32 %v1281_v35, %v1025_v51  ;;  %v374_v0 = vsel %vm308_vm7, %v4138_v43, 0.0  ;;  %v1286_v4 = vld [vmem:[#allocation11 + $0x338] sm:$0xff] }
 0x114   :  { %2326 = vmatprep.mubr.f32.mxu0 %v6058_v20  ;;  %2775 = vmatprep.mubr.f32.mxu1 %v6058_v20  ;;  %v4864_v15 = vmul.f32 %v1280_v14, %v1024_v6  ;;  %v4870_v5 = vmul.f32 %v1282_v25, %v1026_v29  ;;  %v1027_v34 = vadd.f32 1.0, %v771_v56  ;;  %v1029_v21 = vadd.f32 1.0, %v773_v54  ;;  %v1287_v56 = vld [vmem:[#allocation11 + $0x340] sm:$0xff]  ;;  %v1289_v54 = vld [vmem:[#allocation11 + $0x350] sm:$0xff] }
 0x115   :  { %6119 = vst [vmem:[#allocation94_spill] sm:$0xff] %v4860_v63  ;;  %6120 = vst [vmem:[#allocation95_spill] sm:$0xff] %v4862_v3  ;;  %v1028_v10 = vadd.f32 1.0, %v772_v19  ;;  %v774_v36 = vmul.f32 %v632_v55, %v4186_v11  ;;  %v775_v35 = vmul.f32 %v633_v26, %v4143_v45  ;;  %v777_v14 = vmul.f32 %v633_v26, %v4163_v59  ;;  %v1288_v55 = vld [vmem:[#allocation11 + $0x348] sm:$0xff]  ;;  %v1294_v63 = vld [vmem:[#allocation11 + $0x378] sm:$0xff] }
 0x116   :  { %6121 = vst [vmem:[#allocation96_spill] sm:$0xff] %v4864_v15  ;;  %6122 = vst [vmem:[#allocation97_spill] sm:$0xff] %v4870_v5  ;;  %v776_v51 = vmul.f32 %v633_v26, %v4177_v1  ;;  %v4878_v6 = vmul.f32 %v1283_v57, %v1027_v34  ;;  %v4880_v25 = vmul.f32 %v1285_v33, %v1029_v21  ;;  %v178_v19 = vadd.s32 224, %v4124_v37  ;;  %v1747_v5 = vld [vmem:[%s6036_s6 + $0x1a0] sm:$0xff] }
 0x117   :  { %3699 = vmatmul.mubr.msk.f32.gmra.mrb[102].mxu0 %vm1763_vm0, %v1746_v27  ;;  %3763 = vmatmul.mubr.msk.f32.gmra.mrb[102].mxu1 %vm1763_vm0, %v1746_v27  ;;  %v4882_v29 = vmul.f32 %v1284_v58, %v1028_v10  ;;  %v1030_v27 = vadd.f32 1.0, %v774_v36  ;;  %v1031_v34 = vadd.f32 1.0, %v775_v35  ;;  %v1033_v57 = vadd.f32 1.0, %v777_v14  ;;  %v1290_v36 = vld [vmem:[#allocation11 + $0x358] sm:$0xff] }
 0x118   :  { %6123 = vst [vmem:[#allocation98_spill] sm:$0xff] %v4878_v6  ;;  %6124 = vst [vmem:[#allocation99_spill] sm:$0xff] %v4880_v25  ;;  %2332 = vmatprep.mubr.f32.mxu0 %v6058_v20  ;;  %2781 = vmatprep.mubr.f32.mxu1 %v6058_v20  ;;  %v1032_v21 = vadd.f32 1.0, %v776_v51  ;;  %v778_v10 = vmul.f32 %v633_v26, %v4186_v11  ;;  %vm504_vm8 = vcmp.lt.s32.totalorder %v4835_v28, %v4141_v44 }
 0x119   :  { %6125 = vst [vmem:[#allocation100_spill] sm:$0xff] %v4882_v29  ;;  %vm309_vm9 = vcmp.lt.s32.totalorder %v178_v19, %v4128_v40  ;;  %vm505_vm10 = vcmp.lt.s32.totalorder %v178_v19, %v4141_v44  ;;  %v4895_v33 = vmul.f32 %v1286_v4, %v1030_v27  ;;  %v4897_v58 = vmul.f32 %v1287_v56, %v1031_v34  ;;  %v1748_v4 = vld [vmem:[%s6036_s6 + $0x1a8] sm:$0xff] }
 0x11a   :  { %v4899_v29 = vmul.f32 %v1289_v54, %v1033_v57  ;;  %v4901_v25 = vmul.f32 %v1288_v55, %v1032_v21  ;;  %v1034_v26 = vadd.f32 1.0, %v778_v10  ;;  %v570_v28 = vsel %vm504_vm8, %v4149_v47, 0.0  ;;  %v1749_v21 = vld [vmem:[%s6036_s6 + $0x1b0] sm:$0xff] }
 0x11b   :  { %6126 = vst [vmem:[#allocation101_spill] sm:$0xff] %v4895_v33  ;;  %6127 = vst [vmem:[#allocation102_spill] sm:$0xff] %v4897_v58  ;;  %3700 = vmatmul.mubr.msk.f32.gmra.mrb[104].mxu0 %vm1763_vm0, %v1747_v5  ;;  %3764 = vmatmul.mubr.msk.f32.gmra.mrb[104].mxu1 %vm1763_vm0, %v1747_v5  ;;  %v375_v35 = vsel %vm309_vm9, %v4138_v43, 0.0  ;;  %v571_v14 = vsel %vm505_vm10, %v4149_v47, 0.0  ;;  %v634_v51 = vadd.f32 %v570_v28, %v374_v0  ;;  %v4916_v5 = vadd.s32 232, %v4124_v37  ;;  %v1293_v58 = vld [vmem:[#allocation11 + $0x370] sm:$0xff] }
 0x11c   :  { %6128 = vst [vmem:[#allocation103_spill] sm:$0xff] %v4899_v29  ;;  %6129 = vst [vmem:[#allocation104_spill] sm:$0xff] %v4901_v25  ;;  %2338 = vmatprep.mubr.f32.mxu0 %v6058_v20  ;;  %2787 = vmatprep.mubr.f32.mxu1 %v6058_v20  ;;  %v4913_v56 = vadd.f32 %v571_v14, %v375_v35  ;;  %v4919_v54 = vadd.s32 240, %v4124_v37  ;;  %v4921_v55 = vmul.f32 %v1290_v36, %v1034_v26  ;;  %v1291_v29 = vld [vmem:[#allocation11 + $0x360] sm:$0xff] }
 0x11d   :  { %v4924_v19 = vadd.s32 248, %v4124_v37  ;;  %v4927_v27 = vadd.s32 256, %v4124_v37  ;;  %v4930_v34 = vadd.s32 264, %v4124_v37  ;;  %v779_v10 = vmul.f32 %v634_v51, %v4143_v45 }
 0x11e   :  { %6130 = vst [vmem:[#allocation105_spill] sm:$0xff] %v4921_v55  ;;  %v2022_v0 = vpop.f32.mrb[0].mxu0  ;;  %v2471_v57 = vpop.f32.mrb[0].mxu1  ;;  %v781_v36 = vmul.f32 %v634_v51, %v4163_v59  ;;  %v780_v26 = vmul.f32 %v634_v51, %v4177_v1  ;;  %v782_v28 = vmul.f32 %v634_v51, %v4186_v11  ;;  %v783_v33 = vmul.f32 %v4913_v56, %v4143_v45 }
 0x11f   :  { %v2854_v35 = vmul.f32 2.0, %v2022_v0  ;;  %v2856_v14 = vmul.f32 2.0, %v2471_v57  ;;  %v2024_v55 = vpop.f32.mrb[1].mxu0  ;;  %3701 = vmatmul.mubr.msk.f32.gmra.mrb[106].mxu0 %vm1763_vm0, %v1748_v4  ;;  %v2473_v25 = vpop.f32.mrb[1].mxu1  ;;  %3765 = vmatmul.mubr.msk.f32.gmra.mrb[106].mxu1 %vm1763_vm0, %v1748_v4  ;;  %v785_v6 = vmul.f32 %v4913_v56, %v4163_v59  ;;  %v1035_v51 = vadd.f32 1.0, %v779_v10  ;;  %v1292_v57 = vld [vmem:[#allocation11 + $0x368] sm:$0xff] }
 0x120   :  { %v2855_v15 = vmul.f32 2.0, %v2024_v55  ;;  %v2857_v3 = vmul.f32 2.0, %v2473_v25  ;;  %2344 = vmatprep.mubr.f32.mxu0 %v6058_v20  ;;  %2793 = vmatprep.mubr.f32.mxu1 %v6058_v20  ;;  %v1037_v0 = vadd.f32 1.0, %v781_v36  ;;  %v1036_v39 = vadd.f32 1.0, %v780_v26 }
 0x121   :  { %v3110_v4 = vadd.f32 %v2854_v35, %v4199_v23  ;;  %v3112_v60 = vadd.f32 %v2856_v14, %v4214_v41  ;;  %v1038_v38 = vadd.f32 1.0, %v782_v28  ;;  %v4951_v2 = vmul.f32 %v1291_v29, %v1035_v51 }
 0x122   :  { %v3111_v13 = vadd.f32 %v2855_v15, %v4216_v42  ;;  %v3113_v61 = vadd.f32 %v2857_v3, %v4218_v46  ;;  %v2028_v55 = vpop.f32.mrb[2].mxu0  ;;  %v2477_v25 = vpop.f32.mrb[2].mxu1  ;;  %v4953_v22 = vmul.f32 %v1293_v58, %v1037_v0  ;;  %v4957_v41 = vmul.f32 %v1292_v57, %v1036_v39  ;;  %v1295_v46 = vld [vmem:[#allocation11 + $0x380] sm:$0xff]  ;;  %v1297_v3 = vld [vmem:[#allocation11 + $0x390] sm:$0xff] }
 0x123   :  { %3366 = vst [vmem:[#allocation12] sm:$0xff] %v3110_v4  ;;  %3368 = vst [vmem:[#allocation12 + $0x10] sm:$0xff] %v3112_v60  ;;  %v2858_v10 = vmul.f32 2.0, %v2028_v55  ;;  %v2860_v36 = vmul.f32 2.0, %v2477_v25  ;;  %v2030_v37 = vpop.f32.mrb[3].mxu0  ;;  %3702 = vmatmul.mubr.msk.f32.gmra.mrb[108].mxu0 %vm1763_vm0, %v1749_v21  ;;  %v2479_v23 = vpop.f32.mrb[3].mxu1  ;;  %3766 = vmatmul.mubr.msk.f32.gmra.mrb[108].mxu1 %vm1763_vm0, %v1749_v21  ;;  %v4959_v42 = vmul.f32 %v1294_v63, %v1038_v38 }
 0x124   :  { %3367 = vst [vmem:[#allocation12 + $0x8] sm:$0xff] %v3111_v13  ;;  %3369 = vst [vmem:[#allocation12 + $0x18] sm:$0xff] %v3113_v61  ;;  %v2859_v15 = vmul.f32 2.0, %v2030_v37  ;;  %v2861_v29 = vmul.f32 2.0, %v2479_v23  ;;  %2350 = vmatprep.mubr.f32.mxu0 %v6058_v20  ;;  %2799 = vmatprep.mubr.f32.mxu1 %v6058_v20  ;;  %v1750_v60 = vld [vmem:[%s6036_s6 + $0x1b8] sm:$0xff]  ;;  %v1039_v58 = vadd.f32 1.0, %v783_v33  ;;  %v784_v13 = vmul.f32 %v4913_v56, %v4177_v1 }
 0x125   :  { %v1041_v21 = vadd.f32 1.0, %v785_v6  ;;  %v3114_v39 = vadd.f32 %v2858_v10, %v4220_v48  ;;  %v3116_v38 = vadd.f32 %v2860_v36, %v4222_v49  ;;  %v786_v37 = vmul.f32 %v4913_v56, %v4186_v11  ;;  %v1296_v6 = vld [vmem:[#allocation11 + $0x388] sm:$0xff]  ;;  %v1298_v48 = vld [vmem:[#allocation11 + $0x398] sm:$0xff]  ;;  %v1751_v4 = vld [vmem:[%s6036_s6 + $0x1c0] sm:$0xff] }
 0x126   :  { %v3115_v61 = vadd.f32 %v2859_v15, %v4228_v52  ;;  %v3117_v63 = vadd.f32 %v2861_v29, %v4230_v53  ;;  %v2034_v26 = vpop.f32.mrb[4].mxu0  ;;  %v2483_v28 = vpop.f32.mrb[4].mxu1  ;;  %v4974_v35 = vmul.f32 %v1295_v46, %v1039_v58  ;;  %v1040_v52 = vadd.f32 1.0, %v784_v13 }
 0x127   :  { %v4976_v33 = vmul.f32 %v1297_v3, %v1041_v21  ;;  %3370 = vst [vmem:[#allocation12 + $0x20] sm:$0xff] %v3114_v39  ;;  %3372 = vst [vmem:[#allocation12 + $0x30] sm:$0xff] %v3116_v38  ;;  %v2862_v49 = vmul.f32 2.0, %v2034_v26  ;;  %v2864_v14 = vmul.f32 2.0, %v2483_v28  ;;  %v2036_v51 = vpop.f32.mrb[5].mxu0  ;;  %3703 = vmatmul.mubr.msk.f32.gmra.mrb[110].mxu0 %vm1763_vm0, %v1750_v60  ;;  %v2485_v56 = vpop.f32.mrb[5].mxu1  ;;  %3767 = vmatmul.mubr.msk.f32.gmra.mrb[110].mxu1 %vm1763_vm0, %v1750_v60 }
 0x128   :  { %v1042_v53 = vadd.f32 1.0, %v786_v37  ;;  %3371 = vst [vmem:[#allocation12 + $0x28] sm:$0xff] %v3115_v61  ;;  %3373 = vst [vmem:[#allocation12 + $0x38] sm:$0xff] %v3117_v63  ;;  %v2863_v0 = vmul.f32 2.0, %v2036_v51  ;;  %v2865_v57 = vmul.f32 2.0, %v2485_v56  ;;  %2356 = vmatprep.mubr.f32.mxu0 %v6058_v20  ;;  %2805 = vmatprep.mubr.f32.mxu1 %v6058_v20  ;;  %vm310_vm11 = vcmp.lt.s32.totalorder %v4916_v5, %v4128_v40  ;;  %v1752_v39 = vld [vmem:[%s6036_s6 + $0x1c8] sm:$0xff] }
 0x129   :  { %vm506_vm12 = vcmp.lt.s32.totalorder %v4916_v5, %v4141_v44  ;;  %v3118_v55 = vadd.f32 %v2862_v49, %v4257_v16  ;;  %v3120_v25 = vadd.f32 %v2864_v14, %v4259_v17  ;;  %v4991_v10 = vmul.f32 %v1296_v6, %v1040_v52  ;;  %v1299_v63 = vld [vmem:[#allocation11 + $0x3a0] sm:$0xff]  ;;  %v1301_v14 = vld [vmem:[#allocation11 + $0x3b0] sm:$0xff]  ;;  %v1300_v56 = vld [vmem:[#allocation11 + $0x3a8] sm:$0xff] }
 0x12a   :  { %v4993_v36 = vmul.f32 %v1298_v48, %v1042_v53  ;;  %v3119_v23 = vadd.f32 %v2863_v0, %v4261_v18  ;;  %v3121_v46 = vadd.f32 %v2865_v57, %v4266_v24  ;;  %v2040_v3 = vpop.f32.mrb[6].mxu0  ;;  %v2489_v15 = vpop.f32.mrb[6].mxu1  ;;  %v376_v29 = vsel %vm310_vm11, %v4138_v43, 0.0 }
 0x12b   :  { %v572_v60 = vsel %vm506_vm12, %v4149_v47, 0.0  ;;  %3374 = vst [vmem:[#allocation12 + $0x40] sm:$0xff] %v3118_v55  ;;  %3376 = vst [vmem:[#allocation12 + $0x50] sm:$0xff] %v3120_v25  ;;  %v2866_v5 = vmul.f32 2.0, %v2040_v3  ;;  %v2868_v16 = vmul.f32 2.0, %v2489_v15  ;;  %v2042_v58 = vpop.f32.mrb[7].mxu0  ;;  %3704 = vmatmul.mubr.msk.f32.gmra.mrb[112].mxu0 %vm1763_vm0, %v1751_v4  ;;  %3768 = vmatmul.mubr.msk.f32.gmra.mrb[112].mxu1 %vm1763_vm0, %v1751_v4  ;;  %vm311_vm13 = vcmp.lt.s32.totalorder %v4919_v54, %v4128_v40 }
 0x12c   :  { %v2491_v17 = vpop.f32.mrb[7].mxu1  ;;  %v636_v21 = vadd.f32 %v572_v60, %v376_v29  ;;  %3375 = vst [vmem:[#allocation12 + $0x48] sm:$0xff] %v3119_v23  ;;  %3377 = vst [vmem:[#allocation12 + $0x58] sm:$0xff] %v3121_v46  ;;  %v2867_v18 = vmul.f32 2.0, %v2042_v58  ;;  %2362 = vmatprep.mubr.f32.mxu0 %v6058_v20  ;;  %2811 = vmatprep.mubr.f32.mxu1 %v6058_v20  ;;  %v377_v38 = vsel %vm311_vm13, %v4138_v43, 0.0  ;;  %v1753_v25 = vld [vmem:[%s6036_s6 + $0x1d0] sm:$0xff] }
 0x12d   :  { %v2869_v24 = vmul.f32 2.0, %v2491_v17  ;;  %vm507_vm14 = vcmp.lt.s32.totalorder %v4919_v54, %v4141_v44  ;;  %v3122_v13 = vadd.f32 %v2866_v5, %v4273_v30  ;;  %v3124_v37 = vadd.f32 %v2868_v16, %v4275_v31  ;;  %v1302_v30 = vld [vmem:[#allocation11 + $0x3b8] sm:$0xff] }
 0x12e   :  { %v787_v61 = vmul.f32 %v636_v21, %v4143_v45  ;;  %v789_v26 = vmul.f32 %v636_v21, %v4163_v59  ;;  %v3123_v28 = vadd.f32 %v2867_v18, %v4277_v32  ;;  %v2046_v48 = vpop.f32.mrb[8].mxu0  ;;  %v2495_v49 = vpop.f32.mrb[8].mxu1  ;;  %v788_v51 = vmul.f32 %v636_v21, %v4177_v1 }
 0x12f   :  { %v3125_v6 = vadd.f32 %v2869_v24, %v4294_v62  ;;  %v790_v52 = vmul.f32 %v636_v21, %v4186_v11  ;;  %3378 = vst [vmem:[#allocation12 + $0x60] sm:$0xff] %v3122_v13  ;;  %3380 = vst [vmem:[#allocation12 + $0x70] sm:$0xff] %v3124_v37  ;;  %v2870_v31 = vmul.f32 2.0, %v2046_v48  ;;  %v2872_v53 = vmul.f32 2.0, %v2495_v49  ;;  %v2048_v0 = vpop.f32.mrb[9].mxu0  ;;  %3705 = vmatmul.mubr.msk.f32.gmra.mrb[114].mxu0 %vm1763_vm0, %v1752_v39  ;;  %v2497_v57 = vpop.f32.mrb[9].mxu1 }
 0x130   :  { %3769 = vmatmul.mubr.msk.f32.gmra.mrb[114].mxu1 %vm1763_vm0, %v1752_v39  ;;  %v1043_v32 = vadd.f32 1.0, %v787_v61  ;;  %v1045_v62 = vadd.f32 1.0, %v789_v26  ;;  %3379 = vst [vmem:[#allocation12 + $0x68] sm:$0xff] %v3123_v28  ;;  %v2871_v4 = vmul.f32 2.0, %v2048_v0  ;;  %v2873_v55 = vmul.f32 2.0, %v2497_v57  ;;  %2368 = vmatprep.mubr.f32.mxu0 %v6058_v20  ;;  %v1754_v37 = vld [vmem:[%s6036_s6 + $0x1d8] sm:$0xff] }
 0x131   :  { %3381 = vst [vmem:[#allocation12 + $0x78] sm:$0xff] %v3125_v6  ;;  %2817 = vmatprep.mubr.f32.mxu1 %v6058_v20  ;;  %v1044_v23 = vadd.f32 1.0, %v788_v51  ;;  %v1046_v46 = vadd.f32 1.0, %v790_v52  ;;  %v3126_v3 = vadd.f32 %v2870_v31, %v4305_v7  ;;  %v3128_v15 = vadd.f32 %v2872_v53, %v4307_v8  ;;  %v6131_v26 = vld [vmem:[#allocation19_spill] sm:$0xff]  ;;  %v6132_v6 = vld [vmem:[#allocation20_spill] sm:$0xff]  ;;  %v6133_v49 = vld [vmem:[#allocation21_spill] sm:$0xff] }
 0x132   :  { %v5028_v29 = vmul.f32 %v1299_v63, %v1043_v32  ;;  %v5030_v60 = vmul.f32 %v1301_v14, %v1045_v62  ;;  %v3127_v5 = vadd.f32 %v2871_v4, %v4309_v9  ;;  %v3129_v16 = vadd.f32 %v2873_v55, %v4312_v12  ;;  %v2052_v58 = vpop.f32.mrb[10].mxu0  ;;  %v2501_v17 = vpop.f32.mrb[10].mxu1  ;;  %v1303_v57 = vld [vmem:[#allocation11 + $0x3c0] sm:$0xff]  ;;  %v1305_v32 = vld [vmem:[#allocation11 + $0x3d0] sm:$0xff] }
 0x133   :  { %v5034_v21 = vmul.f32 %v1300_v56, %v1044_v23  ;;  %v5036_v18 = vmul.f32 %v1302_v30, %v1046_v46  ;;  %3382 = vst [vmem:[#allocation12 + $0x80] sm:$0xff] %v3126_v3  ;;  %3384 = vst [vmem:[#allocation12 + $0x90] sm:$0xff] %v3128_v15  ;;  %v2874_v24 = vmul.f32 2.0, %v2052_v58  ;;  %v2876_v7 = vmul.f32 2.0, %v2501_v17  ;;  %v2054_v39 = vpop.f32.mrb[11].mxu0  ;;  %3706 = vmatmul.mubr.msk.f32.gmra.mrb[116].mxu0 %vm1763_vm0, %v1753_v25  ;;  %v2503_v8 = vpop.f32.mrb[11].mxu1 }
 0x134   :  { %3770 = vmatmul.mubr.msk.f32.gmra.mrb[116].mxu1 %vm1763_vm0, %v1753_v25  ;;  %v573_v9 = vsel %vm507_vm14, %v4149_v47, 0.0  ;;  %vm312_vm15 = vcmp.lt.s32.totalorder %v4924_v19, %v4128_v40  ;;  %3383 = vst [vmem:[#allocation12 + $0x88] sm:$0xff] %v3127_v5  ;;  %3385 = vst [vmem:[#allocation12 + $0x98] sm:$0xff] %v3129_v16  ;;  %v2875_v12 = vmul.f32 2.0, %v2054_v39  ;;  %v2877_v13 = vmul.f32 2.0, %v2503_v8  ;;  %2374 = vmatprep.mubr.f32.mxu0 %v6058_v20  ;;  %v1304_v3 = vld [vmem:[#allocation11 + $0x3c8] sm:$0xff] }
 0x135   :  { %2823 = vmatprep.mubr.f32.mxu1 %v6058_v20  ;;  %v637_v61 = vadd.f32 %v573_v9, %v377_v38  ;;  %v5052_v63 = vsel %vm312_vm15, %v4138_v43, 0.0  ;;  %v3130_v54 = vadd.f32 %v2874_v24, %v4333_v50  ;;  %v3132_v28 = vadd.f32 %v2876_v7, %v6131_v26  ;;  %v1755_v38 = vld [vmem:[%s6036_s6 + $0x1e0] sm:$0xff]  ;;  %v1306_v15 = vld [vmem:[#allocation11 + $0x3d8] sm:$0xff]  ;;  %v6135_v58 = vld [vmem:[#allocation23_spill] sm:$0xff] }
 0x136   :  { %vm508_vm1 = vcmp.lt.s32.totalorder %v4924_v19, %v4141_v44  ;;  %vm313_vm2 = vcmp.lt.s32.totalorder %v4927_v27, %v4128_v40  ;;  %v3131_v48 = vadd.f32 %v2875_v12, %v6132_v6  ;;  %v3133_v14 = vadd.f32 %v2877_v13, %v6133_v49  ;;  %v2058_v51 = vpop.f32.mrb[12].mxu0  ;;  %v2507_v56 = vpop.f32.mrb[12].mxu1  ;;  %v6134_v5 = vld [vmem:[#allocation22_spill] sm:$0xff]  ;;  %v6136_v39 = vld [vmem:[#allocation24_spill] sm:$0xff]  ;;  %v6137_v9 = vld [vmem:[#allocation25_spill] sm:$0xff] }
 0x137   :  { %v791_v50 = vmul.f32 %v637_v61, %v4143_v45  ;;  %v793_v52 = vmul.f32 %v637_v61, %v4163_v59  ;;  %3386 = vst [vmem:[#allocation12 + $0xa0] sm:$0xff] %v3130_v54  ;;  %3388 = vst [vmem:[#allocation12 + $0xb0] sm:$0xff] %v3132_v28  ;;  %v2878_v30 = vmul.f32 2.0, %v2058_v51  ;;  %v2880_v31 = vmul.f32 2.0, %v2507_v56  ;;  %v2060_v53 = vpop.f32.mrb[13].mxu0  ;;  %3707 = vmatmul.mubr.msk.f32.gmra.mrb[118].mxu0 %vm1763_vm0, %v1754_v37  ;;  %v2509_v0 = vpop.f32.mrb[13].mxu1 }
 0x138   :  { %3771 = vmatmul.mubr.msk.f32.gmra.mrb[118].mxu1 %vm1763_vm0, %v1754_v37  ;;  %v792_v62 = vmul.f32 %v637_v61, %v4177_v1  ;;  %v794_v4 = vmul.f32 %v637_v61, %v4186_v11  ;;  %3387 = vst [vmem:[#allocation12 + $0xa8] sm:$0xff] %v3131_v48  ;;  %3389 = vst [vmem:[#allocation12 + $0xb8] sm:$0xff] %v3133_v14  ;;  %v2879_v55 = vmul.f32 2.0, %v2060_v53  ;;  %v2881_v25 = vmul.f32 2.0, %v2509_v0  ;;  %v6139_v53 = vld [vmem:[#allocation27_spill] sm:$0xff] }
 0x139   :  { %2380 = vmatprep.mubr.f32.mxu0 %v6058_v20  ;;  %2829 = vmatprep.mubr.f32.mxu1 %v6058_v20  ;;  %v1047_v23 = vadd.f32 1.0, %v791_v50  ;;  %v1049_v46 = vadd.f32 1.0, %v793_v52  ;;  %v3134_v16 = vadd.f32 %v2878_v30, %v6134_v5  ;;  %v3136_v17 = vadd.f32 %v2880_v31, %v6135_v58  ;;  %v1756_v50 = vld [vmem:[%s6036_s6 + $0x1e8] sm:$0xff]  ;;  %v6138_v30 = vld [vmem:[#allocation26_spill] sm:$0xff] }
 0x13a   :  { %v1048_v24 = vadd.f32 1.0, %v792_v62  ;;  %v1050_v7 = vadd.f32 1.0, %v794_v4  ;;  %v3135_v8 = vadd.f32 %v2879_v55, %v6136_v39  ;;  %v3137_v12 = vadd.f32 %v2881_v25, %v6137_v9  ;;  %v2064_v13 = vpop.f32.mrb[14].mxu0  ;;  %v2513_v37 = vpop.f32.mrb[14].mxu1  ;;  %v6141_v4 = vld [vmem:[#allocation29_spill] sm:$0xff]  ;;  %v6142_v9 = vld [vmem:[#allocation30_spill] sm:$0xff] }
 0x13b   :  { %v5077_v61 = vmul.f32 %v1303_v57, %v1047_v23  ;;  %v5079_v54 = vmul.f32 %v1305_v32, %v1049_v46  ;;  %3390 = vst [vmem:[#allocation12 + $0xc0] sm:$0xff] %v3134_v16  ;;  %3392 = vst [vmem:[#allocation12 + $0xd0] sm:$0xff] %v3136_v17  ;;  %v2882_v26 = vmul.f32 2.0, %v2064_v13  ;;  %v2884_v28 = vmul.f32 2.0, %v2513_v37  ;;  %v2066_v6 = vpop.f32.mrb[15].mxu0  ;;  %3708 = vmatmul.mubr.msk.f32.gmra.mrb[120].mxu0 %vm1763_vm0, %v1755_v38  ;;  %v2515_v48 = vpop.f32.mrb[15].mxu1 }
 0x13c   :  { %3772 = vmatmul.mubr.msk.f32.gmra.mrb[120].mxu1 %vm1763_vm0, %v1755_v38  ;;  %v5083_v49 = vmul.f32 %v1304_v3, %v1048_v24  ;;  %v5085_v14 = vmul.f32 %v1306_v15, %v1050_v7  ;;  %3391 = vst [vmem:[#allocation12 + $0xc8] sm:$0xff] %v3135_v8  ;;  %3393 = vst [vmem:[#allocation12 + $0xd8] sm:$0xff] %v3137_v12  ;;  %v2883_v51 = vmul.f32 2.0, %v2066_v6  ;;  %v2885_v56 = vmul.f32 2.0, %v2515_v48  ;;  %v6140_v32 = vld [vmem:[#allocation28_spill] sm:$0xff]  ;;  %v1307_v24 = vld [vmem:[#allocation11 + $0x3e0] sm:$0xff] }
 0x13d   :  { %2386 = vmatprep.mubr.f32.mxu0 %v6058_v20  ;;  %2835 = vmatprep.mubr.f32.mxu1 %v6058_v20  ;;  %v574_v38 = vsel %vm508_vm1, %v4149_v47, 0.0  ;;  %v5100_v52 = vsel %vm313_vm2, %v4138_v43, 0.0  ;;  %v3138_v31 = vadd.f32 %v2882_v26, %v6138_v30  ;;  %v3140_v0 = vadd.f32 %v2884_v28, %v6139_v53  ;;  %v1757_v17 = vld [vmem:[%s6036_s6 + $0x1f0] sm:$0xff]  ;;  %v6143_v13 = vld [vmem:[#allocation31_spill] sm:$0xff]  ;;  %v1310_v48 = vld [vmem:[#allocation11 + $0x3f8] sm:$0xff] }
 0x13e   :  { %v638_v57 = vadd.f32 %v574_v38, %v5052_v63  ;;  %vm509_vm3 = vcmp.lt.s32.totalorder %v4927_v27, %v4141_v44  ;;  %v3139_v62 = vadd.f32 %v2883_v51, %v6140_v32  ;;  %v3141_v19 = vadd.f32 %v2885_v56, %v6141_v4  ;;  %v2070_v55 = vpop.f32.mrb[16].mxu0  ;;  %v2519_v25 = vpop.f32.mrb[16].mxu1  ;;  %v1309_v7 = vld [vmem:[#allocation11 + $0x3f0] sm:$0xff]  ;;  %v1308_v6 = vld [vmem:[#allocation11 + $0x3e8] sm:$0xff] }
 0x13f   :  { %v575_v23 = vsel %vm509_vm3, %v4149_v47, 0.0  ;;  %vm314_vm4 = vcmp.lt.s32.totalorder %v4930_v34, %v4128_v40  ;;  %3394 = vst [vmem:[#allocation12 + $0xe0] sm:$0xff] %v3138_v31  ;;  %3396 = vst [vmem:[#allocation12 + $0xf0] sm:$0xff] %v3140_v0  ;;  %v2886_v46 = vmul.f32 2.0, %v2070_v55  ;;  %v2888_v3 = vmul.f32 2.0, %v2519_v25  ;;  %v2072_v15 = vpop.f32.mrb[17].mxu0  ;;  %3709 = vmatmul.mubr.msk.f32.gmra.mrb[122].mxu0 %vm1763_vm0, %v1756_v50 }
 0x140   :  { %v2521_v63 = vpop.f32.mrb[17].mxu1  ;;  %3773 = vmatmul.mubr.msk.f32.gmra.mrb[122].mxu1 %vm1763_vm0, %v1756_v50  ;;  %v795_v27 = vmul.f32 %v638_v57, %v4143_v45  ;;  %v797_v5 = vmul.f32 %v638_v57, %v4163_v59  ;;  %3395 = vst [vmem:[#allocation12 + $0xe8] sm:$0xff] %v3139_v62  ;;  %3397 = vst [vmem:[#allocation12 + $0xf8] sm:$0xff] %v3141_v19  ;;  %v2887_v16 = vmul.f32 2.0, %v2072_v15  ;;  %2392 = vmatprep.mubr.f32.mxu0 %v6058_v20  ;;  %v6144_v51 = vld [vmem:[#allocation32_spill] sm:$0xff]  ;;  %v6145_v50 = vld [vmem:[#allocation33_spill] sm:$0xff] }
 0x141   :  { %v2889_v58 = vmul.f32 2.0, %v2521_v63  ;;  %2841 = vmatprep.mubr.f32.mxu1 %v6058_v20  ;;  %v796_v39 = vmul.f32 %v638_v57, %v4177_v1  ;;  %v798_v8 = vmul.f32 %v638_v57, %v4186_v11  ;;  %v3142_v12 = vadd.f32 %v2886_v46, %v6142_v9 }
 0x142   :  { %v3144_v37 = vadd.f32 %v2888_v3, %v6143_v13  ;;  %v1051_v26 = vadd.f32 1.0, %v795_v27  ;;  %v1053_v28 = vadd.f32 1.0, %v797_v5  ;;  %v3143_v56 = vadd.f32 %v2887_v16, %v6144_v51  ;;  %v2076_v30 = vpop.f32.mrb[18].mxu0  ;;  %v2525_v31 = vpop.f32.mrb[18].mxu1  ;;  %v1758_v3 = vld [vmem:[%s6036_s6 + $0x1f8] sm:$0xff]  ;;  %v6146_v27 = vld [vmem:[#allocation34_spill] sm:$0xff] }
 0x143   :  { %v3145_v38 = vadd.f32 %v2889_v58, %v6145_v50  ;;  %v1052_v53 = vadd.f32 1.0, %v796_v39  ;;  %v1054_v0 = vadd.f32 1.0, %v798_v8  ;;  %3398 = vst [vmem:[#allocation12 + $0x100] sm:$0xff] %v3142_v12  ;;  %v2890_v32 = vmul.f32 2.0, %v2076_v30  ;;  %v2078_v62 = vpop.f32.mrb[19].mxu0  ;;  %3710 = vmatmul.mubr.msk.f32.gmra.mrb[124].mxu0 %vm1763_vm0, %v1757_v17  ;;  %v2527_v4 = vpop.f32.mrb[19].mxu1 }
 0x144   :  { %3400 = vst [vmem:[#allocation12 + $0x110] sm:$0xff] %v3144_v37  ;;  %v2892_v57 = vmul.f32 2.0, %v2525_v31  ;;  %3774 = vmatmul.mubr.msk.f32.gmra.mrb[124].mxu1 %vm1763_vm0, %v1757_v17  ;;  %v5129_v19 = vmul.f32 %v1307_v24, %v1051_v26  ;;  %v5131_v55 = vmul.f32 %v1309_v7, %v1053_v28  ;;  %3399 = vst [vmem:[#allocation12 + $0x108] sm:$0xff] %v3143_v56  ;;  %v2891_v25 = vmul.f32 2.0, %v2078_v62  ;;  %v6147_v16 = vld [vmem:[#allocation35_spill] sm:$0xff]  ;;  %v6149_v39 = vld [vmem:[#allocation37_spill] sm:$0xff] }
 0x145   :  { %3401 = vst [vmem:[#allocation12 + $0x118] sm:$0xff] %v3145_v38  ;;  %v2893_v46 = vmul.f32 2.0, %v2527_v4  ;;  %2398 = vmatprep.mubr.f32.mxu0 %v6058_v20  ;;  %2847 = vmatprep.mubr.f32.mxu1 %v6058_v20  ;;  %v5138_v15 = vmul.f32 %v1308_v6, %v1052_v53  ;;  %v5140_v63 = vmul.f32 %v1310_v48, %v1054_v0  ;;  %v380_v24 = vsel %vm314_vm4, %v4138_v43, 0.0  ;;  %v6148_v20 = vld [vmem:[#allocation36_spill] sm:$0xff]  ;;  %v6150_v13 = vld [vmem:[#allocation18_spill] sm:$0xff]  ;;  %s3895_s6 = smov [#allocation12]  }
 0x146   :  { %v3146_v5 = vadd.f32 %v2890_v32, %v6146_v27  ;;  %v3148_v58 = vadd.f32 %v2892_v57, %v6147_v16  ;;  %v639_v17 = vadd.f32 %v575_v23, %v5100_v52  ;;  %v3147_v7 = vadd.f32 %v2891_v25, %v6148_v20  ;;  %v2082_v9 = vpop.f32.mrb[20].mxu0  ;;  %v2531_v12 = vpop.f32.mrb[20].mxu1  ;;  %v1311_v50 = vld [vmem:[#allocation11 + $0x400] sm:$0xff]  ;;  %v1313_v38 = vld [vmem:[#allocation11 + $0x410] sm:$0xff]  ;;  %v6152_v32 = vld [vmem:[#allocation39_spill] sm:$0xff]  ;;  %s3627_s15 = sshll.u32 %s3895_s6, 4  ;;  %s3628_s15 = int_to_ptr.vmem [resolvable:$true] %s3627_s15 }
 0x147   :  { %v3149_v8 = vadd.f32 %v2893_v46, %v6149_v39  ;;  %vm510_vm5 = vcmp.lt.s32.totalorder %v4930_v34, %v4141_v44  ;;  %v5154_v37 = vadd.s32 272, %v6150_v13  ;;  %v2894_v52 = vmul.f32 2.0, %v2082_v9  ;;  %v2084_v26 = vpop.f32.mrb[21].mxu0  ;;  %3711 = vmatmul.mubr.msk.f32.gmra.mrb[126].mxu0 %vm1763_vm0, %v1758_v3  ;;  %v2533_v28 = vpop.f32.mrb[21].mxu1  ;;  %v6151_v53 = vld [vmem:[#allocation38_spill] sm:$0xff]  ;;  %v1312_v25 = vld [vmem:[#allocation11 + $0x408] sm:$0xff]  ;;  %p3860_p1 = scmp.lt.s32.totalorder %s3628_s15, %s3628_s15 }
 0x148   :  { %3402 = vst [vmem:[#allocation12 + $0x120] sm:$0xff] %v3146_v5  ;;  %3404 = vst [vmem:[#allocation12 + $0x130] sm:$0xff] %v3148_v58  ;;  %v2896_v23 = vmul.f32 2.0, %v2531_v12  ;;  %3775 = vmatmul.mubr.msk.f32.gmra.mrb[126].mxu1 %vm1763_vm0, %v1758_v3  ;;  %v799_v6 = vmul.f32 %v639_v17, %v4143_v45  ;;  %v801_v48 = vmul.f32 %v639_v17, %v4163_v59  ;;  %v2895_v51 = vmul.f32 2.0, %v2084_v26  ;;  %v1314_v46 = vld [vmem:[#allocation11 + $0x418] sm:$0xff]  ;;  %v6153_v3 = vld [vmem:[#allocation40_spill] sm:$0xff] }
 0x149   :  { %3403 = vst [vmem:[#allocation12 + $0x128] sm:$0xff] %v3147_v7  ;;  %3405 = vst [vmem:[#allocation12 + $0x138] sm:$0xff] %v3149_v8  ;;  %v2897_v56 = vmul.f32 2.0, %v2533_v28  ;;  %v800_v30 = vmul.f32 %v639_v17, %v4177_v1  ;;  %v802_v31 = vmul.f32 %v639_v17, %v4186_v11  ;;  %v3150_v0 = vadd.f32 %v2894_v52, %v6151_v53  ;;  %v6154_v5 = vld [vmem:[#allocation41_spill] sm:$0xff]  ;;  %s3855_s16 = scalar_lea.vmem %s3628_s15, 32768 }
 0x14a   :  { %v3152_v57 = vadd.f32 %v2896_v23, %v6152_v32  ;;  %v1055_v62 = vadd.f32 1.0, %v799_v6  ;;  %v1057_v4 = vadd.f32 1.0, %v801_v48  ;;  %v3151_v27 = vadd.f32 %v2895_v51, %v6153_v3  ;;  %v2088_v58 = vpop.f32.mrb[22].mxu0  ;;  %v2537_v20 = vpop.f32.mrb[22].mxu1  ;;  %v6157_v51 = vld [vmem:[#allocation42_spill] sm:$0xff]  ;;  %p3856_p0 = scmp.ne.s32.totalorder %s3628_s15, %s3855_s16  ;;  %p3861_p2 = scmp.lt.s32.totalorder %s3855_s16, %s3855_s16 }
 0x14b   :  { %v3153_v16 = vadd.f32 %v2897_v56, %v6154_v5  ;;  %v1056_v7 = vadd.f32 1.0, %v800_v30  ;;  %v1058_v39 = vadd.f32 1.0, %v802_v31  ;;  %3406 = vst [vmem:[#allocation12 + $0x140] sm:$0xff] %v3150_v0  ;;  %v2898_v8 = vmul.f32 2.0, %v2088_v58  ;;  %v2090_v9 = vpop.f32.mrb[23].mxu0  ;;  %v2539_v12 = vpop.f32.mrb[23].mxu1 }
 0x14c   :  { %3408 = vst [vmem:[#allocation12 + $0x150] sm:$0xff] %v3152_v57  ;;  %v2900_v17 = vmul.f32 2.0, %v2537_v20  ;;  %v5166_v52 = vmul.f32 %v1311_v50, %v1055_v62  ;;  %v5168_v23 = vmul.f32 %v1313_v38, %v1057_v4  ;;  %3407 = vst [vmem:[#allocation12 + $0x148] sm:$0xff] %v3151_v27  ;;  %v2899_v26 = vmul.f32 2.0, %v2090_v9  ;;  %v6158_v30 = vld [vmem:[#allocation43_spill] sm:$0xff]  ;;  %v6159_v38 = vld [vmem:[#allocation44_spill] sm:$0xff]  ;;  %p3862_p3 = por %p3861_p2, %p3860_p1 }
 0x14d   :  { %3409 = vst [vmem:[#allocation12 + $0x158] sm:$0xff] %v3153_v16  ;;  %v2901_v28 = vmul.f32 2.0, %v2539_v12  ;;  %v5170_v6 = vmul.f32 %v1312_v25, %v1056_v7  ;;  %v5172_v48 = vmul.f32 %v1314_v46, %v1058_v39  ;;  %v3154_v56 = vadd.f32 %v2898_v8, %v6157_v51  ;;  %v6160_v0 = vld [vmem:[#allocation45_spill] sm:$0xff]  ;;  %v6161_v7 = vld [vmem:[#allocation46_spill] sm:$0xff]  ;;  %v6162_v8 = vld [vmem:[#allocation47_spill] sm:$0xff] }
 0x14e   :  { %v3156_v31 = vadd.f32 %v2900_v17, %v6158_v30  ;;  %v576_v50 = vsel %vm510_vm5, %v4149_v47, 0.0  ;;  %vm315_vm0 = vcmp.lt.s32.totalorder %v5154_v37, %v4128_v40  ;;  %v3155_v53 = vadd.f32 %v2899_v26, %v6159_v38  ;;  %v2094_v57 = vpop.f32.mrb[24].mxu0  ;;  %v2543_v62 = vpop.f32.mrb[24].mxu1  ;;  %v1315_v9 = vld [vmem:[#allocation11 + $0x420] sm:$0xff]  ;;  %v1317_v12 = vld [vmem:[#allocation11 + $0x430] sm:$0xff]  ;;  %v6164_v30 = vld [vmem:[#allocation49_spill] sm:$0xff]  ;;  %p3863_p4 = pnand %p3862_p3, %p3856_p0 }
 0x14f   :  { %6155 = vst [vmem:[#allocation19_spill] sm:$0xff] %v5170_v6  ;;  %6156 = vst [vmem:[#allocation20_spill] sm:$0xff] %v5172_v48  ;;  %v3157_v32 = vadd.f32 %v2901_v28, %v6160_v0  ;;  %v640_v4 = vadd.f32 %v576_v50, %v380_v24  ;;  %v381_v25 = vsel %vm315_vm0, %v4138_v43, 0.0  ;;  %v2902_v46 = vmul.f32 2.0, %v2094_v57  ;;  %v2096_v27 = vpop.f32.mrb[25].mxu0  ;;  %v2545_v5 = vpop.f32.mrb[25].mxu1 }
 0x150   :  { %3410 = vst [vmem:[#allocation12 + $0x160] sm:$0xff] %v3154_v56  ;;  %3412 = vst [vmem:[#allocation12 + $0x170] sm:$0xff] %v3156_v31  ;;  %v2904_v3 = vmul.f32 2.0, %v2543_v62  ;;  %vm511_vm6 = vcmp.lt.s32.totalorder %v5154_v37, %v4141_v44  ;;  %v5188_v34 = vadd.s32 280, %v6150_v13  ;;  %v2903_v16 = vmul.f32 2.0, %v2096_v27  ;;  %v6163_v51 = vld [vmem:[#allocation48_spill] sm:$0xff] }
 0x151   :  { %3411 = vst [vmem:[#allocation12 + $0x168] sm:$0xff] %v3155_v53  ;;  %3413 = vst [vmem:[#allocation12 + $0x178] sm:$0xff] %v3157_v32  ;;  %v2905_v58 = vmul.f32 2.0, %v2545_v5  ;;  %v803_v24 = vmul.f32 %v640_v4, %v4143_v45  ;;  %v805_v20 = vmul.f32 %v640_v4, %v4163_v59  ;;  %v3158_v39 = vadd.f32 %v2902_v46, %v6161_v7  ;;  %v1316_v32 = vld [vmem:[#allocation11 + $0x428] sm:$0xff]  ;;  %v1318_v57 = vld [vmem:[#allocation11 + $0x438] sm:$0xff] }
 0x152   :  { %v3160_v17 = vadd.f32 %v2904_v3, %v6162_v8  ;;  %v804_v26 = vmul.f32 %v640_v4, %v4177_v1  ;;  %v806_v28 = vmul.f32 %v640_v4, %v4186_v11  ;;  %v3159_v56 = vadd.f32 %v2903_v16, %v6163_v51  ;;  %v2100_v50 = vpop.f32.mrb[26].mxu0  ;;  %v2549_v38 = vpop.f32.mrb[26].mxu1  ;;  %v6168_v51 = vld [vmem:[#allocation51_spill] sm:$0xff] }
 0x153   :  { %v3161_v31 = vadd.f32 %v2905_v58, %v6164_v30  ;;  %v1059_v53 = vadd.f32 1.0, %v803_v24  ;;  %v1061_v0 = vadd.f32 1.0, %v805_v20  ;;  %3414 = vst [vmem:[#allocation12 + $0x180] sm:$0xff] %v3158_v39  ;;  %v2906_v62 = vmul.f32 2.0, %v2100_v50  ;;  %v2102_v3 = vpop.f32.mrb[27].mxu0  ;;  %v2551_v27 = vpop.f32.mrb[27].mxu1 }
 0x154   :  { %3416 = vst [vmem:[#allocation12 + $0x190] sm:$0xff] %v3160_v17  ;;  %v2908_v46 = vmul.f32 2.0, %v2549_v38  ;;  %v1060_v5 = vadd.f32 1.0, %v804_v26  ;;  %v1062_v7 = vadd.f32 1.0, %v806_v28  ;;  %3415 = vst [vmem:[#allocation12 + $0x188] sm:$0xff] %v3159_v56  ;;  %v2907_v4 = vmul.f32 2.0, %v2102_v3 }
 0x155   :  { %3417 = vst [vmem:[#allocation12 + $0x198] sm:$0xff] %v3161_v31  ;;  %v2909_v16 = vmul.f32 2.0, %v2551_v27  ;;  %v5198_v8 = vmul.f32 %v1315_v9, %v1059_v53  ;;  %v5200_v58 = vmul.f32 %v1317_v12, %v1061_v0  ;;  %v6167_v24 = vld [vmem:[#allocation50_spill] sm:$0xff]  ;;  %v6171_v50 = vld [vmem:[#allocation52_spill] sm:$0xff]  ;;  %v6172_v26 = vld [vmem:[#allocation53_spill] sm:$0xff]  ;;  %v577_v9 = vsel %vm511_vm6, %v4149_v47, 0.0 }
 0x156   :  { %v3162_v20 = vadd.f32 %v2906_v62, %v6167_v24  ;;  %v3164_v30 = vadd.f32 %v2908_v46, %v6168_v51  ;;  %v5204_v39 = vmul.f32 %v1316_v32, %v1060_v5  ;;  %v5206_v17 = vmul.f32 %v1318_v57, %v1062_v7  ;;  %v2106_v56 = vpop.f32.mrb[28].mxu0  ;;  %v2555_v31 = vpop.f32.mrb[28].mxu1  ;;  %v6173_v27 = vld [vmem:[#allocation54_spill] sm:$0xff]  ;;  %v6174_v7 = vld [vmem:[#allocation55_spill] sm:$0xff] }
 0x157   :  { %6165 = vst [vmem:[#allocation21_spill] sm:$0xff] %v5198_v8  ;;  %6166 = vst [vmem:[#allocation22_spill] sm:$0xff] %v5200_v58  ;;  %v3163_v38 = vadd.f32 %v2907_v4, %v6171_v50  ;;  %v3165_v28 = vadd.f32 %v2909_v16, %v6172_v26  ;;  %vm316_vm7 = vcmp.lt.s32.totalorder %v5188_v34, %v4128_v40  ;;  %v2910_v12 = vmul.f32 2.0, %v2106_v56  ;;  %v2108_v0 = vpop.f32.mrb[29].mxu0  ;;  %v2557_v32 = vpop.f32.mrb[29].mxu1  ;;  %v1319_v24 = vld [vmem:[#allocation11 + $0x440] sm:$0xff] }
 0x158   :  { %6169 = vst [vmem:[#allocation23_spill] sm:$0xff] %v5204_v39  ;;  %6170 = vst [vmem:[#allocation24_spill] sm:$0xff] %v5206_v17  ;;  %v2912_v53 = vmul.f32 2.0, %v2555_v31  ;;  %v641_v57 = vadd.f32 %v577_v9, %v381_v25  ;;  %v382_v62 = vsel %vm316_vm7, %v4138_v43, 0.0  ;;  %v2911_v46 = vmul.f32 2.0, %v2108_v0  ;;  %v1320_v31 = vld [vmem:[#allocation11 + $0x448] sm:$0xff] }
 0x159   :  { %3418 = vst [vmem:[#allocation12 + $0x1a0] sm:$0xff] %v3162_v20  ;;  %3420 = vst [vmem:[#allocation12 + $0x1b0] sm:$0xff] %v3164_v30  ;;  %v2913_v3 = vmul.f32 2.0, %v2557_v32  ;;  %vm512_vm8 = vcmp.lt.s32.totalorder %v5188_v34, %v4141_v44  ;;  %v5220_v37 = vadd.s32 288, %v6150_v13  ;;  %v3166_v5 = vadd.f32 %v2910_v12, %v6173_v27  ;;  %v6175_v20 = vld [vmem:[#allocation56_spill] sm:$0xff]  ;;  %v6176_v30 = vld [vmem:[#allocation57_spill] sm:$0xff] }
 0x15a   :  { %3419 = vst [vmem:[#allocation12 + $0x1a8] sm:$0xff] %v3163_v38  ;;  %3421 = vst [vmem:[#allocation12 + $0x1b8] sm:$0xff] %v3165_v28  ;;  %v3168_v4 = vadd.f32 %v2912_v53, %v6174_v7  ;;  %v807_v16 = vmul.f32 %v641_v57, %v4143_v45  ;;  %v809_v25 = vmul.f32 %v641_v57, %v4163_v59  ;;  %v2112_v38 = vpop.f32.mrb[30].mxu0  ;;  %v2561_v26 = vpop.f32.mrb[30].mxu1  ;;  %v1321_v28 = vld [vmem:[#allocation11 + $0x450] sm:$0xff]  ;;  %v1322_v12 = vld [vmem:[#allocation11 + $0x458] sm:$0xff] }
 0x15b   :  { %v3167_v51 = vadd.f32 %v2911_v46, %v6175_v20  ;;  %v3169_v50 = vadd.f32 %v2913_v3, %v6176_v30  ;;  %v808_v56 = vmul.f32 %v641_v57, %v4177_v1  ;;  %v810_v9 = vmul.f32 %v641_v57, %v4186_v11  ;;  %3422 = vst [vmem:[#allocation12 + $0x1c0] sm:$0xff] %v3166_v5  ;;  %v2114_v32 = vpop.f32.mrb[31].mxu0  ;;  %v2563_v27 = vpop.f32.mrb[31].mxu1  ;;  %v6177_v39 = vld [vmem:[#allocation58_spill] sm:$0xff]  ;;  %v6178_v8 = vld [vmem:[#allocation59_spill] sm:$0xff] }
 0x15c   :  { %3424 = vst [vmem:[#allocation12 + $0x1d0] sm:$0xff] %v3168_v4  ;;  %v2914_v53 = vmul.f32 2.0, %v2112_v38  ;;  %v2916_v0 = vmul.f32 2.0, %v2561_v26  ;;  %v1063_v7 = vadd.f32 1.0, %v807_v16  ;;  %v1065_v17 = vadd.f32 1.0, %v809_v25  ;;  %v6181_v4 = vld [vmem:[#allocation60_spill] sm:$0xff] }
 0x15d   :  { %3423 = vst [vmem:[#allocation12 + $0x1c8] sm:$0xff] %v3167_v51  ;;  %3425 = vst [vmem:[#allocation12 + $0x1d8] sm:$0xff] %v3169_v50  ;;  %v2915_v46 = vmul.f32 2.0, %v2114_v32  ;;  %v2917_v3 = vmul.f32 2.0, %v2563_v27  ;;  %v1064_v20 = vadd.f32 1.0, %v808_v56  ;;  %v1066_v30 = vadd.f32 1.0, %v810_v9 }
 0x15e   :  { %v3170_v58 = vadd.f32 %v2914_v53, %v6177_v39  ;;  %v3172_v48 = vadd.f32 %v2916_v0, %v6178_v8  ;;  %v5232_v57 = vmul.f32 %v1319_v24, %v1063_v7  ;;  %v5234_v5 = vmul.f32 %v1321_v28, %v1065_v17  ;;  %v6182_v26 = vld [vmem:[#allocation61_spill] sm:$0xff]  ;;  %v2118_v16 = vpop.f32.mrb[32].mxu0  ;;  %v2567_v25 = vpop.f32.mrb[32].mxu1  ;;  %v6186_v53 = vld [vmem:[#allocation63_spill] sm:$0xff]  ;;  %v6187_v32 = vld [vmem:[#allocation64_spill] sm:$0xff] }
 0x15f   :  { %v3171_v38 = vadd.f32 %v2915_v46, %v6181_v4  ;;  %v3173_v6 = vadd.f32 %v2917_v3, %v6182_v26  ;;  %v5238_v51 = vmul.f32 %v1320_v31, %v1064_v20  ;;  %v5240_v50 = vmul.f32 %v1322_v12, %v1066_v30  ;;  %v2120_v9 = vpop.f32.mrb[33].mxu0  ;;  %v2569_v8 = vpop.f32.mrb[33].mxu1  ;;  %v6188_v7 = vld [vmem:[#allocation65_spill] sm:$0xff] }
 0x160   :  { %6179 = vst [vmem:[#allocation25_spill] sm:$0xff] %v5232_v57  ;;  %6180 = vst [vmem:[#allocation26_spill] sm:$0xff] %v5234_v5  ;;  %v2918_v56 = vmul.f32 2.0, %v2118_v16  ;;  %v2920_v39 = vmul.f32 2.0, %v2567_v25  ;;  %v578_v17 = vsel %vm512_vm8, %v4149_v47, 0.0  ;;  %vm317_vm9 = vcmp.lt.s32.totalorder %v5220_v37, %v4128_v40  ;;  %v1323_v16 = vld [vmem:[#allocation11 + $0x460] sm:$0xff] }
 0x161   :  { %6183 = vst [vmem:[#allocation27_spill] sm:$0xff] %v5238_v51  ;;  %6184 = vst [vmem:[#allocation28_spill] sm:$0xff] %v5240_v50  ;;  %v2919_v24 = vmul.f32 2.0, %v2120_v9  ;;  %v2921_v28 = vmul.f32 2.0, %v2569_v8  ;;  %v642_v31 = vadd.f32 %v578_v17, %v382_v62  ;;  %vm513_vm10 = vcmp.lt.s32.totalorder %v5220_v37, %v4141_v44  ;;  %v1325_v25 = vld [vmem:[#allocation11 + $0x470] sm:$0xff]  ;;  %v6192_v51 = vld [vmem:[#allocation69_spill] sm:$0xff] }
 0x162   :  { %3426 = vst [vmem:[#allocation12 + $0x1e0] sm:$0xff] %v3170_v58  ;;  %3428 = vst [vmem:[#allocation12 + $0x1f0] sm:$0xff] %v3172_v48  ;;  %v383_v58 = vsel %vm317_vm9, %v4138_v43, 0.0  ;;  %v6185_v48 = vld [vmem:[#allocation62_spill] sm:$0xff]  ;;  %v3176_v0 = vadd.f32 %v2920_v39, %v6186_v53  ;;  %v5254_v34 = vadd.s32 296, %v6150_v13  ;;  %v2573_v3 = vpop.f32.mrb[34].mxu1 }
 0x163   :  { %3427 = vst [vmem:[#allocation12 + $0x1e8] sm:$0xff] %v3171_v38  ;;  %3429 = vst [vmem:[#allocation12 + $0x1f8] sm:$0xff] %v3173_v6  ;;  %v3174_v12 = vadd.f32 %v2918_v56, %v6185_v48  ;;  %v3175_v27 = vadd.f32 %v2919_v24, %v6187_v32  ;;  %v3177_v46 = vadd.f32 %v2921_v28, %v6188_v7  ;;  %v2124_v6 = vpop.f32.mrb[34].mxu0  ;;  %v2924_v4 = vmul.f32 2.0, %v2573_v3  ;;  %v2575_v26 = vpop.f32.mrb[35].mxu1  ;;  %v1324_v28 = vld [vmem:[#allocation11 + $0x468] sm:$0xff] }
 0x164   :  { %v811_v62 = vmul.f32 %v642_v31, %v4143_v45  ;;  %v813_v20 = vmul.f32 %v642_v31, %v4163_v59  ;;  %3432 = vst [vmem:[#allocation12 + $0x210] sm:$0xff] %v3176_v0  ;;  %v2922_v30 = vmul.f32 2.0, %v2124_v6  ;;  %v2126_v38 = vpop.f32.mrb[35].mxu0  ;;  %v812_v56 = vmul.f32 %v642_v31, %v4177_v1  ;;  %v1326_v48 = vld [vmem:[#allocation11 + $0x478] sm:$0xff]  ;;  %v6190_v0 = vld [vmem:[#allocation67_spill] sm:$0xff]  ;;  %v6191_v3 = vld [vmem:[#allocation68_spill] sm:$0xff] }
 0x165   :  { %3430 = vst [vmem:[#allocation12 + $0x200] sm:$0xff] %v3174_v12  ;;  %v814_v39 = vmul.f32 %v642_v31, %v4186_v11  ;;  %3431 = vst [vmem:[#allocation12 + $0x208] sm:$0xff] %v3175_v27  ;;  %v2923_v9 = vmul.f32 2.0, %v2126_v38  ;;  %v2925_v8 = vmul.f32 2.0, %v2575_v26  ;;  %v6189_v12 = vld [vmem:[#allocation66_spill] sm:$0xff]  ;;  %v3180_v32 = vadd.f32 %v2924_v4, %v6190_v0 }
 0x166   :  { %3433 = vst [vmem:[#allocation12 + $0x218] sm:$0xff] %v3177_v46  ;;  %v1067_v17 = vadd.f32 1.0, %v811_v62  ;;  %v1069_v24 = vadd.f32 1.0, %v813_v20  ;;  %v3178_v53 = vadd.f32 %v2922_v30, %v6189_v12  ;;  %v1068_v7 = vadd.f32 1.0, %v812_v56  ;;  %v2130_v57 = vpop.f32.mrb[36].mxu0  ;;  %v2579_v31 = vpop.f32.mrb[36].mxu1 }
 0x167   :  { %v1070_v6 = vadd.f32 1.0, %v814_v39  ;;  %v3179_v50 = vadd.f32 %v2923_v9, %v6191_v3  ;;  %v3181_v5 = vadd.f32 %v2925_v8, %v6192_v51  ;;  %3436 = vst [vmem:[#allocation12 + $0x230] sm:$0xff] %v3180_v32  ;;  %v2926_v62 = vmul.f32 2.0, %v2130_v57  ;;  %v2132_v38 = vpop.f32.mrb[37].mxu0  ;;  %v2581_v30 = vpop.f32.mrb[37].mxu1  ;;  %v6197_v57 = vld [vmem:[#allocation70_spill] sm:$0xff] }
 0x168   :  { %v5266_v27 = vmul.f32 %v1323_v16, %v1067_v17  ;;  %v5268_v46 = vmul.f32 %v1325_v25, %v1069_v24  ;;  %3434 = vst [vmem:[#allocation12 + $0x220] sm:$0xff] %v3178_v53  ;;  %v2928_v20 = vmul.f32 2.0, %v2579_v31  ;;  %v5270_v26 = vmul.f32 %v1324_v28, %v1068_v7  ;;  %v6198_v39 = vld [vmem:[#allocation71_spill] sm:$0xff]  ;;  %v6199_v24 = vld [vmem:[#allocation72_spill] sm:$0xff] }
 0x169   :  { %v5272_v4 = vmul.f32 %v1326_v48, %v1070_v6  ;;  %3435 = vst [vmem:[#allocation12 + $0x228] sm:$0xff] %v3179_v50  ;;  %3437 = vst [vmem:[#allocation12 + $0x238] sm:$0xff] %v3181_v5  ;;  %v2927_v56 = vmul.f32 2.0, %v2132_v38  ;;  %v2929_v51 = vmul.f32 2.0, %v2581_v30  ;;  %v579_v16 = vsel %vm513_vm10, %v4149_v47, 0.0  ;;  %v6200_v5 = vld [vmem:[#allocation73_spill] sm:$0xff] }
 0x16a   :  { %6193 = vst [vmem:[#allocation29_spill] sm:$0xff] %v5266_v27  ;;  %6194 = vst [vmem:[#allocation30_spill] sm:$0xff] %v5268_v46  ;;  %vm318_vm11 = vcmp.lt.s32.totalorder %v5254_v34, %v4128_v40  ;;  %v3182_v25 = vadd.f32 %v2926_v62, %v6197_v57  ;;  %v3184_v9 = vadd.f32 %v2928_v20, %v6198_v39  ;;  %v2136_v48 = vpop.f32.mrb[38].mxu0  ;;  %v2585_v12 = vpop.f32.mrb[38].mxu1  ;;  %v5288_v37 = vadd.s32 304, %v6150_v13  ;;  %v1327_v62 = vld [vmem:[#allocation11 + $0x480] sm:$0xff] }
 0x16b   :  { %6195 = vst [vmem:[#allocation31_spill] sm:$0xff] %v5270_v26  ;;  %6196 = vst [vmem:[#allocation32_spill] sm:$0xff] %v5272_v4  ;;  %v643_v8 = vadd.f32 %v579_v16, %v383_v58  ;;  %v384_v17 = vsel %vm318_vm11, %v4138_v43, 0.0  ;;  %v3183_v50 = vadd.f32 %v2927_v56, %v6199_v24  ;;  %v3185_v28 = vadd.f32 %v2929_v51, %v6200_v5  ;;  %v2138_v32 = vpop.f32.mrb[39].mxu0  ;;  %v2587_v58 = vpop.f32.mrb[39].mxu1  ;;  %v1329_v20 = vld [vmem:[#allocation11 + $0x490] sm:$0xff] }
 0x16c   :  { %vm514_vm12 = vcmp.lt.s32.totalorder %v5254_v34, %v4141_v44  ;;  %3438 = vst [vmem:[#allocation12 + $0x240] sm:$0xff] %v3182_v25  ;;  %3440 = vst [vmem:[#allocation12 + $0x250] sm:$0xff] %v3184_v9  ;;  %v2930_v53 = vmul.f32 2.0, %v2136_v48  ;;  %v2932_v0 = vmul.f32 2.0, %v2585_v12  ;;  %v2931_v3 = vmul.f32 2.0, %v2138_v32  ;;  %v6201_v56 = vld [vmem:[#allocation74_spill] sm:$0xff] }
 0x16d   :  { %v815_v7 = vmul.f32 %v643_v8, %v4143_v45  ;;  %v817_v6 = vmul.f32 %v643_v8, %v4163_v59  ;;  %3439 = vst [vmem:[#allocation12 + $0x248] sm:$0xff] %v3183_v50  ;;  %3441 = vst [vmem:[#allocation12 + $0x258] sm:$0xff] %v3185_v28  ;;  %v2933_v31 = vmul.f32 2.0, %v2587_v58  ;;  %v816_v38 = vmul.f32 %v643_v8, %v4177_v1  ;;  %v6202_v16 = vld [vmem:[#allocation75_spill] sm:$0xff]  ;;  %v1330_v24 = vld [vmem:[#allocation11 + $0x498] sm:$0xff] }
 0x16e   :  { %v818_v30 = vmul.f32 %v643_v8, %v4186_v11  ;;  %v3186_v51 = vadd.f32 %v2930_v53, %v6201_v56  ;;  %v3188_v57 = vadd.f32 %v2932_v0, %v6202_v16  ;;  %v1328_v9 = vld [vmem:[#allocation11 + $0x488] sm:$0xff]  ;;  %v6203_v5 = vld [vmem:[#allocation76_spill] sm:$0xff]  ;;  %v6204_v50 = vld [vmem:[#allocation77_spill] sm:$0xff]  ;;  %v2142_v12 = vpop.f32.mrb[40].mxu0  ;;  %v2591_v32 = vpop.f32.mrb[40].mxu1  ;;  %vm319_vm13 = vcmp.lt.s32.totalorder %v5288_v37, %v4128_v40 }
 0x16f   :  { %v1071_v25 = vadd.f32 1.0, %v815_v7  ;;  %v1073_v39 = vadd.f32 1.0, %v817_v6  ;;  %v3187_v48 = vadd.f32 %v2931_v3, %v6203_v5  ;;  %v3189_v28 = vadd.f32 %v2933_v31, %v6204_v50  ;;  %v2144_v46 = vpop.f32.mrb[41].mxu0  ;;  %v2593_v53 = vpop.f32.mrb[41].mxu1 }
 0x170   :  { %v1072_v58 = vadd.f32 1.0, %v816_v38  ;;  %v1074_v4 = vadd.f32 1.0, %v818_v30  ;;  %3442 = vst [vmem:[#allocation12 + $0x260] sm:$0xff] %v3186_v51  ;;  %3444 = vst [vmem:[#allocation12 + $0x270] sm:$0xff] %v3188_v57  ;;  %v2934_v26 = vmul.f32 2.0, %v2142_v12  ;;  %v2936_v8 = vmul.f32 2.0, %v2591_v32 }
 0x171   :  { %v5298_v56 = vmul.f32 %v1327_v62, %v1071_v25  ;;  %v5300_v0 = vmul.f32 %v1329_v20, %v1073_v39  ;;  %3443 = vst [vmem:[#allocation12 + $0x268] sm:$0xff] %v3187_v48  ;;  %3445 = vst [vmem:[#allocation12 + $0x278] sm:$0xff] %v3189_v28  ;;  %v2935_v7 = vmul.f32 2.0, %v2144_v46  ;;  %v2937_v6 = vmul.f32 2.0, %v2593_v53  ;;  %v6209_v38 = vld [vmem:[#allocation78_spill] sm:$0xff]  ;;  %v6210_v51 = vld [vmem:[#allocation79_spill] sm:$0xff] }
 0x172   :  { %v5302_v3 = vmul.f32 %v1328_v9, %v1072_v58  ;;  %v5304_v31 = vmul.f32 %v1330_v24, %v1074_v4  ;;  %v3190_v30 = vadd.f32 %v2934_v26, %v6209_v38  ;;  %v3192_v16 = vadd.f32 %v2936_v8, %v6210_v51  ;;  %v6211_v20 = vld [vmem:[#allocation80_spill] sm:$0xff]  ;;  %v6212_v46 = vld [vmem:[#allocation81_spill] sm:$0xff]  ;;  %v2148_v39 = vpop.f32.mrb[42].mxu0  ;;  %v2597_v9 = vpop.f32.mrb[42].mxu1  ;;  %v6213_v58 = vld [vmem:[#allocation82_spill] sm:$0xff] }
 0x173   :  { %6205 = vst [vmem:[#allocation33_spill] sm:$0xff] %v5298_v56  ;;  %6206 = vst [vmem:[#allocation34_spill] sm:$0xff] %v5300_v0  ;;  %v580_v62 = vsel %vm514_vm12, %v4149_v47, 0.0  ;;  %v3191_v57 = vadd.f32 %v2935_v7, %v6211_v20  ;;  %v3193_v25 = vadd.f32 %v2937_v6, %v6212_v46  ;;  %v385_v24 = vsel %vm319_vm13, %v4138_v43, 0.0  ;;  %v2150_v48 = vpop.f32.mrb[43].mxu0  ;;  %v2599_v50 = vpop.f32.mrb[43].mxu1 }
 0x174   :  { %6207 = vst [vmem:[#allocation35_spill] sm:$0xff] %v5302_v3  ;;  %6208 = vst [vmem:[#allocation36_spill] sm:$0xff] %v5304_v31  ;;  %v644_v4 = vadd.f32 %v580_v62, %v384_v17  ;;  %v2938_v26 = vmul.f32 2.0, %v2148_v39  ;;  %v2940_v5 = vmul.f32 2.0, %v2597_v9  ;;  %vm515_vm14 = vcmp.lt.s32.totalorder %v5288_v37, %v4141_v44  ;;  %v6214_v53 = vld [vmem:[#allocation83_spill] sm:$0xff]  ;;  %v1331_v6 = vld [vmem:[#allocation11 + $0x4a0] sm:$0xff] }
 0x175   :  { %3446 = vst [vmem:[#allocation12 + $0x280] sm:$0xff] %v3190_v30  ;;  %3448 = vst [vmem:[#allocation12 + $0x290] sm:$0xff] %v3192_v16  ;;  %v5320_v34 = vadd.s32 312, %v6150_v13  ;;  %v2939_v28 = vmul.f32 2.0, %v2150_v48  ;;  %v2941_v12 = vmul.f32 2.0, %v2599_v50  ;;  %v1333_v38 = vld [vmem:[#allocation11 + $0x4b0] sm:$0xff] }
 0x176   :  { %3447 = vst [vmem:[#allocation12 + $0x288] sm:$0xff] %v3191_v57  ;;  %3449 = vst [vmem:[#allocation12 + $0x298] sm:$0xff] %v3193_v25  ;;  %v819_v17 = vmul.f32 %v644_v4, %v4143_v45  ;;  %v821_v32 = vmul.f32 %v644_v4, %v4163_v59  ;;  %v3194_v8 = vadd.f32 %v2938_v26, %v6213_v58  ;;  %v6215_v16 = vld [vmem:[#allocation84_spill] sm:$0xff]  ;;  %v6216_v20 = vld [vmem:[#allocation85_spill] sm:$0xff]  ;;  %v2154_v46 = vpop.f32.mrb[44].mxu0  ;;  %v2603_v25 = vpop.f32.mrb[44].mxu1 }
 0x177   :  { %v3196_v7 = vadd.f32 %v2940_v5, %v6214_v53  ;;  %v820_v30 = vmul.f32 %v644_v4, %v4177_v1  ;;  %v822_v51 = vmul.f32 %v644_v4, %v4186_v11  ;;  %v3195_v62 = vadd.f32 %v2939_v28, %v6215_v16  ;;  %v1332_v48 = vld [vmem:[#allocation11 + $0x4a8] sm:$0xff]  ;;  %v1334_v50 = vld [vmem:[#allocation11 + $0x4b8] sm:$0xff]  ;;  %v2156_v58 = vpop.f32.mrb[45].mxu0  ;;  %v2605_v53 = vpop.f32.mrb[45].mxu1 }
 0x178   :  { %v3197_v57 = vadd.f32 %v2941_v12, %v6216_v20  ;;  %v1075_v39 = vadd.f32 1.0, %v819_v17  ;;  %v1077_v9 = vadd.f32 1.0, %v821_v32  ;;  %3450 = vst [vmem:[#allocation12 + $0x2a0] sm:$0xff] %v3194_v8  ;;  %v2942_v26 = vmul.f32 2.0, %v2154_v46  ;;  %v6219_v17 = vld [vmem:[#allocation86_spill] sm:$0xff]  ;;  %v6220_v20 = vld [vmem:[#allocation87_spill] sm:$0xff] }
 0x179   :  { %3452 = vst [vmem:[#allocation12 + $0x2b0] sm:$0xff] %v3196_v7  ;;  %v2944_v5 = vmul.f32 2.0, %v2603_v25  ;;  %v1076_v31 = vadd.f32 1.0, %v820_v30  ;;  %v1078_v3 = vadd.f32 1.0, %v822_v51  ;;  %3451 = vst [vmem:[#allocation12 + $0x2a8] sm:$0xff] %v3195_v62  ;;  %v2943_v4 = vmul.f32 2.0, %v2156_v58 }
 0x17a   :  { %3453 = vst [vmem:[#allocation12 + $0x2b8] sm:$0xff] %v3197_v57  ;;  %v2945_v28 = vmul.f32 2.0, %v2605_v53  ;;  %v5330_v16 = vmul.f32 %v1331_v6, %v1075_v39  ;;  %v5332_v12 = vmul.f32 %v1333_v38, %v1077_v9  ;;  %v3198_v32 = vadd.f32 %v2942_v26, %v6219_v17  ;;  %v6223_v46 = vld [vmem:[#allocation88_spill] sm:$0xff]  ;;  %v6224_v30 = vld [vmem:[#allocation89_spill] sm:$0xff]  ;;  %v2160_v62 = vpop.f32.mrb[46].mxu0  ;;  %v2609_v57 = vpop.f32.mrb[46].mxu1 }
 0x17b   :  { %v3200_v0 = vadd.f32 %v2944_v5, %v6220_v20  ;;  %v5336_v8 = vmul.f32 %v1332_v48, %v1076_v31  ;;  %v5338_v7 = vmul.f32 %v1334_v50, %v1078_v3  ;;  %v3199_v25 = vadd.f32 %v2943_v4, %v6223_v46  ;;  %v2162_v3 = vpop.f32.mrb[47].mxu0  ;;  %v2611_v39 = vpop.f32.mrb[47].mxu1  ;;  %v6225_v5 = vld [vmem:[#allocation90_spill] sm:$0xff]  ;;  %v6227_v17 = vld [vmem:[#allocation92_spill] sm:$0xff]  ;;  %v6228_v20 = vld [vmem:[#allocation93_spill] sm:$0xff] }
 0x17c   :  { %6217 = vst [vmem:[#allocation37_spill] sm:$0xff] %v5330_v16  ;;  %6218 = vst [vmem:[#allocation18_spill] sm:$0xff] %v5332_v12  ;;  %v3201_v51 = vadd.f32 %v2945_v28, %v6224_v30  ;;  %v581_v6 = vsel %vm515_vm14, %v4149_v47, 0.0  ;;  %vm320_vm15 = vcmp.lt.s32.totalorder %v5320_v34, %v4128_v40  ;;  %v2946_v31 = vmul.f32 2.0, %v2160_v62  ;;  %v1335_v28 = vld [vmem:[#allocation11 + $0x4c0] sm:$0xff]  ;;  %v6230_v16 = vld [vmem:[#allocation95_spill] sm:$0xff] }
 0x17d   :  { %6221 = vst [vmem:[#allocation38_spill] sm:$0xff] %v5336_v8  ;;  %6222 = vst [vmem:[#allocation39_spill] sm:$0xff] %v5338_v7  ;;  %v2948_v38 = vmul.f32 2.0, %v2609_v57  ;;  %v645_v9 = vadd.f32 %v581_v6, %v385_v24  ;;  %v386_v48 = vsel %vm320_vm15, %v4138_v43, 0.0  ;;  %v2947_v50 = vmul.f32 2.0, %v2162_v3  ;;  %v1336_v57 = vld [vmem:[#allocation11 + $0x4c8] sm:$0xff] }
 0x17e   :  { %3454 = vst [vmem:[#allocation12 + $0x2c0] sm:$0xff] %v3198_v32  ;;  %3456 = vst [vmem:[#allocation12 + $0x2d0] sm:$0xff] %v3200_v0  ;;  %v2949_v26 = vmul.f32 2.0, %v2611_v39  ;;  %vm516_vm1 = vcmp.lt.s32.totalorder %v5320_v34, %v4141_v44  ;;  %v5352_v37 = vadd.s32 320, %v6150_v13  ;;  %v3202_v58 = vadd.f32 %v2946_v31, %v6225_v5  ;;  %v6226_v0 = vld [vmem:[#allocation91_spill] sm:$0xff]  ;;  %v2615_v30 = vpop.f32.mrb[48].mxu1 }
 0x17f   :  { %3455 = vst [vmem:[#allocation12 + $0x2c8] sm:$0xff] %v3199_v25  ;;  %3457 = vst [vmem:[#allocation12 + $0x2d8] sm:$0xff] %v3201_v51  ;;  %v3204_v53 = vadd.f32 %v2948_v38, %v6226_v0  ;;  %v823_v4 = vmul.f32 %v645_v9, %v4143_v45  ;;  %v825_v24 = vmul.f32 %v645_v9, %v4163_v59  ;;  %v2166_v25 = vpop.f32.mrb[48].mxu0  ;;  %v1337_v51 = vld [vmem:[#allocation11 + $0x4d0] sm:$0xff]  ;;  %v1338_v31 = vld [vmem:[#allocation11 + $0x4d8] sm:$0xff]  ;;  %v2952_v3 = vmul.f32 2.0, %v2615_v30 }
 0x180   :  { %v3203_v32 = vadd.f32 %v2947_v50, %v6227_v17  ;;  %v3205_v46 = vadd.f32 %v2949_v26, %v6228_v20  ;;  %v824_v62 = vmul.f32 %v645_v9, %v4177_v1  ;;  %v826_v6 = vmul.f32 %v645_v9, %v4186_v11  ;;  %3458 = vst [vmem:[#allocation12 + $0x2e0] sm:$0xff] %v3202_v58  ;;  %v2168_v39 = vpop.f32.mrb[49].mxu0  ;;  %v2617_v5 = vpop.f32.mrb[49].mxu1  ;;  %v6229_v8 = vld [vmem:[#allocation94_spill] sm:$0xff]  ;;  %v6234_v30 = vld [vmem:[#allocation97_spill] sm:$0xff] }
 0x181   :  { %3460 = vst [vmem:[#allocation12 + $0x2f0] sm:$0xff] %v3204_v53  ;;  %v2950_v38 = vmul.f32 2.0, %v2166_v25  ;;  %v1079_v0 = vadd.f32 1.0, %v823_v4  ;;  %v1081_v7 = vadd.f32 1.0, %v825_v24  ;;  %v2951_v50 = vmul.f32 2.0, %v2168_v39  ;;  %v6233_v53 = vld [vmem:[#allocation96_spill] sm:$0xff] }
 0x182   :  { %3459 = vst [vmem:[#allocation12 + $0x2e8] sm:$0xff] %v3203_v32  ;;  %3461 = vst [vmem:[#allocation12 + $0x2f8] sm:$0xff] %v3205_v46  ;;  %v2953_v26 = vmul.f32 2.0, %v2617_v5  ;;  %v1080_v17 = vadd.f32 1.0, %v824_v62  ;;  %v1082_v20 = vadd.f32 1.0, %v826_v6  ;;  %v3208_v56 = vadd.f32 %v2952_v3, %v6230_v16  ;;  %v2172_v4 = vpop.f32.mrb[50].mxu0 }
 0x183   :  { %v3206_v12 = vadd.f32 %v2950_v38, %v6229_v8  ;;  %v5364_v9 = vmul.f32 %v1335_v28, %v1079_v0  ;;  %v5366_v58 = vmul.f32 %v1337_v51, %v1081_v7  ;;  %v3207_v25 = vadd.f32 %v2951_v50, %v6233_v53  ;;  %v2621_v24 = vpop.f32.mrb[50].mxu1  ;;  %v2174_v6 = vpop.f32.mrb[51].mxu0  ;;  %v6238_v38 = vld [vmem:[#allocation99_spill] sm:$0xff]  ;;  %v6239_v39 = vld [vmem:[#allocation100_spill] sm:$0xff]  ;;  %v6240_v0 = vld [vmem:[#allocation101_spill] sm:$0xff] }
 0x184   :  { %v3209_v27 = vadd.f32 %v2953_v26, %v6234_v30  ;;  %v5370_v32 = vmul.f32 %v1336_v57, %v1080_v17  ;;  %v5372_v46 = vmul.f32 %v1338_v31, %v1082_v20  ;;  %3464 = vst [vmem:[#allocation12 + $0x310] sm:$0xff] %v3208_v56  ;;  %v2954_v62 = vmul.f32 2.0, %v2172_v4  ;;  %v2623_v16 = vpop.f32.mrb[51].mxu1  ;;  %v6237_v56 = vld [vmem:[#allocation98_spill] sm:$0xff] }
 0x185   :  { %6231 = vst [vmem:[#allocation40_spill] sm:$0xff] %v5364_v9  ;;  %6232 = vst [vmem:[#allocation41_spill] sm:$0xff] %v5366_v58  ;;  %v2956_v8 = vmul.f32 2.0, %v2621_v24  ;;  %v582_v7 = vsel %vm516_vm1, %v4149_v47, 0.0  ;;  %vm321_vm2 = vcmp.lt.s32.totalorder %v5352_v37, %v4128_v40  ;;  %v2955_v28 = vmul.f32 2.0, %v2174_v6  ;;  %v1339_v4 = vld [vmem:[#allocation11 + $0x4e0] sm:$0xff] }
 0x186   :  { %6235 = vst [vmem:[#allocation42_spill] sm:$0xff] %v5370_v32  ;;  %6236 = vst [vmem:[#allocation43_spill] sm:$0xff] %v5372_v46  ;;  %v2957_v51 = vmul.f32 2.0, %v2623_v16  ;;  %v646_v57 = vadd.f32 %v582_v7, %v386_v48  ;;  %v3210_v31 = vadd.f32 %v2954_v62, %v6237_v56  ;;  %vm517_vm3 = vcmp.lt.s32.totalorder %v5352_v37, %v4141_v44  ;;  %v2627_v26 = vpop.f32.mrb[52].mxu1  ;;  %v1341_v24 = vld [vmem:[#allocation11 + $0x4f0] sm:$0xff]  ;;  %v1342_v56 = vld [vmem:[#allocation11 + $0x4f8] sm:$0xff] }
 0x187   :  { %3462 = vst [vmem:[#allocation12 + $0x300] sm:$0xff] %v3206_v12  ;;  %3463 = vst [vmem:[#allocation12 + $0x308] sm:$0xff] %v3207_v25  ;;  %v387_v12 = vsel %vm321_vm2, %v4138_v43, 0.0  ;;  %v3212_v3 = vadd.f32 %v2956_v8, %v6238_v38  ;;  %v5386_v34 = vadd.s32 328, %v6150_v13  ;;  %v3211_v5 = vadd.f32 %v2955_v28, %v6239_v39  ;;  %v2629_v30 = vpop.f32.mrb[53].mxu1  ;;  %v6244_v32 = vld [vmem:[#allocation105_spill] sm:$0xff] }
 0x188   :  { %3465 = vst [vmem:[#allocation12 + $0x318] sm:$0xff] %v3209_v27  ;;  %v3213_v50 = vadd.f32 %v2957_v51, %v6240_v0  ;;  %v2178_v27 = vpop.f32.mrb[52].mxu0  ;;  %v827_v48 = vmul.f32 %v646_v57, %v4143_v45  ;;  %v829_v17 = vmul.f32 %v646_v57, %v4163_v59  ;;  %3466 = vst [vmem:[#allocation12 + $0x320] sm:$0xff] %v3210_v31  ;;  %v2960_v53 = vmul.f32 2.0, %v2627_v26  ;;  %v1340_v51 = vld [vmem:[#allocation11 + $0x4e8] sm:$0xff]  ;;  %v6241_v31 = vld [vmem:[#allocation102_spill] sm:$0xff] }
 0x189   :  { %3468 = vst [vmem:[#allocation12 + $0x330] sm:$0xff] %v3212_v3  ;;  %v2958_v20 = vmul.f32 2.0, %v2178_v27  ;;  %v2180_v25 = vpop.f32.mrb[53].mxu0  ;;  %v828_v62 = vmul.f32 %v646_v57, %v4177_v1  ;;  %v830_v8 = vmul.f32 %v646_v57, %v4186_v11  ;;  %3467 = vst [vmem:[#allocation12 + $0x328] sm:$0xff] %v3211_v5  ;;  %v2961_v16 = vmul.f32 2.0, %v2629_v30  ;;  %v6242_v3 = vld [vmem:[#allocation103_spill] sm:$0xff] }
 0x18a   :  { %3469 = vst [vmem:[#allocation12 + $0x338] sm:$0xff] %v3213_v50  ;;  %v2959_v6 = vmul.f32 2.0, %v2180_v25  ;;  %v1083_v7 = vadd.f32 1.0, %v827_v48  ;;  %v1085_v28 = vadd.f32 1.0, %v829_v17  ;;  %v3216_v39 = vadd.f32 %v2960_v53, %v6242_v3  ;;  %v6243_v26 = vld [vmem:[#allocation104_spill] sm:$0xff]  ;;  %v2184_v9 = vpop.f32.mrb[54].mxu0 }
 0x18b   :  { %v3214_v38 = vadd.f32 %v2958_v20, %v6241_v31  ;;  %v1084_v0 = vadd.f32 1.0, %v828_v62  ;;  %v1086_v27 = vadd.f32 1.0, %v830_v8  ;;  %v3217_v58 = vadd.f32 %v2961_v16, %v6244_v32  ;;  %v2633_v57 = vpop.f32.mrb[54].mxu1  ;;  %v2186_v25 = vpop.f32.mrb[55].mxu0  ;;  %v1343_v31 = vld [vmem:[#allocation11 + $0x500] sm:$0xff] }
 0x18c   :  { %v3215_v46 = vadd.f32 %v2959_v6, %v6243_v26  ;;  %v5398_v5 = vmul.f32 %v1339_v4, %v1083_v7  ;;  %v5400_v50 = vmul.f32 %v1341_v24, %v1085_v28  ;;  %3472 = vst [vmem:[#allocation12 + $0x350] sm:$0xff] %v3216_v39  ;;  %v2962_v48 = vmul.f32 2.0, %v2184_v9  ;;  %v2635_v20 = vpop.f32.mrb[55].mxu1 }
 0x18d   :  { %3470 = vst [vmem:[#allocation12 + $0x340] sm:$0xff] %v3214_v38  ;;  %v2964_v17 = vmul.f32 2.0, %v2633_v57  ;;  %v5402_v30 = vmul.f32 %v1340_v51, %v1084_v0  ;;  %v5404_v53 = vmul.f32 %v1342_v56, %v1086_v27  ;;  %3473 = vst [vmem:[#allocation12 + $0x358] sm:$0xff] %v3217_v58  ;;  %v2963_v62 = vmul.f32 2.0, %v2186_v25  ;;  %v1345_v38 = vld [vmem:[#allocation11 + $0x510] sm:$0xff] }
 0x18e   :  { %3471 = vst [vmem:[#allocation12 + $0x348] sm:$0xff] %v3215_v46  ;;  %v2965_v32 = vmul.f32 2.0, %v2635_v20  ;;  %v583_v4 = vsel %vm517_vm3, %v4149_v47, 0.0  ;;  %vm322_vm4 = vcmp.lt.s32.totalorder %v5386_v34, %v4128_v40  ;;  %v3218_v9 = vadd.f32 %v2962_v48, %v4951_v2  ;;  %v2190_v16 = vpop.f32.mrb[56].mxu0  ;;  %v2639_v7 = vpop.f32.mrb[56].mxu1  ;;  %v1344_v48 = vld [vmem:[#allocation11 + $0x508] sm:$0xff] }
 0x18f   :  { %v3220_v24 = vadd.f32 %v2964_v17, %v4953_v22  ;;  %v647_v8 = vadd.f32 %v583_v4, %v387_v12  ;;  %v388_v6 = vsel %vm322_vm4, %v4138_v43, 0.0  ;;  %v3219_v46 = vadd.f32 %v2963_v62, %v4957_v41  ;;  %v2192_v22 = vpop.f32.mrb[57].mxu0  ;;  %v2641_v12 = vpop.f32.mrb[57].mxu1  ;;  %v1346_v17 = vld [vmem:[#allocation11 + $0x518] sm:$0xff] }
 0x190   :  { %v3221_v58 = vadd.f32 %v2965_v32, %v4959_v42  ;;  %vm518_vm5 = vcmp.lt.s32.totalorder %v5386_v34, %v4141_v44  ;;  %v5420_v37 = vadd.s32 336, %v6150_v13  ;;  %3474 = vst [vmem:[#allocation12 + $0x360] sm:$0xff] %v3218_v9  ;;  %v2966_v2 = vmul.f32 2.0, %v2190_v16 }
 0x191   :  { %3476 = vst [vmem:[#allocation12 + $0x370] sm:$0xff] %v3220_v24  ;;  %v2968_v28 = vmul.f32 2.0, %v2639_v7  ;;  %v831_v51 = vmul.f32 %v647_v8, %v4143_v45  ;;  %v833_v41 = vmul.f32 %v647_v8, %v4163_v59  ;;  %3475 = vst [vmem:[#allocation12 + $0x368] sm:$0xff] %v3219_v46  ;;  %v2967_v42 = vmul.f32 2.0, %v2192_v22 }
 0x192   :  { %3477 = vst [vmem:[#allocation12 + $0x378] sm:$0xff] %v3221_v58  ;;  %v2969_v56 = vmul.f32 2.0, %v2641_v12  ;;  %v832_v3 = vmul.f32 %v647_v8, %v4177_v1  ;;  %v834_v39 = vmul.f32 %v647_v8, %v4186_v11  ;;  %v3222_v0 = vadd.f32 %v2966_v2, %v4974_v35  ;;  %v2196_v62 = vpop.f32.mrb[58].mxu0  ;;  %v2645_v32 = vpop.f32.mrb[58].mxu1 }
 0x193   :  { %v3224_v27 = vadd.f32 %v2968_v28, %v4976_v33  ;;  %v1087_v26 = vadd.f32 1.0, %v831_v51  ;;  %v1089_v57 = vadd.f32 1.0, %v833_v41  ;;  %v3223_v25 = vadd.f32 %v2967_v42, %v4991_v10  ;;  %v2198_v46 = vpop.f32.mrb[59].mxu0  ;;  %v2647_v35 = vpop.f32.mrb[59].mxu1 }
 0x194   :  { %v3225_v20 = vadd.f32 %v2969_v56, %v4993_v36  ;;  %v1088_v4 = vadd.f32 1.0, %v832_v3  ;;  %v1090_v9 = vadd.f32 1.0, %v834_v39  ;;  %3478 = vst [vmem:[#allocation12 + $0x380] sm:$0xff] %v3222_v0  ;;  %v2970_v24 = vmul.f32 2.0, %v2196_v62 }
 0x195   :  { %3480 = vst [vmem:[#allocation12 + $0x390] sm:$0xff] %v3224_v27  ;;  %v2972_v8 = vmul.f32 2.0, %v2645_v32  ;;  %v5430_v58 = vmul.f32 %v1343_v31, %v1087_v26  ;;  %v5432_v33 = vmul.f32 %v1345_v38, %v1089_v57  ;;  %3479 = vst [vmem:[#allocation12 + $0x388] sm:$0xff] %v3223_v25  ;;  %v2971_v16 = vmul.f32 2.0, %v2198_v46  ;;  %v1347_v26 = vld [vmem:[#allocation11 + $0x520] sm:$0xff]  ;;  %v1349_v57 = vld [vmem:[#allocation11 + $0x530] sm:$0xff] }
 0x196   :  { %3481 = vst [vmem:[#allocation12 + $0x398] sm:$0xff] %v3225_v20  ;;  %v2973_v10 = vmul.f32 2.0, %v2647_v35  ;;  %v5434_v7 = vmul.f32 %v1344_v48, %v1088_v4  ;;  %v5436_v36 = vmul.f32 %v1346_v17, %v1090_v9  ;;  %v3226_v2 = vadd.f32 %v2970_v24, %v5028_v29  ;;  %v2202_v41 = vpop.f32.mrb[60].mxu0  ;;  %v2651_v42 = vpop.f32.mrb[60].mxu1  ;;  %v1348_v24 = vld [vmem:[#allocation11 + $0x528] sm:$0xff] }
 0x197   :  { %v3228_v28 = vadd.f32 %v2972_v8, %v5030_v60  ;;  %v584_v22 = vsel %vm518_vm5, %v4149_v47, 0.0  ;;  %vm323_vm0 = vcmp.lt.s32.totalorder %v5420_v37, %v4128_v40  ;;  %v3227_v12 = vadd.f32 %v2971_v16, %v5034_v21  ;;  %v2204_v38 = vpop.f32.mrb[61].mxu0  ;;  %v2653_v3 = vpop.f32.mrb[61].mxu1  ;;  %v1350_v8 = vld [vmem:[#allocation11 + $0x538] sm:$0xff] }
 0x198   :  { %v3229_v51 = vadd.f32 %v2973_v10, %v5036_v18  ;;  %v648_v56 = vadd.f32 %v584_v22, %v388_v6  ;;  %v389_v31 = vsel %vm323_vm0, %v4138_v43, 0.0  ;;  %3482 = vst [vmem:[#allocation12 + $0x3a0] sm:$0xff] %v3226_v2  ;;  %v2974_v29 = vmul.f32 2.0, %v2202_v41 }
 0x199   :  { %3484 = vst [vmem:[#allocation12 + $0x3b0] sm:$0xff] %v3228_v28  ;;  %v2976_v60 = vmul.f32 2.0, %v2651_v42  ;;  %vm519_vm6 = vcmp.lt.s32.totalorder %v5420_v37, %v4141_v44  ;;  %v5452_v34 = vadd.s32 344, %v6150_v13  ;;  %3483 = vst [vmem:[#allocation12 + $0x3a8] sm:$0xff] %v3227_v12  ;;  %v2975_v21 = vmul.f32 2.0, %v2204_v38 }
 0x19a   :  { %3485 = vst [vmem:[#allocation12 + $0x3b8] sm:$0xff] %v3229_v51  ;;  %v2977_v18 = vmul.f32 2.0, %v2653_v3  ;;  %v835_v6 = vmul.f32 %v648_v56, %v4143_v45  ;;  %v837_v39 = vmul.f32 %v648_v56, %v4163_v59  ;;  %v3230_v0 = vadd.f32 %v2974_v29, %v5077_v61  ;;  %v2208_v62 = vpop.f32.mrb[62].mxu0  ;;  %v2657_v32 = vpop.f32.mrb[62].mxu1 }
 0x19b   :  { %v3232_v27 = vadd.f32 %v2976_v60, %v5079_v54  ;;  %v836_v48 = vmul.f32 %v648_v56, %v4177_v1  ;;  %v838_v17 = vmul.f32 %v648_v56, %v4186_v11  ;;  %v3231_v25 = vadd.f32 %v2975_v21, %v5083_v49  ;;  %v2210_v46 = vpop.f32.mrb[63].mxu0  ;;  %v2659_v35 = vpop.f32.mrb[63].mxu1 }
 0x19c   :  { %v3233_v20 = vadd.f32 %v2977_v18, %v5085_v14  ;;  %v1091_v4 = vadd.f32 1.0, %v835_v6  ;;  %v1093_v9 = vadd.f32 1.0, %v837_v39  ;;  %3486 = vst [vmem:[#allocation12 + $0x3c0] sm:$0xff] %v3230_v0  ;;  %v2978_v61 = vmul.f32 2.0, %v2208_v62 }
 0x19d   :  { %3488 = vst [vmem:[#allocation12 + $0x3d0] sm:$0xff] %v3232_v27  ;;  %v2980_v54 = vmul.f32 2.0, %v2657_v32  ;;  %v1092_v16 = vadd.f32 1.0, %v836_v48  ;;  %v1094_v10 = vadd.f32 1.0, %v838_v17  ;;  %3487 = vst [vmem:[#allocation12 + $0x3c8] sm:$0xff] %v3231_v25  ;;  %v2979_v2 = vmul.f32 2.0, %v2210_v46 }
 0x19e   :  { %3489 = vst [vmem:[#allocation12 + $0x3d8] sm:$0xff] %v3233_v20  ;;  %v2981_v49 = vmul.f32 2.0, %v2659_v35  ;;  %v5462_v28 = vmul.f32 %v1347_v26, %v1091_v4  ;;  %v5464_v14 = vmul.f32 %v1349_v57, %v1093_v9  ;;  %v3234_v22 = vadd.f32 %v2978_v61, %v5129_v19  ;;  %v2214_v29 = vpop.f32.mrb[64].mxu0  ;;  %v2663_v60 = vpop.f32.mrb[64].mxu1  ;;  %v1351_v26 = vld [vmem:[#allocation11 + $0x540] sm:$0xff]  ;;  %v6245_v57 = vld [vmem:[#allocation19_spill] sm:$0xff] }
 0x19f   :  { %v3236_v12 = vadd.f32 %v2980_v54, %v5131_v55  ;;  %v5468_v51 = vmul.f32 %v1348_v24, %v1092_v16  ;;  %v5470_v41 = vmul.f32 %v1350_v8, %v1094_v10  ;;  %v3235_v42 = vadd.f32 %v2979_v2, %v5138_v15  ;;  %v2216_v3 = vpop.f32.mrb[65].mxu0  ;;  %v2665_v21 = vpop.f32.mrb[65].mxu1  ;;  %v6246_v17 = vld [vmem:[#allocation20_spill] sm:$0xff]  ;;  %v1352_v9 = vld [vmem:[#allocation11 + $0x548] sm:$0xff] }
 0x1a0   :  { %v3237_v56 = vadd.f32 %v2981_v49, %v5140_v63  ;;  %v585_v38 = vsel %vm519_vm6, %v4149_v47, 0.0  ;;  %vm324_vm7 = vcmp.lt.s32.totalorder %v5452_v34, %v4128_v40  ;;  %3490 = vst [vmem:[#allocation12 + $0x3e0] sm:$0xff] %v3234_v22  ;;  %v2982_v19 = vmul.f32 2.0, %v2214_v29  ;;  %v1353_v32 = vld [vmem:[#allocation11 + $0x550] sm:$0xff]  ;;  %v6247_v22 = vld [vmem:[#allocation21_spill] sm:$0xff] }
 0x1a1   :  { %3492 = vst [vmem:[#allocation12 + $0x3f0] sm:$0xff] %v3236_v12  ;;  %v2984_v55 = vmul.f32 2.0, %v2663_v60  ;;  %v649_v18 = vadd.f32 %v585_v38, %v389_v31  ;;  %v390_v15 = vsel %vm324_vm7, %v4138_v43, 0.0  ;;  %3491 = vst [vmem:[#allocation12 + $0x3e8] sm:$0xff] %v3235_v42  ;;  %v2983_v63 = vmul.f32 2.0, %v2216_v3  ;;  %v6248_v42 = vld [vmem:[#allocation22_spill] sm:$0xff] }
 0x1a2   :  { %3493 = vst [vmem:[#allocation12 + $0x3f8] sm:$0xff] %v3237_v56  ;;  %v2985_v6 = vmul.f32 2.0, %v2665_v21  ;;  %vm520_vm8 = vcmp.lt.s32.totalorder %v5452_v34, %v4141_v44  ;;  %v5484_v37 = vadd.s32 352, %v6150_v13  ;;  %v3238_v39 = vadd.f32 %v2982_v19, %v5166_v52  ;;  %v2220_v20 = vpop.f32.mrb[66].mxu0  ;;  %v2669_v62 = vpop.f32.mrb[66].mxu1  ;;  %v1354_v52 = vld [vmem:[#allocation11 + $0x558] sm:$0xff] }
 0x1a3   :  { %v3240_v0 = vadd.f32 %v2984_v55, %v5168_v23  ;;  %v839_v27 = vmul.f32 %v649_v18, %v4143_v45  ;;  %v841_v31 = vmul.f32 %v649_v18, %v4163_v59  ;;  %v3239_v48 = vadd.f32 %v2983_v63, %v6245_v57  ;;  %v2222_v61 = vpop.f32.mrb[67].mxu0  ;;  %v2671_v54 = vpop.f32.mrb[67].mxu1  ;;  %v6249_v38 = vld [vmem:[#allocation23_spill] sm:$0xff]  ;;  %v6250_v55 = vld [vmem:[#allocation24_spill] sm:$0xff] }
 0x1a4   :  { %v3241_v25 = vadd.f32 %v2985_v6, %v6246_v17  ;;  %v840_v4 = vmul.f32 %v649_v18, %v4177_v1  ;;  %v842_v24 = vmul.f32 %v649_v18, %v4186_v11  ;;  %3494 = vst [vmem:[#allocation12 + $0x400] sm:$0xff] %v3238_v39  ;;  %v2986_v23 = vmul.f32 2.0, %v2220_v20  ;;  %v6251_v20 = vld [vmem:[#allocation25_spill] sm:$0xff] }
 0x1a5   :  { %3496 = vst [vmem:[#allocation12 + $0x410] sm:$0xff] %v3240_v0  ;;  %v2988_v8 = vmul.f32 2.0, %v2669_v62  ;;  %v1095_v46 = vadd.f32 1.0, %v839_v27  ;;  %v1097_v35 = vadd.f32 1.0, %v841_v31  ;;  %3495 = vst [vmem:[#allocation12 + $0x408] sm:$0xff] %v3239_v48  ;;  %v2987_v16 = vmul.f32 2.0, %v2222_v61 }
 0x1a6   :  { %3497 = vst [vmem:[#allocation12 + $0x418] sm:$0xff] %v3241_v25  ;;  %v2989_v10 = vmul.f32 2.0, %v2671_v54  ;;  %v1096_v2 = vadd.f32 1.0, %v840_v4  ;;  %v1098_v49 = vadd.f32 1.0, %v842_v24  ;;  %v3242_v12 = vadd.f32 %v2986_v23, %v6247_v22  ;;  %v2226_v21 = vpop.f32.mrb[68].mxu0  ;;  %v2675_v18 = vpop.f32.mrb[68].mxu1 }
 0x1a7   :  { %v3244_v56 = vadd.f32 %v2988_v8, %v6248_v42  ;;  %v5496_v29 = vmul.f32 %v1351_v26, %v1095_v46  ;;  %v5498_v60 = vmul.f32 %v1353_v32, %v1097_v35  ;;  %v3243_v19 = vadd.f32 %v2987_v16, %v6249_v38  ;;  %v2228_v27 = vpop.f32.mrb[69].mxu0  ;;  %v2677_v31 = vpop.f32.mrb[69].mxu1  ;;  %v6252_v32 = vld [vmem:[#allocation26_spill] sm:$0xff] }
 0x1a8   :  { %v3245_v3 = vadd.f32 %v2989_v10, %v6250_v55  ;;  %v5502_v63 = vmul.f32 %v1352_v9, %v1096_v2  ;;  %v5504_v6 = vmul.f32 %v1354_v52, %v1098_v49  ;;  %3498 = vst [vmem:[#allocation12 + $0x420] sm:$0xff] %v3242_v12  ;;  %v2990_v39 = vmul.f32 2.0, %v2226_v21  ;;  %v6253_v9 = vld [vmem:[#allocation27_spill] sm:$0xff]  ;;  %v6254_v52 = vld [vmem:[#allocation28_spill] sm:$0xff]  ;;  %v1355_v2 = vld [vmem:[#allocation11 + $0x560] sm:$0xff] }
 0x1a9   :  { %3500 = vst [vmem:[#allocation12 + $0x430] sm:$0xff] %v3244_v56  ;;  %v2992_v0 = vmul.f32 2.0, %v2675_v18  ;;  %v586_v26 = vsel %vm520_vm8, %v4149_v47, 0.0  ;;  %vm325_vm9 = vcmp.lt.s32.totalorder %v5484_v37, %v4128_v40  ;;  %3499 = vst [vmem:[#allocation12 + $0x428] sm:$0xff] %v3243_v19  ;;  %v2991_v57 = vmul.f32 2.0, %v2228_v27  ;;  %v1357_v49 = vld [vmem:[#allocation11 + $0x570] sm:$0xff] }
 0x1aa   :  { %3501 = vst [vmem:[#allocation12 + $0x438] sm:$0xff] %v3245_v3  ;;  %v2993_v48 = vmul.f32 2.0, %v2677_v31  ;;  %v650_v17 = vadd.f32 %v586_v26, %v390_v15  ;;  %v391_v25 = vsel %vm325_vm9, %v4138_v43, 0.0  ;;  %v3246_v62 = vadd.f32 %v2990_v39, %v6251_v20  ;;  %v2232_v8 = vpop.f32.mrb[70].mxu0  ;;  %v2681_v61 = vpop.f32.mrb[70].mxu1  ;;  %v1356_v55 = vld [vmem:[#allocation11 + $0x568] sm:$0xff] }
 0x1ab   :  { %v3248_v4 = vadd.f32 %v2992_v0, %v6252_v32  ;;  %vm521_vm10 = vcmp.lt.s32.totalorder %v5484_v37, %v4141_v44  ;;  %v5518_v34 = vadd.s32 360, %v6150_v13  ;;  %v3247_v24 = vadd.f32 %v2991_v57, %v6253_v9  ;;  %v2234_v16 = vpop.f32.mrb[71].mxu0  ;;  %v2683_v10 = vpop.f32.mrb[71].mxu1  ;;  %v1358_v3 = vld [vmem:[#allocation11 + $0x578] sm:$0xff]  ;;  %v6256_v39 = vld [vmem:[#allocation30_spill] sm:$0xff]  ;;  %v6257_v26 = vld [vmem:[#allocation31_spill] sm:$0xff] }
 0x1ac   :  { %v3249_v23 = vadd.f32 %v2993_v48, %v6254_v52  ;;  %v843_v15 = vmul.f32 %v650_v17, %v4143_v45  ;;  %v845_v54 = vmul.f32 %v650_v17, %v4163_v59  ;;  %3502 = vst [vmem:[#allocation12 + $0x440] sm:$0xff] %v3246_v62  ;;  %v2994_v46 = vmul.f32 2.0, %v2232_v8  ;;  %v6255_v21 = vld [vmem:[#allocation29_spill] sm:$0xff]  ;;  %v6258_v48 = vld [vmem:[#allocation32_spill] sm:$0xff] }
 0x1ad   :  { %3504 = vst [vmem:[#allocation12 + $0x450] sm:$0xff] %v3248_v4  ;;  %v2996_v35 = vmul.f32 2.0, %v2681_v61  ;;  %v844_v22 = vmul.f32 %v650_v17, %v4177_v1  ;;  %v846_v12 = vmul.f32 %v650_v17, %v4186_v11  ;;  %3503 = vst [vmem:[#allocation12 + $0x448] sm:$0xff] %v3247_v24  ;;  %v2995_v42 = vmul.f32 2.0, %v2234_v16 }
 0x1ae   :  { %3505 = vst [vmem:[#allocation12 + $0x458] sm:$0xff] %v3249_v23  ;;  %v2997_v56 = vmul.f32 2.0, %v2683_v10  ;;  %v1099_v38 = vadd.f32 1.0, %v843_v15  ;;  %v1101_v19 = vadd.f32 1.0, %v845_v54  ;;  %v3250_v18 = vadd.f32 %v2994_v46, %v6255_v21  ;;  %v2238_v62 = vpop.f32.mrb[72].mxu0  ;;  %v2687_v17 = vpop.f32.mrb[72].mxu1 }
 0x1af   :  { %v3252_v0 = vadd.f32 %v2996_v35, %v6256_v39  ;;  %v1100_v27 = vadd.f32 1.0, %v844_v22  ;;  %v1102_v31 = vadd.f32 1.0, %v846_v12  ;;  %v3251_v57 = vadd.f32 %v2995_v42, %v6257_v26  ;;  %v2240_v52 = vpop.f32.mrb[73].mxu0  ;;  %v2689_v23 = vpop.f32.mrb[73].mxu1  ;;  %v6259_v35 = vld [vmem:[#allocation33_spill] sm:$0xff]  ;;  %v6260_v10 = vld [vmem:[#allocation34_spill] sm:$0xff] }
 0x1b0   :  { %v3253_v20 = vadd.f32 %v2997_v56, %v6258_v48  ;;  %v5530_v32 = vmul.f32 %v1355_v2, %v1099_v38  ;;  %v5532_v4 = vmul.f32 %v1357_v49, %v1101_v19  ;;  %3506 = vst [vmem:[#allocation12 + $0x460] sm:$0xff] %v3250_v18  ;;  %v2998_v9 = vmul.f32 2.0, %v2238_v62  ;;  %v6261_v12 = vld [vmem:[#allocation35_spill] sm:$0xff]  ;;  %v6262_v56 = vld [vmem:[#allocation36_spill] sm:$0xff]  ;;  %v1359_v26 = vld [vmem:[#allocation11 + $0x580] sm:$0xff] }
 0x1b1   :  { %3508 = vst [vmem:[#allocation12 + $0x470] sm:$0xff] %v3252_v0  ;;  %v3000_v24 = vmul.f32 2.0, %v2687_v17  ;;  %v5534_v8 = vmul.f32 %v1356_v55, %v1100_v27  ;;  %v5536_v61 = vmul.f32 %v1358_v3, %v1102_v31  ;;  %3507 = vst [vmem:[#allocation12 + $0x468] sm:$0xff] %v3251_v57  ;;  %v2999_v15 = vmul.f32 2.0, %v2240_v52  ;;  %v1361_v57 = vld [vmem:[#allocation11 + $0x590] sm:$0xff]  ;;  %v6263_v62 = vld [vmem:[#allocation37_spill] sm:$0xff] }
 0x1b2   :  { %3509 = vst [vmem:[#allocation12 + $0x478] sm:$0xff] %v3253_v20  ;;  %v3001_v54 = vmul.f32 2.0, %v2689_v23  ;;  %v587_v46 = vsel %vm521_vm10, %v4149_v47, 0.0  ;;  %vm326_vm11 = vcmp.lt.s32.totalorder %v5518_v34, %v4128_v40  ;;  %v3254_v16 = vadd.f32 %v2998_v9, %v6259_v35  ;;  %v2244_v19 = vpop.f32.mrb[74].mxu0  ;;  %v2693_v55 = vpop.f32.mrb[74].mxu1  ;;  %v6264_v9 = vld [vmem:[#allocation18_spill] sm:$0xff] }
 0x1b3   :  { %v3256_v2 = vadd.f32 %v3000_v24, %v6260_v10  ;;  %v651_v49 = vadd.f32 %v587_v46, %v391_v25  ;;  %v392_v22 = vsel %vm326_vm11, %v4138_v43, 0.0  ;;  %v3255_v42 = vadd.f32 %v2999_v15, %v6261_v12  ;;  %v2246_v18 = vpop.f32.mrb[75].mxu0  ;;  %v2695_v25 = vpop.f32.mrb[75].mxu1  ;;  %v1360_v15 = vld [vmem:[#allocation11 + $0x588] sm:$0xff]  ;;  %v6265_v46 = vld [vmem:[#allocation38_spill] sm:$0xff] }
 0x1b4   :  { %v3257_v38 = vadd.f32 %v3001_v54, %v6262_v56  ;;  %vm522_vm12 = vcmp.lt.s32.totalorder %v5518_v34, %v4141_v44  ;;  %v5552_v37 = vadd.s32 368, %v6150_v13  ;;  %3510 = vst [vmem:[#allocation12 + $0x480] sm:$0xff] %v3254_v16  ;;  %v3002_v3 = vmul.f32 2.0, %v2244_v19  ;;  %v1362_v54 = vld [vmem:[#allocation11 + $0x598] sm:$0xff]  ;;  %v6266_v16 = vld [vmem:[#allocation39_spill] sm:$0xff] }
 0x1b5   :  { %3512 = vst [vmem:[#allocation12 + $0x490] sm:$0xff] %v3256_v2  ;;  %v3004_v21 = vmul.f32 2.0, %v2693_v55  ;;  %v847_v39 = vmul.f32 %v651_v49, %v4143_v45  ;;  %v849_v0 = vmul.f32 %v651_v49, %v4163_v59  ;;  %3511 = vst [vmem:[#allocation12 + $0x488] sm:$0xff] %v3255_v42  ;;  %v3003_v27 = vmul.f32 2.0, %v2246_v18 }
 0x1b6   :  { %3513 = vst [vmem:[#allocation12 + $0x498] sm:$0xff] %v3257_v38  ;;  %v3005_v31 = vmul.f32 2.0, %v2695_v25  ;;  %v848_v48 = vmul.f32 %v651_v49, %v4177_v1  ;;  %v850_v20 = vmul.f32 %v651_v49, %v4186_v11  ;;  %v3258_v17 = vadd.f32 %v3002_v3, %v6263_v62  ;;  %v2250_v2 = vpop.f32.mrb[76].mxu0  ;;  %v2699_v12 = vpop.f32.mrb[76].mxu1 }
 0x1b7   :  { %v3260_v24 = vadd.f32 %v3004_v21, %v6264_v9  ;;  %v1103_v52 = vadd.f32 1.0, %v847_v39  ;;  %v1105_v23 = vadd.f32 1.0, %v849_v0  ;;  %v3259_v35 = vadd.f32 %v3003_v27, %v6265_v46  ;;  %v2252_v19 = vpop.f32.mrb[77].mxu0  ;;  %v2701_v55 = vpop.f32.mrb[77].mxu1  ;;  %v6267_v27 = vld [vmem:[#allocation40_spill] sm:$0xff] }
 0x1b8   :  { %v3261_v10 = vadd.f32 %v3005_v31, %v6266_v16  ;;  %v1104_v42 = vadd.f32 1.0, %v848_v48  ;;  %v1106_v56 = vadd.f32 1.0, %v850_v20  ;;  %3514 = vst [vmem:[#allocation12 + $0x4a0] sm:$0xff] %v3258_v17  ;;  %v3006_v38 = vmul.f32 2.0, %v2250_v2  ;;  %v6268_v48 = vld [vmem:[#allocation41_spill] sm:$0xff]  ;;  %v6270_v17 = vld [vmem:[#allocation43_spill] sm:$0xff] }
 0x1b9   :  { %3516 = vst [vmem:[#allocation12 + $0x4b0] sm:$0xff] %v3260_v24  ;;  %v3008_v49 = vmul.f32 2.0, %v2699_v12  ;;  %v5562_v3 = vmul.f32 %v1359_v26, %v1103_v52  ;;  %v5564_v21 = vmul.f32 %v1361_v57, %v1105_v23  ;;  %3515 = vst [vmem:[#allocation12 + $0x4a8] sm:$0xff] %v3259_v35  ;;  %v3007_v18 = vmul.f32 2.0, %v2252_v19  ;;  %v6269_v57 = vld [vmem:[#allocation42_spill] sm:$0xff] }
 0x1ba   :  { %3517 = vst [vmem:[#allocation12 + $0x4b8] sm:$0xff] %v3261_v10  ;;  %v3009_v25 = vmul.f32 2.0, %v2701_v55  ;;  %v5566_v39 = vmul.f32 %v1360_v15, %v1104_v42  ;;  %v5568_v0 = vmul.f32 %v1362_v54, %v1106_v56  ;;  %v3262_v31 = vadd.f32 %v3006_v38, %v6267_v27  ;;  %v2256_v24 = vpop.f32.mrb[78].mxu0  ;;  %v2705_v52 = vpop.f32.mrb[78].mxu1  ;;  %v1363_v38 = vld [vmem:[#allocation11 + $0x5a0] sm:$0xff] }
 0x1bb   :  { %v3264_v20 = vadd.f32 %v3008_v49, %v6268_v48  ;;  %v588_v26 = vsel %vm522_vm12, %v4149_v47, 0.0  ;;  %vm327_vm13 = vcmp.lt.s32.totalorder %v5552_v37, %v4128_v40  ;;  %v3263_v62 = vadd.f32 %v3007_v18, %v6269_v57  ;;  %v2258_v35 = vpop.f32.mrb[79].mxu0  ;;  %v2707_v16 = vpop.f32.mrb[79].mxu1  ;;  %v1365_v49 = vld [vmem:[#allocation11 + $0x5b0] sm:$0xff]  ;;  %v1366_v57 = vld [vmem:[#allocation11 + $0x5b8] sm:$0xff] }
 0x1bc   :  { %v3265_v9 = vadd.f32 %v3009_v25, %v6270_v17  ;;  %v652_v23 = vadd.f32 %v588_v26, %v392_v22  ;;  %v393_v15 = vsel %vm327_vm13, %v4138_v43, 0.0  ;;  %3518 = vst [vmem:[#allocation12 + $0x4c0] sm:$0xff] %v3262_v31  ;;  %v3010_v54 = vmul.f32 2.0, %v2256_v24  ;;  %v1364_v26 = vld [vmem:[#allocation11 + $0x5a8] sm:$0xff] }
 0x1bd   :  { %3520 = vst [vmem:[#allocation12 + $0x4d0] sm:$0xff] %v3264_v20  ;;  %v3012_v46 = vmul.f32 2.0, %v2705_v52  ;;  %vm523_vm14 = vcmp.lt.s32.totalorder %v5552_v37, %v4141_v44  ;;  %v5584_v34 = vadd.s32 376, %v6150_v13  ;;  %3519 = vst [vmem:[#allocation12 + $0x4c8] sm:$0xff] %v3263_v62  ;;  %v3011_v10 = vmul.f32 2.0, %v2258_v35 }
 0x1be   :  { %3521 = vst [vmem:[#allocation12 + $0x4d8] sm:$0xff] %v3265_v9  ;;  %v3013_v2 = vmul.f32 2.0, %v2707_v16  ;;  %v851_v22 = vmul.f32 %v652_v23, %v4143_v45  ;;  %v853_v12 = vmul.f32 %v652_v23, %v4163_v59  ;;  %v3266_v42 = vadd.f32 %v3010_v54, %v5398_v5  ;;  %v2262_v27 = vpop.f32.mrb[80].mxu0  ;;  %v2711_v31 = vpop.f32.mrb[80].mxu1 }
 0x1bf   :  { %v3268_v56 = vadd.f32 %v3012_v46, %v5400_v50  ;;  %v852_v19 = vmul.f32 %v652_v23, %v4177_v1  ;;  %v854_v55 = vmul.f32 %v652_v23, %v4186_v11  ;;  %v3267_v18 = vadd.f32 %v3011_v10, %v5402_v30  ;;  %v2264_v62 = vpop.f32.mrb[81].mxu0  ;;  %v2713_v17 = vpop.f32.mrb[81].mxu1 }
 0x1c0   :  { %v3269_v25 = vadd.f32 %v3013_v2, %v5404_v53  ;;  %v1107_v48 = vadd.f32 1.0, %v851_v22  ;;  %v1109_v20 = vadd.f32 1.0, %v853_v12  ;;  %3522 = vst [vmem:[#allocation12 + $0x4e0] sm:$0xff] %v3266_v42  ;;  %v3014_v5 = vmul.f32 2.0, %v2262_v27  ;;  %v1367_v27 = vld [vmem:[#allocation11 + $0x5c0] sm:$0xff] }
 0x1c1   :  { %3524 = vst [vmem:[#allocation12 + $0x4f0] sm:$0xff] %v3268_v56  ;;  %v3016_v50 = vmul.f32 2.0, %v2711_v31  ;;  %v1108_v9 = vadd.f32 1.0, %v852_v19  ;;  %v1110_v24 = vadd.f32 1.0, %v854_v55  ;;  %3523 = vst [vmem:[#allocation12 + $0x4e8] sm:$0xff] %v3267_v18  ;;  %v3015_v52 = vmul.f32 2.0, %v2264_v62 }
 0x1c2   :  { %3525 = vst [vmem:[#allocation12 + $0x4f8] sm:$0xff] %v3269_v25  ;;  %v3017_v30 = vmul.f32 2.0, %v2713_v17  ;;  %v5594_v23 = vmul.f32 %v1363_v38, %v1107_v48  ;;  %v5596_v53 = vmul.f32 %v1365_v49, %v1109_v20  ;;  %v3270_v54 = vadd.f32 %v3014_v5, %v5430_v58  ;;  %v2268_v22 = vpop.f32.mrb[82].mxu0  ;;  %v2717_v12 = vpop.f32.mrb[82].mxu1 }
 0x1c3   :  { %v3272_v46 = vadd.f32 %v3016_v50, %v5432_v33  ;;  %v5600_v35 = vmul.f32 %v1364_v26, %v1108_v9  ;;  %v5602_v16 = vmul.f32 %v1366_v57, %v1110_v24  ;;  %v3271_v10 = vadd.f32 %v3015_v52, %v5434_v7  ;;  %v2270_v56 = vpop.f32.mrb[83].mxu0  ;;  %v2719_v38 = vpop.f32.mrb[83].mxu1  ;;  %v1369_v57 = vld [vmem:[#allocation11 + $0x5d0] sm:$0xff]  ;;  %v1368_v50 = vld [vmem:[#allocation11 + $0x5c8] sm:$0xff] }
 0x1c4   :  { %v3273_v2 = vadd.f32 %v3017_v30, %v5436_v36  ;;  %v589_v42 = vsel %vm523_vm14, %v4149_v47, 0.0  ;;  %vm328_vm15 = vcmp.lt.s32.totalorder %v5584_v34, %v4128_v40  ;;  %3526 = vst [vmem:[#allocation12 + $0x500] sm:$0xff] %v3270_v54  ;;  %v3018_v58 = vmul.f32 2.0, %v2268_v22 }
 0x1c5   :  { %3528 = vst [vmem:[#allocation12 + $0x510] sm:$0xff] %v3272_v46  ;;  %v3020_v33 = vmul.f32 2.0, %v2717_v12  ;;  %v653_v49 = vadd.f32 %v589_v42, %v393_v15  ;;  %v394_v7 = vsel %vm328_vm15, %v4138_v43, 0.0  ;;  %3527 = vst [vmem:[#allocation12 + $0x508] sm:$0xff] %v3271_v10  ;;  %v3019_v36 = vmul.f32 2.0, %v2270_v56 }
 0x1c6   :  { %3529 = vst [vmem:[#allocation12 + $0x518] sm:$0xff] %v3273_v2  ;;  %v3021_v19 = vmul.f32 2.0, %v2719_v38  ;;  %vm524_vm1 = vcmp.lt.s32.totalorder %v5584_v34, %v4141_v44  ;;  %v5616_v37 = vadd.s32 384, %v6150_v13  ;;  %v3274_v55 = vadd.f32 %v3018_v58, %v5462_v28  ;;  %v2274_v20 = vpop.f32.mrb[84].mxu0  ;;  %v2723_v26 = vpop.f32.mrb[84].mxu1  ;;  %v1370_v28 = vld [vmem:[#allocation11 + $0x5d8] sm:$0xff] }
 0x1c7   :  { %v3276_v18 = vadd.f32 %v3020_v33, %v5464_v14  ;;  %v855_v25 = vmul.f32 %v653_v49, %v4143_v45  ;;  %v857_v15 = vmul.f32 %v653_v49, %v4163_v59  ;;  %v3275_v31 = vadd.f32 %v3019_v36, %v5468_v51  ;;  %v2276_v9 = vpop.f32.mrb[85].mxu0  ;;  %v2725_v24 = vpop.f32.mrb[85].mxu1 }
 0x1c8   :  { %v3277_v48 = vadd.f32 %v3021_v19, %v5470_v41  ;;  %v856_v5 = vmul.f32 %v653_v49, %v4177_v1  ;;  %v858_v62 = vmul.f32 %v653_v49, %v4186_v11  ;;  %3530 = vst [vmem:[#allocation12 + $0x520] sm:$0xff] %v3274_v55  ;;  %v3022_v14 = vmul.f32 2.0, %v2274_v20 }
 0x1c9   :  { %3532 = vst [vmem:[#allocation12 + $0x530] sm:$0xff] %v3276_v18  ;;  %v3024_v17 = vmul.f32 2.0, %v2723_v26  ;;  %v1111_v52 = vadd.f32 1.0, %v855_v25  ;;  %v1113_v30 = vadd.f32 1.0, %v857_v15  ;;  %3531 = vst [vmem:[#allocation12 + $0x528] sm:$0xff] %v3275_v31  ;;  %v3023_v51 = vmul.f32 2.0, %v2276_v9 }
 0x1ca   :  { %3533 = vst [vmem:[#allocation12 + $0x538] sm:$0xff] %v3277_v48  ;;  %v3025_v41 = vmul.f32 2.0, %v2725_v24  ;;  %v1112_v54 = vadd.f32 1.0, %v856_v5  ;;  %v1114_v46 = vadd.f32 1.0, %v858_v62  ;;  %v3278_v10 = vadd.f32 %v3022_v14, %v5496_v29  ;;  %v2280_v33 = vpop.f32.mrb[86].mxu0  ;;  %v2729_v56 = vpop.f32.mrb[86].mxu1 }
 0x1cb   :  { %v3280_v2 = vadd.f32 %v3024_v17, %v5498_v60  ;;  %v5628_v22 = vmul.f32 %v1367_v27, %v1111_v52  ;;  %v5630_v12 = vmul.f32 %v1369_v57, %v1113_v30  ;;  %v3279_v42 = vadd.f32 %v3023_v51, %v5502_v63  ;;  %v2282_v19 = vpop.f32.mrb[87].mxu0  ;;  %v2731_v60 = vpop.f32.mrb[87].mxu1  ;;  %v1371_v62 = vld [vmem:[#allocation11 + $0x5e0] sm:$0xff]  ;;  %v1372_v52 = vld [vmem:[#allocation11 + $0x5e8] sm:$0xff]  ;;  %v1374_v30 = vld [vmem:[#allocation11 + $0x5f8] sm:$0xff] }
 0x1cc   :  { %v3281_v58 = vadd.f32 %v3025_v41, %v5504_v6  ;;  %v5634_v38 = vmul.f32 %v1368_v50, %v1112_v54  ;;  %v5636_v49 = vmul.f32 %v1370_v28, %v1114_v46  ;;  %3534 = vst [vmem:[#allocation12 + $0x540] sm:$0xff] %v3278_v10  ;;  %v3026_v36 = vmul.f32 2.0, %v2280_v33  ;;  %v1373_v28 = vld [vmem:[#allocation11 + $0x5f0] sm:$0xff] }
 0x1cd   :  { %3536 = vst [vmem:[#allocation12 + $0x550] sm:$0xff] %v3280_v2  ;;  %v3028_v29 = vmul.f32 2.0, %v2729_v56  ;;  %v590_v55 = vsel %vm524_vm1, %v4149_v47, 0.0  ;;  %vm329_vm2 = vcmp.lt.s32.totalorder %v5616_v37, %v4128_v40  ;;  %3535 = vst [vmem:[#allocation12 + $0x548] sm:$0xff] %v3279_v42  ;;  %v3027_v63 = vmul.f32 2.0, %v2282_v19 }
 0x1ce   :  { %3537 = vst [vmem:[#allocation12 + $0x558] sm:$0xff] %v3281_v58  ;;  %v3029_v6 = vmul.f32 2.0, %v2731_v60  ;;  %v654_v18 = vadd.f32 %v590_v55, %v394_v7  ;;  %v395_v25 = vsel %vm329_vm2, %v4138_v43, 0.0  ;;  %v3282_v27 = vadd.f32 %v3026_v36, %v5530_v32  ;;  %v2286_v20 = vpop.f32.mrb[88].mxu0  ;;  %v2735_v26 = vpop.f32.mrb[88].mxu1 }
 0x1cf   :  { %v3284_v15 = vadd.f32 %v3028_v29, %v5532_v4  ;;  %vm525_vm3 = vcmp.lt.s32.totalorder %v5616_v37, %v4141_v44  ;;  %v5650_v34 = vadd.s32 392, %v6150_v13  ;;  %v3283_v31 = vadd.f32 %v3027_v63, %v5534_v8  ;;  %v2288_v5 = vpop.f32.mrb[89].mxu0  ;;  %v2737_v50 = vpop.f32.mrb[89].mxu1 }
 0x1d0   :  { %v3285_v48 = vadd.f32 %v3029_v6, %v5536_v61  ;;  %v859_v7 = vmul.f32 %v654_v18, %v4143_v45  ;;  %v861_v57 = vmul.f32 %v654_v18, %v4163_v59  ;;  %3538 = vst [vmem:[#allocation12 + $0x560] sm:$0xff] %v3282_v27  ;;  %v3030_v32 = vmul.f32 2.0, %v2286_v20 }
 0x1d1   :  { %3540 = vst [vmem:[#allocation12 + $0x570] sm:$0xff] %v3284_v15  ;;  %v3032_v4 = vmul.f32 2.0, %v2735_v26  ;;  %v860_v14 = vmul.f32 %v654_v18, %v4177_v1  ;;  %v862_v8 = vmul.f32 %v654_v18, %v4186_v11  ;;  %3539 = vst [vmem:[#allocation12 + $0x568] sm:$0xff] %v3283_v31  ;;  %v3031_v61 = vmul.f32 2.0, %v2288_v5 }
 0x1d2   :  { %3541 = vst [vmem:[#allocation12 + $0x578] sm:$0xff] %v3285_v48  ;;  %v3033_v17 = vmul.f32 2.0, %v2737_v50  ;;  %v1115_v9 = vadd.f32 1.0, %v859_v7  ;;  %v1117_v24 = vadd.f32 1.0, %v861_v57  ;;  %v3286_v51 = vadd.f32 %v3030_v32, %v5562_v3  ;;  %v2292_v42 = vpop.f32.mrb[90].mxu0  ;;  %v2741_v58 = vpop.f32.mrb[90].mxu1 }
 0x1d3   :  { %v3288_v41 = vadd.f32 %v3032_v4, %v5564_v21  ;;  %v1116_v54 = vadd.f32 1.0, %v860_v14  ;;  %v1118_v46 = vadd.f32 1.0, %v862_v8  ;;  %v3287_v10 = vadd.f32 %v3031_v61, %v5566_v39  ;;  %v2294_v19 = vpop.f32.mrb[91].mxu0  ;;  %v2743_v3 = vpop.f32.mrb[91].mxu1  ;;  %v1375_v32 = vld [vmem:[#allocation11 + $0x600] sm:$0xff]  ;;  %v1377_v4 = vld [vmem:[#allocation11 + $0x610] sm:$0xff] }
 0x1d4   :  { %v3289_v2 = vadd.f32 %v3033_v17, %v5568_v0  ;;  %v5662_v33 = vmul.f32 %v1371_v62, %v1115_v9  ;;  %v5664_v56 = vmul.f32 %v1373_v28, %v1117_v24  ;;  %3542 = vst [vmem:[#allocation12 + $0x580] sm:$0xff] %v3286_v51  ;;  %v3034_v36 = vmul.f32 2.0, %v2292_v42  ;;  %v1376_v61 = vld [vmem:[#allocation11 + $0x608] sm:$0xff]  ;;  %v1378_v17 = vld [vmem:[#allocation11 + $0x618] sm:$0xff] }
 0x1d5   :  { %3544 = vst [vmem:[#allocation12 + $0x590] sm:$0xff] %v3288_v41  ;;  %v3036_v29 = vmul.f32 2.0, %v2741_v58  ;;  %v5666_v60 = vmul.f32 %v1372_v52, %v1116_v54  ;;  %v5668_v21 = vmul.f32 %v1374_v30, %v1118_v46  ;;  %3543 = vst [vmem:[#allocation12 + $0x588] sm:$0xff] %v3287_v10  ;;  %v3035_v39 = vmul.f32 2.0, %v2294_v19 }
 0x1d6   :  { %3545 = vst [vmem:[#allocation12 + $0x598] sm:$0xff] %v3289_v2  ;;  %v3037_v0 = vmul.f32 2.0, %v2743_v3  ;;  %v591_v55 = vsel %vm525_vm3, %v4149_v47, 0.0  ;;  %vm330_vm4 = vcmp.lt.s32.totalorder %v5650_v34, %v4128_v40  ;;  %v3290_v63 = vadd.f32 %v3034_v36, %v5594_v23  ;;  %v2298_v48 = vpop.f32.mrb[92].mxu0  ;;  %v2747_v20 = vpop.f32.mrb[92].mxu1 }
 0x1d7   :  { %v3292_v6 = vadd.f32 %v3036_v29, %v5596_v53  ;;  %v655_v18 = vadd.f32 %v591_v55, %v395_v25  ;;  %v396_v27 = vsel %vm330_vm4, %v4138_v43, 0.0  ;;  %v3291_v15 = vadd.f32 %v3035_v39, %v5600_v35  ;;  %v2300_v53 = vpop.f32.mrb[93].mxu0  ;;  %v2749_v25 = vpop.f32.mrb[93].mxu1 }
 0x1d8   :  { %v3293_v31 = vadd.f32 %v3037_v0, %v5602_v16  ;;  %vm526_vm5 = vcmp.lt.s32.totalorder %v5650_v34, %v4141_v44  ;;  %v5684_v37 = vadd.s32 400, %v6150_v13  ;;  %3546 = vst [vmem:[#allocation12 + $0x5a0] sm:$0xff] %v3290_v63  ;;  %v3038_v23 = vmul.f32 2.0, %v2298_v48 }
 0x1d9   :  { %3548 = vst [vmem:[#allocation12 + $0x5b0] sm:$0xff] %v3292_v6  ;;  %v3040_v26 = vmul.f32 2.0, %v2747_v20  ;;  %v863_v7 = vmul.f32 %v655_v18, %v4143_v45  ;;  %v865_v35 = vmul.f32 %v655_v18, %v4163_v59  ;;  %3547 = vst [vmem:[#allocation12 + $0x5a8] sm:$0xff] %v3291_v15  ;;  %v3039_v16 = vmul.f32 2.0, %v2300_v53 }
 0x1da   :  { %3549 = vst [vmem:[#allocation12 + $0x5b8] sm:$0xff] %v3293_v31  ;;  %v3041_v57 = vmul.f32 2.0, %v2749_v25  ;;  %v864_v5 = vmul.f32 %v655_v18, %v4177_v1  ;;  %v866_v50 = vmul.f32 %v655_v18, %v4186_v11  ;;  %v3294_v62 = vadd.f32 %v3038_v23, %v5628_v22  ;;  %v2304_v52 = vpop.f32.mrb[94].mxu0  ;;  %v2753_v30 = vpop.f32.mrb[94].mxu1  ;;  %v1379_v23 = vld [vmem:[#allocation11 + $0x620] sm:$0xff] }
 0x1db   :  { %v3296_v28 = vadd.f32 %v3040_v26, %v5630_v12  ;;  %v1119_v14 = vadd.f32 1.0, %v863_v7  ;;  %v1121_v8 = vadd.f32 1.0, %v865_v35  ;;  %v3295_v9 = vadd.f32 %v3039_v16, %v5634_v38  ;;  %v2306_v10 = vpop.f32.mrb[95].mxu0  ;;  %v2755_v22 = vpop.f32.mrb[95].mxu1  ;;  %v1381_v26 = vld [vmem:[#allocation11 + $0x630] sm:$0xff] }
 0x1dc   :  { %v3297_v24 = vadd.f32 %v3041_v57, %v5636_v49  ;;  %v1120_v51 = vadd.f32 1.0, %v864_v5  ;;  %v1122_v41 = vadd.f32 1.0, %v866_v50  ;;  %3550 = vst [vmem:[#allocation12 + $0x5c0] sm:$0xff] %v3294_v62  ;;  %v3042_v54 = vmul.f32 2.0, %v2304_v52  ;;  %v1380_v5 = vld [vmem:[#allocation11 + $0x628] sm:$0xff]  ;;  %v1382_v50 = vld [vmem:[#allocation11 + $0x638] sm:$0xff] }
 0x1dd   :  { %3552 = vst [vmem:[#allocation12 + $0x5d0] sm:$0xff] %v3296_v28  ;;  %v3044_v46 = vmul.f32 2.0, %v2753_v30  ;;  %v1631_v2 = vmul.f32 %v1375_v32, %v1119_v14  ;;  %v1633_v12 = vmul.f32 %v1377_v4, %v1121_v8  ;;  %3551 = vst [vmem:[#allocation12 + $0x5c8] sm:$0xff] %v3295_v9  ;;  %v3043_v42 = vmul.f32 2.0, %v2306_v10 }
 0x1de   :  { %3553 = vst [vmem:[#allocation12 + $0x5d8] sm:$0xff] %v3297_v24  ;;  %v3045_v58 = vmul.f32 2.0, %v2755_v22  ;;  %v1632_v36 = vmul.f32 %v1376_v61, %v1120_v51  ;;  %v1634_v38 = vmul.f32 %v1378_v17, %v1122_v41  ;;  %v3298_v49 = vadd.f32 %v3042_v54, %v5662_v33  ;;  %v2310_v0 = vpop.f32.mrb[96].mxu0  ;;  %v2759_v55 = vpop.f32.mrb[96].mxu1 }
 0x1df   :  { %v3300_v29 = vadd.f32 %v3044_v46, %v5664_v56  ;;  %v592_v19 = vsel %vm526_vm5, %v4149_v47, 0.0  ;;  %vm331_vm0 = vcmp.lt.s32.totalorder %v5684_v37, %v4128_v40  ;;  %v3299_v3 = vadd.f32 %v3043_v42, %v5666_v60  ;;  %v2312_v18 = vpop.f32.mrb[97].mxu0  ;;  %v2761_v15 = vpop.f32.mrb[97].mxu1 }
 0x1e0   :  { %v3301_v39 = vadd.f32 %v3045_v58, %v5668_v21  ;;  %v656_v63 = vadd.f32 %v592_v19, %v396_v27  ;;  %v397_v6 = vsel %vm331_vm0, %v4138_v43, 0.0  ;;  %3554 = vst [vmem:[#allocation12 + $0x5e0] sm:$0xff] %v3298_v49  ;;  %v3046_v33 = vmul.f32 2.0, %v2310_v0 }
 0x1e1   :  { %3556 = vst [vmem:[#allocation12 + $0x5f0] sm:$0xff] %v3300_v29  ;;  %v3048_v56 = vmul.f32 2.0, %v2759_v55  ;;  %vm527_vm6 = vcmp.lt.s32.totalorder %v5684_v37, %v4141_v44  ;;  %v5708_v34 = vadd.s32 408, %v6150_v13  ;;  %3555 = vst [vmem:[#allocation12 + $0x5e8] sm:$0xff] %v3299_v3  ;;  %v3047_v60 = vmul.f32 2.0, %v2312_v18  ;;  %v1383_v3 = vld [vmem:[#allocation11 + $0x640] sm:$0xff] }
 0x1e2   :  { %3557 = vst [vmem:[#allocation12 + $0x5f8] sm:$0xff] %v3301_v39  ;;  %v3049_v21 = vmul.f32 2.0, %v2761_v15  ;;  %v867_v27 = vmul.f32 %v656_v63, %v4143_v45  ;;  %v869_v31 = vmul.f32 %v656_v63, %v4163_v59  ;;  %v3302_v48 = vadd.f32 %v3046_v33, %v1631_v2  ;;  %v2316_v57 = vpop.f32.mrb[98].mxu0  ;;  %v2765_v4 = vpop.f32.mrb[98].mxu1 }
 0x1e3   :  { %v3304_v20 = vadd.f32 %v3048_v56, %v1633_v12  ;;  %v868_v53 = vmul.f32 %v656_v63, %v4177_v1  ;;  %v870_v25 = vmul.f32 %v656_v63, %v4186_v11  ;;  %v3303_v7 = vadd.f32 %v3047_v60, %v1632_v36  ;;  %v2318_v8 = vpop.f32.mrb[99].mxu0  ;;  %v2767_v17 = vpop.f32.mrb[99].mxu1  ;;  %v1385_v63 = vld [vmem:[#allocation11 + $0x650] sm:$0xff]  ;;  %v1386_v56 = vld [vmem:[#allocation11 + $0x658] sm:$0xff] }
 0x1e4   :  { %v3305_v35 = vadd.f32 %v3049_v21, %v1634_v38  ;;  %v1123_v16 = vadd.f32 1.0, %v867_v27  ;;  %v1125_v32 = vadd.f32 1.0, %v869_v31  ;;  %3558 = vst [vmem:[#allocation12 + $0x600] sm:$0xff] %v3302_v48  ;;  %v3050_v62 = vmul.f32 2.0, %v2316_v57 }
 0x1e5   :  { %3560 = vst [vmem:[#allocation12 + $0x610] sm:$0xff] %v3304_v20  ;;  %v3052_v28 = vmul.f32 2.0, %v2765_v4  ;;  %v1124_v14 = vadd.f32 1.0, %v868_v53  ;;  %v1126_v61 = vadd.f32 1.0, %v870_v25  ;;  %3559 = vst [vmem:[#allocation12 + $0x608] sm:$0xff] %v3303_v7  ;;  %v3051_v52 = vmul.f32 2.0, %v2318_v8 }
 0x1e6   :  { %3561 = vst [vmem:[#allocation12 + $0x618] sm:$0xff] %v3305_v35  ;;  %v1635_v9 = vmul.f32 %v1379_v23, %v1123_v16  ;;  %v1637_v24 = vmul.f32 %v1381_v26, %v1125_v32  ;;  %v3053_v30 = vmul.f32 2.0, %v2767_v17  ;;  %v593_v54 = vsel %vm527_vm6, %v4149_v47, 0.0  ;;  %v2322_v2 = vpop.f32.mrb[100].mxu0  ;;  %v2771_v12 = vpop.f32.mrb[100].mxu1  ;;  %v1389_v17 = vld [vmem:[#allocation11 + $0x670] sm:$0xff] }
 0x1e7   :  { %v1636_v51 = vmul.f32 %v1380_v5, %v1124_v14  ;;  %v1638_v41 = vmul.f32 %v1382_v50, %v1126_v61  ;;  %vm332_vm7 = vcmp.lt.s32.totalorder %v5708_v34, %v4128_v40  ;;  %v657_v22 = vadd.f32 %v593_v54, %v397_v6  ;;  %v2324_v29 = vpop.f32.mrb[101].mxu0  ;;  %v2773_v19 = vpop.f32.mrb[101].mxu1  ;;  %v1384_v6 = vld [vmem:[#allocation11 + $0x648] sm:$0xff]  ;;  %v1387_v61 = vld [vmem:[#allocation11 + $0x660] sm:$0xff] }
 0x1e8   :  { %v3306_v46 = vadd.f32 %v3050_v62, %v1635_v9  ;;  %v3308_v10 = vadd.f32 %v3052_v28, %v1637_v24  ;;  %v398_v42 = vsel %vm332_vm7, %v4138_v43, 0.0  ;;  %v3054_v38 = vmul.f32 2.0, %v2322_v2  ;;  %v1388_v9 = vld [vmem:[#allocation11 + $0x668] sm:$0xff] }
 0x1e9   :  { %v3307_v58 = vadd.f32 %v3051_v52, %v1636_v51  ;;  %v3309_v36 = vadd.f32 %v3053_v30, %v1638_v41  ;;  %v3056_v49 = vmul.f32 2.0, %v2771_v12  ;;  %v871_v37 = vmul.f32 %v657_v22, %v4143_v45 }
 0x1ea   :  { %3562 = vst [vmem:[#allocation12 + $0x620] sm:$0xff] %v3306_v46  ;;  %3564 = vst [vmem:[#allocation12 + $0x630] sm:$0xff] %v3308_v10  ;;  %v873_v39 = vmul.f32 %v657_v22, %v4163_v59  ;;  %v872_v0 = vmul.f32 %v657_v22, %v4177_v1  ;;  %v3055_v55 = vmul.f32 2.0, %v2324_v29  ;;  %v874_v33 = vmul.f32 %v657_v22, %v4186_v11  ;;  %v2328_v48 = vpop.f32.mrb[102].mxu0  ;;  %v2777_v20 = vpop.f32.mrb[102].mxu1  ;;  %v1390_v10 = vld [vmem:[#allocation11 + $0x678] sm:$0xff] }
 0x1eb   :  { %3563 = vst [vmem:[#allocation12 + $0x628] sm:$0xff] %v3307_v58  ;;  %3565 = vst [vmem:[#allocation12 + $0x638] sm:$0xff] %v3309_v36  ;;  %v3057_v18 = vmul.f32 2.0, %v2773_v19  ;;  %vm528_vm8 = vcmp.lt.s32.totalorder %v5708_v34, %v4141_v44  ;;  %v202_v15 = vadd.s32 416, %v6150_v13  ;;  %v1127_v60 = vadd.f32 1.0, %v871_v37  ;;  %v2330_v7 = vpop.f32.mrb[103].mxu0 }
 0x1ec   :  { %v1129_v21 = vadd.f32 1.0, %v873_v39  ;;  %v1128_v27 = vadd.f32 1.0, %v872_v0  ;;  %v594_v31 = vsel %vm528_vm8, %v4149_v47, 0.0  ;;  %v1130_v23 = vadd.f32 1.0, %v874_v33  ;;  %v2779_v35 = vpop.f32.mrb[103].mxu1 }
 0x1ed   :  { %v658_v26 = vadd.f32 %v594_v31, %v398_v42  ;;  %v3058_v53 = vmul.f32 2.0, %v2328_v48  ;;  %v3060_v25 = vmul.f32 2.0, %v2777_v20  ;;  %v1639_v16 = vmul.f32 %v1383_v3, %v1127_v60  ;;  %v1391_v48 = vld [vmem:[#allocation11 + $0x680] sm:$0xff] }
 0x1ee   :  { %v1641_v57 = vmul.f32 %v1385_v63, %v1129_v21  ;;  %v1640_v32 = vmul.f32 %v1384_v6, %v1128_v27  ;;  %v3059_v4 = vmul.f32 2.0, %v2330_v7  ;;  %v1642_v34 = vmul.f32 %v1386_v56, %v1130_v23  ;;  %v2334_v52 = vpop.f32.mrb[104].mxu0  ;;  %v2783_v30 = vpop.f32.mrb[104].mxu1  ;;  %v1393_v23 = vld [vmem:[#allocation11 + $0x690] sm:$0xff]  ;;  %v1394_v7 = vld [vmem:[#allocation11 + $0x698] sm:$0xff] }
 0x1ef   :  { %v875_v5 = vmul.f32 %v658_v26, %v4143_v45  ;;  %v877_v50 = vmul.f32 %v658_v26, %v4163_v59  ;;  %v876_v62 = vmul.f32 %v658_v26, %v4177_v1  ;;  %v3310_v28 = vadd.f32 %v3054_v38, %v1639_v16  ;;  %v2336_v22 = vpop.f32.mrb[105].mxu0  ;;  %v2785_v2 = vpop.f32.mrb[105].mxu1 }
 0x1f0   :  { %v3312_v14 = vadd.f32 %v3056_v49, %v1641_v57  ;;  %v3311_v8 = vadd.f32 %v3055_v55, %v1640_v32  ;;  %v878_v24 = vmul.f32 %v658_v26, %v4186_v11  ;;  %v3313_v51 = vadd.f32 %v3057_v18, %v1642_v34 }
 0x1f1   :  { %v1131_v41 = vadd.f32 1.0, %v875_v5  ;;  %v1133_v54 = vadd.f32 1.0, %v877_v50  ;;  %v1132_v46 = vadd.f32 1.0, %v876_v62  ;;  %3566 = vst [vmem:[#allocation12 + $0x640] sm:$0xff] %v3310_v28  ;;  %v3061_v42 = vmul.f32 2.0, %v2779_v35 }
 0x1f2   :  { %3568 = vst [vmem:[#allocation12 + $0x650] sm:$0xff] %v3312_v14  ;;  %3567 = vst [vmem:[#allocation12 + $0x648] sm:$0xff] %v3311_v8  ;;  %v1134_v12 = vadd.f32 1.0, %v878_v24  ;;  %vm333_vm9 = vcmp.lt.s32.totalorder %v202_v15, %v4128_v40  ;;  %vm529_vm10 = vcmp.lt.s32.totalorder %v202_v15, %v4141_v44  ;;  %v3062_v37 = vmul.f32 2.0, %v2334_v52  ;;  %v2340_v39 = vpop.f32.mrb[106].mxu0  ;;  %v2789_v0 = vpop.f32.mrb[106].mxu1 }
 0x1f3   :  { %3569 = vst [vmem:[#allocation12 + $0x658] sm:$0xff] %v3313_v51  ;;  %v1643_v58 = vmul.f32 %v1387_v61, %v1131_v41  ;;  %v1645_v36 = vmul.f32 %v1389_v17, %v1133_v54  ;;  %v1644_v38 = vmul.f32 %v1388_v9, %v1132_v46  ;;  %v399_v49 = vsel %vm333_vm9, %v4138_v43, 0.0  ;;  %v2342_v56 = vpop.f32.mrb[107].mxu0  ;;  %v2791_v18 = vpop.f32.mrb[107].mxu1 }
 0x1f4   :  { %v1646_v29 = vmul.f32 %v1390_v10, %v1134_v12  ;;  %v595_v19 = vsel %vm529_vm10, %v4149_v47, 0.0  ;;  %v3064_v3 = vmul.f32 2.0, %v2783_v30  ;;  %v3063_v60 = vmul.f32 2.0, %v2336_v22 }
 0x1f5   :  { %v3314_v55 = vadd.f32 %v3058_v53, %v1643_v58  ;;  %v3316_v63 = vadd.f32 %v3060_v25, %v1645_v36  ;;  %v3315_v6 = vadd.f32 %v3059_v4, %v1644_v38  ;;  %v659_v33 = vadd.f32 %v595_v19, %v399_v49  ;;  %v1392_v25 = vld [vmem:[#allocation11 + $0x688] sm:$0xff] }
 0x1f6   :  { %v3317_v15 = vadd.f32 %v3061_v42, %v1646_v29  ;;  %v3065_v21 = vmul.f32 2.0, %v2785_v2  ;;  %v203_v27 = vadd.s32 424, %v6150_v13  ;;  %v5744_v35 = vmul.f32 2.0, %v2340_v39  ;;  %v2346_v57 = vpop.f32.mrb[108].mxu0  ;;  %v2795_v32 = vpop.f32.mrb[108].mxu1  ;;  %v1395_v29 = vld [vmem:[#allocation11 + $0x6a0] sm:$0xff] }
 0x1f7   :  { %3570 = vst [vmem:[#allocation12 + $0x660] sm:$0xff] %v3314_v55  ;;  %3572 = vst [vmem:[#allocation12 + $0x670] sm:$0xff] %v3316_v63  ;;  %v879_v31 = vmul.f32 %v659_v33, %v4143_v45  ;;  %v881_v20 = vmul.f32 %v659_v33, %v4163_v59  ;;  %v880_v26 = vmul.f32 %v659_v33, %v4177_v1  ;;  %v5746_v16 = vmul.f32 2.0, %v2789_v0  ;;  %v2348_v62 = vpop.f32.mrb[109].mxu0  ;;  %v2797_v28 = vpop.f32.mrb[109].mxu1  ;;  %v1397_v55 = vld [vmem:[#allocation11 + $0x6b0] sm:$0xff] }
 0x1f8   :  { %3571 = vst [vmem:[#allocation12 + $0x668] sm:$0xff] %v3315_v6  ;;  %v882_v53 = vmul.f32 %v659_v33, %v4186_v11  ;;  %3573 = vst [vmem:[#allocation12 + $0x678] sm:$0xff] %v3317_v15  ;;  %vm334_vm11 = vcmp.lt.s32.totalorder %v203_v27, %v4128_v40  ;;  %vm530_vm12 = vcmp.lt.s32.totalorder %v203_v27, %v4141_v44  ;;  %v3067_v61 = vmul.f32 2.0, %v2342_v56 }
 0x1f9   :  { %v1135_v4 = vadd.f32 1.0, %v879_v31  ;;  %v1137_v34 = vadd.f32 1.0, %v881_v20  ;;  %v1136_v5 = vadd.f32 1.0, %v880_v26  ;;  %v400_v14 = vsel %vm334_vm11, %v4138_v43, 0.0 }
 0x1fa   :  { %v1138_v50 = vadd.f32 1.0, %v882_v53  ;;  %v596_v8 = vsel %vm530_vm12, %v4149_v47, 0.0  ;;  %v3069_v17 = vmul.f32 2.0, %v2791_v18  ;;  %v204_v41 = vadd.s32 432, %v6150_v13  ;;  %v2352_v10 = vpop.f32.mrb[110].mxu0  ;;  %v2801_v22 = vpop.f32.mrb[110].mxu1 }
 0x1fb   :  { %v1647_v9 = vmul.f32 %v1391_v48, %v1135_v4  ;;  %v1649_v24 = vmul.f32 %v1393_v23, %v1137_v34  ;;  %v1648_v52 = vmul.f32 %v1392_v25, %v1136_v5  ;;  %v660_v51 = vadd.f32 %v596_v8, %v400_v14  ;;  %v2354_v36 = vpop.f32.mrb[111].mxu0  ;;  %v2803_v38 = vpop.f32.mrb[111].mxu1 }
 0x1fc   :  { %v1650_v30 = vmul.f32 %v1394_v7, %v1138_v50  ;;  %v5751_v54 = vmul.f32 2.0, %v2346_v57  ;;  %v5753_v46 = vmul.f32 2.0, %v2795_v32  ;;  %vm335_vm13 = vcmp.lt.s32.totalorder %v204_v41, %v4128_v40 }
 0x1fd   :  { %v3318_v2 = vadd.f32 %v3062_v37, %v1647_v9  ;;  %v3320_v12 = vadd.f32 %v3064_v3, %v1649_v24  ;;  %v3319_v42 = vadd.f32 %v3063_v60, %v1648_v52  ;;  %v883_v49 = vmul.f32 %v660_v51, %v4143_v45  ;;  %v1396_v37 = vld [vmem:[#allocation11 + $0x6a8] sm:$0xff]  ;;  %v1398_v3 = vld [vmem:[#allocation11 + $0x6b8] sm:$0xff]  ;;  %v1399_v9 = vld [vmem:[#allocation11 + $0x6c0] sm:$0xff] }
 0x1fe   :  { %v3321_v58 = vadd.f32 %v3065_v21, %v1650_v30  ;;  %v885_v19 = vmul.f32 %v660_v51, %v4163_v59  ;;  %v884_v39 = vmul.f32 %v660_v51, %v4177_v1  ;;  %v886_v0 = vmul.f32 %v660_v51, %v4186_v11  ;;  %v2358_v60 = vpop.f32.mrb[112].mxu0  ;;  %v2807_v21 = vpop.f32.mrb[112].mxu1  ;;  %v1401_v52 = vld [vmem:[#allocation11 + $0x6d0] sm:$0xff] }
 0x1ff   :  { %3574 = vst [vmem:[#allocation12 + $0x680] sm:$0xff] %v3318_v2  ;;  %3576 = vst [vmem:[#allocation12 + $0x690] sm:$0xff] %v3320_v12  ;;  %vm531_vm14 = vcmp.lt.s32.totalorder %v204_v41, %v4141_v44  ;;  %v5761_v63 = vmul.f32 2.0, %v2348_v62  ;;  %v5763_v6 = vmul.f32 2.0, %v2797_v28  ;;  %v1139_v33 = vadd.f32 1.0, %v883_v49  ;;  %v5770_v23 = vpop.f32.mrb[113].mxu0 }
 0x200   :  { %3575 = vst [vmem:[#allocation12 + $0x688] sm:$0xff] %v3319_v42  ;;  %3577 = vst [vmem:[#allocation12 + $0x698] sm:$0xff] %v3321_v58  ;;  %v1141_v56 = vadd.f32 1.0, %v885_v19  ;;  %v1140_v18 = vadd.f32 1.0, %v884_v39  ;;  %v1142_v15 = vadd.f32 1.0, %v886_v0  ;;  %v401_v27 = vsel %vm335_vm13, %v4138_v43, 0.0 }
 0x201   :  { %v597_v31 = vsel %vm531_vm14, %v4149_v47, 0.0  ;;  %v205_v48 = vadd.s32 440, %v6150_v13  ;;  %v5768_v20 = vmul.f32 2.0, %v2352_v10  ;;  %v5772_v26 = vpop.f32.mrb[113].mxu1  ;;  %v1651_v53 = vmul.f32 %v1395_v29, %v1139_v33 }
 0x202   :  { %v1653_v25 = vmul.f32 %v1397_v55, %v1141_v56  ;;  %v1652_v7 = vmul.f32 %v1396_v37, %v1140_v18  ;;  %v1654_v57 = vmul.f32 %v1398_v3, %v1142_v15  ;;  %v661_v32 = vadd.f32 %v597_v31, %v401_v27  ;;  %v5780_v28 = vpop.f32.mrb[114].mxu0  ;;  %v1403_v27 = vld [vmem:[#allocation11 + $0x6e0] sm:$0xff] }
 0x203   :  { %vm336_vm15 = vcmp.lt.s32.totalorder %v205_v48, %v4128_v40  ;;  %vm532_vm1 = vcmp.lt.s32.totalorder %v205_v48, %v4141_v44  ;;  %v5776_v4 = vmul.f32 2.0, %v2801_v22  ;;  %v3322_v34 = vadd.f32 %v5744_v35, %v1651_v53  ;;  %v5782_v14 = vpop.f32.mrb[114].mxu1  ;;  %v5788_v41 = vpop.f32.mrb[115].mxu0 }
 0x204   :  { %v3324_v5 = vadd.f32 %v5746_v16, %v1653_v25  ;;  %v3323_v50 = vadd.f32 %v3067_v61, %v1652_v7  ;;  %v3325_v62 = vadd.f32 %v3069_v17, %v1654_v57  ;;  %v887_v8 = vmul.f32 %v661_v32, %v4143_v45  ;;  %v5790_v35 = vpop.f32.mrb[115].mxu1  ;;  %v1400_v16 = vld [vmem:[#allocation11 + $0x6c8] sm:$0xff]  ;;  %v1402_v61 = vld [vmem:[#allocation11 + $0x6d8] sm:$0xff]  ;;  %v1405_v57 = vld [vmem:[#allocation11 + $0x6f0] sm:$0xff] }
 0x205   :  { %v889_v24 = vmul.f32 %v661_v32, %v4163_v59  ;;  %v888_v30 = vmul.f32 %v661_v32, %v4177_v1  ;;  %v890_v51 = vmul.f32 %v661_v32, %v4186_v11  ;;  %3578 = vst [vmem:[#allocation12 + $0x6a0] sm:$0xff] %v3322_v34  ;;  %v402_v17 = vsel %vm336_vm15, %v4138_v43, 0.0  ;;  %v1404_v32 = vld [vmem:[#allocation11 + $0x6e8] sm:$0xff]  ;;  %v1406_v34 = vld [vmem:[#allocation11 + $0x6f8] sm:$0xff] }
 0x206   :  { %3580 = vst [vmem:[#allocation12 + $0x6b0] sm:$0xff] %v3324_v5  ;;  %3579 = vst [vmem:[#allocation12 + $0x6a8] sm:$0xff] %v3323_v50  ;;  %v598_v10 = vsel %vm532_vm1, %v4149_v47, 0.0  ;;  %v3075_v22 = vmul.f32 2.0, %v2354_v36  ;;  %v3077_v2 = vmul.f32 2.0, %v2803_v38  ;;  %v1143_v12 = vadd.f32 1.0, %v887_v8 }
 0x207   :  { %3581 = vst [vmem:[#allocation12 + $0x6b8] sm:$0xff] %v3325_v62  ;;  %v1145_v42 = vadd.f32 1.0, %v889_v24  ;;  %v1144_v58 = vadd.f32 1.0, %v888_v30  ;;  %v1146_v49 = vadd.f32 1.0, %v890_v51  ;;  %v662_v29 = vadd.f32 %v598_v10, %v402_v17  ;;  %v5803_v55 = vpop.f32.mrb[116].mxu0  ;;  %v5805_v37 = vpop.f32.mrb[116].mxu1 }
 0x208   :  { %v206_v19 = vadd.s32 448, %v6150_v13  ;;  %v5799_v39 = vmul.f32 2.0, %v2358_v60  ;;  %v5801_v0 = vmul.f32 2.0, %v2807_v21  ;;  %v1655_v3 = vmul.f32 %v1399_v9, %v1143_v12  ;;  %v5807_v38 = vpop.f32.mrb[117].mxu0  ;;  %v5809_v18 = vpop.f32.mrb[117].mxu1 }
 0x209   :  { %v1657_v33 = vmul.f32 %v1401_v52, %v1145_v42  ;;  %v1656_v56 = vmul.f32 %v1400_v16, %v1144_v58  ;;  %v1658_v36 = vmul.f32 %v1402_v61, %v1146_v49  ;;  %v891_v15 = vmul.f32 %v662_v29, %v4143_v45 }
 0x20a   :  { %v893_v60 = vmul.f32 %v662_v29, %v4163_v59  ;;  %v892_v21 = vmul.f32 %v662_v29, %v4177_v1  ;;  %v894_v31 = vmul.f32 %v662_v29, %v4186_v11  ;;  %v3326_v48 = vadd.f32 %v5751_v54, %v1655_v3  ;;  %v5819_v9 = vpop.f32.mrb[118].mxu0 }
 0x20b   :  { %v3328_v53 = vadd.f32 %v5753_v46, %v1657_v33  ;;  %v3327_v25 = vadd.f32 %v5761_v63, %v1656_v56  ;;  %v3329_v7 = vadd.f32 %v5763_v6, %v1658_v36  ;;  %v1147_v5 = vadd.f32 1.0, %v891_v15  ;;  %v5821_v24 = vpop.f32.mrb[118].mxu1  ;;  %v5831_v63 = vpop.f32.mrb[119].mxu0  ;;  %v1409_v15 = vld [vmem:[#allocation11 + $0x710] sm:$0xff] }
 0x20c   :  { %v1149_v50 = vadd.f32 1.0, %v893_v60  ;;  %v1148_v62 = vadd.f32 1.0, %v892_v21  ;;  %v1150_v8 = vadd.f32 1.0, %v894_v31  ;;  %3582 = vst [vmem:[#allocation12 + $0x6c0] sm:$0xff] %v3326_v48  ;;  %vm337_vm2 = vcmp.lt.s32.totalorder %v206_v19, %v4128_v40  ;;  %v5833_v6 = vpop.f32.mrb[119].mxu1  ;;  %v1408_v60 = vld [vmem:[#allocation11 + $0x708] sm:$0xff] }
 0x20d   :  { %3584 = vst [vmem:[#allocation12 + $0x6d0] sm:$0xff] %v3328_v53  ;;  %3583 = vst [vmem:[#allocation12 + $0x6c8] sm:$0xff] %v3327_v25  ;;  %vm533_vm3 = vcmp.lt.s32.totalorder %v206_v19, %v4141_v44  ;;  %v5826_v54 = vmul.f32 2.0, %v5770_v23  ;;  %v5829_v46 = vmul.f32 2.0, %v5772_v26  ;;  %v1659_v52 = vmul.f32 %v1403_v27, %v1147_v5  ;;  %v1410_v31 = vld [vmem:[#allocation11 + $0x718] sm:$0xff] }
 0x20e   :  { %3585 = vst [vmem:[#allocation12 + $0x6d8] sm:$0xff] %v3329_v7  ;;  %v1661_v30 = vmul.f32 %v1405_v57, %v1149_v50  ;;  %v1660_v51 = vmul.f32 %v1404_v32, %v1148_v62  ;;  %v1662_v16 = vmul.f32 %v1406_v34, %v1150_v8  ;;  %v403_v61 = vsel %vm337_vm2, %v4138_v43, 0.0  ;;  %v5843_v49 = vpop.f32.mrb[120].mxu0 }
 0x20f   :  { %v599_v17 = vsel %vm533_vm3, %v4149_v47, 0.0  ;;  %v207_v10 = vadd.s32 456, %v6150_v13  ;;  %v5839_v23 = vmul.f32 2.0, %v5780_v28  ;;  %v3330_v26 = vadd.f32 %v5768_v20, %v1659_v52  ;;  %v5845_v29 = vpop.f32.mrb[120].mxu1  ;;  %v5852_v28 = vpop.f32.mrb[121].mxu0  ;;  %v1411_v52 = vld [vmem:[#allocation11 + $0x720] sm:$0xff] }
 0x210   :  { %v3332_v12 = vadd.f32 %v5776_v4, %v1661_v30  ;;  %v3331_v42 = vadd.f32 %v3075_v22, %v1660_v51  ;;  %v3333_v58 = vadd.f32 %v3077_v2, %v1662_v16  ;;  %v663_v19 = vadd.f32 %v599_v17, %v403_v61  ;;  %v5854_v33 = vpop.f32.mrb[121].mxu1 }
 0x211   :  { %vm338_vm4 = vcmp.lt.s32.totalorder %v207_v10, %v4128_v40  ;;  %vm534_vm5 = vcmp.lt.s32.totalorder %v207_v10, %v4141_v44  ;;  %v5850_v3 = vmul.f32 2.0, %v5782_v14  ;;  %3586 = vst [vmem:[#allocation12 + $0x6e0] sm:$0xff] %v3330_v26  ;;  %v3083_v22 = vmul.f32 2.0, %v5788_v41  ;;  %v1407_v14 = vld [vmem:[#allocation11 + $0x700] sm:$0xff]  ;;  %v1413_v10 = vld [vmem:[#allocation11 + $0x730] sm:$0xff]  ;;  %v1412_v26 = vld [vmem:[#allocation11 + $0x728] sm:$0xff] }
 0x212   :  { %3588 = vst [vmem:[#allocation12 + $0x6f0] sm:$0xff] %v3332_v12  ;;  %3587 = vst [vmem:[#allocation12 + $0x6e8] sm:$0xff] %v3331_v42  ;;  %v404_v20 = vsel %vm338_vm4, %v4138_v43, 0.0  ;;  %v600_v4 = vsel %vm534_vm5, %v4149_v47, 0.0  ;;  %v3085_v2 = vmul.f32 2.0, %v5790_v35  ;;  %v895_v56 = vmul.f32 %v663_v19, %v4143_v45  ;;  %v5871_v35 = vpop.f32.mrb[122].mxu0 }
 0x213   :  { %3589 = vst [vmem:[#allocation12 + $0x6f8] sm:$0xff] %v3333_v58  ;;  %v897_v36 = vmul.f32 %v663_v19, %v4163_v59  ;;  %v896_v27 = vmul.f32 %v663_v19, %v4177_v1  ;;  %v898_v21 = vmul.f32 %v663_v19, %v4186_v11  ;;  %v664_v48 = vadd.f32 %v600_v4, %v404_v20  ;;  %v5873_v7 = vpop.f32.mrb[122].mxu1  ;;  %v5875_v50 = vpop.f32.mrb[123].mxu0  ;;  %v1414_v12 = vld [vmem:[#allocation11 + $0x738] sm:$0xff] }
 0x214   :  { %v208_v53 = vadd.s32 464, %v6150_v13  ;;  %v5866_v25 = vmul.f32 2.0, %v5803_v55  ;;  %v5869_v41 = vmul.f32 2.0, %v5805_v37  ;;  %v1151_v57 = vadd.f32 1.0, %v895_v56  ;;  %v5877_v62 = vpop.f32.mrb[123].mxu1 }
 0x215   :  { %v1153_v32 = vadd.f32 1.0, %v897_v36  ;;  %v1152_v34 = vadd.f32 1.0, %v896_v27  ;;  %v1154_v5 = vadd.f32 1.0, %v898_v21  ;;  %v899_v8 = vmul.f32 %v664_v48, %v4143_v45 }
 0x216   :  { %v901_v55 = vmul.f32 %v664_v48, %v4163_v59  ;;  %v900_v37 = vmul.f32 %v664_v48, %v4177_v1  ;;  %v902_v30 = vmul.f32 %v664_v48, %v4186_v11  ;;  %v1663_v51 = vmul.f32 %v1407_v14, %v1151_v57  ;;  %v5883_v4 = vpop.f32.mrb[124].mxu0 }
 0x217   :  { %v1665_v16 = vmul.f32 %v1409_v15, %v1153_v32  ;;  %v1664_v61 = vmul.f32 %v1408_v60, %v1152_v34  ;;  %v1666_v17 = vmul.f32 %v1410_v31, %v1154_v5  ;;  %v1155_v42 = vadd.f32 1.0, %v899_v8  ;;  %v5885_v56 = vpop.f32.mrb[124].mxu1  ;;  %v5891_v60 = vpop.f32.mrb[125].mxu0 }
 0x218   :  { %v1157_v58 = vadd.f32 1.0, %v901_v55  ;;  %v1156_v19 = vadd.f32 1.0, %v900_v37  ;;  %v1158_v20 = vadd.f32 1.0, %v902_v30  ;;  %v3334_v36 = vadd.f32 %v5799_v39, %v1663_v51  ;;  %v5893_v21 = vpop.f32.mrb[125].mxu1 }
 0x219   :  { %v3336_v27 = vadd.f32 %v5801_v0, %v1665_v16  ;;  %v3335_v14 = vadd.f32 %v5826_v54, %v1664_v61  ;;  %v3337_v15 = vadd.f32 %v5829_v46, %v1666_v17  ;;  %v1667_v31 = vmul.f32 %v1411_v52, %v1155_v42  ;;  %v1415_v61 = vld [vmem:[#allocation11 + $0x740] sm:$0xff] }
 0x21a   :  { %v1669_v48 = vmul.f32 %v1413_v10, %v1157_v58  ;;  %v1668_v57 = vmul.f32 %v1412_v26, %v1156_v19  ;;  %v1670_v32 = vmul.f32 %v1414_v12, %v1158_v20  ;;  %3590 = vst [vmem:[#allocation12 + $0x700] sm:$0xff] %v3334_v36  ;;  %vm339_vm0 = vcmp.lt.s32.totalorder %v208_v53, %v4128_v40  ;;  %v5901_v8 = vpop.f32.mrb[126].mxu0  ;;  %v1416_v10 = vld [vmem:[#allocation11 + $0x748] sm:$0xff]  ;;  %v1418_v26 = vld [vmem:[#allocation11 + $0x758] sm:$0xff] }
 0x21b   :  { %3592 = vst [vmem:[#allocation12 + $0x710] sm:$0xff] %v3336_v27  ;;  %3591 = vst [vmem:[#allocation12 + $0x708] sm:$0xff] %v3335_v14  ;;  %vm535_vm6 = vcmp.lt.s32.totalorder %v208_v53, %v4141_v44  ;;  %v3087_v39 = vmul.f32 2.0, %v5807_v38  ;;  %v3089_v0 = vmul.f32 2.0, %v5809_v18  ;;  %v3338_v54 = vadd.f32 %v5839_v23, %v1667_v31  ;;  %v5903_v52 = vpop.f32.mrb[126].mxu1  ;;  %v5911_v18 = vpop.f32.mrb[127].mxu0 }
 0x21c   :  { %3593 = vst [vmem:[#allocation12 + $0x718] sm:$0xff] %v3337_v15  ;;  %v3340_v46 = vadd.f32 %v5850_v3, %v1669_v48  ;;  %v3339_v34 = vadd.f32 %v3083_v22, %v1668_v57  ;;  %v3341_v5 = vadd.f32 %v3085_v2, %v1670_v32  ;;  %v405_v55 = vsel %vm339_vm0, %v4138_v43, 0.0  ;;  %v5913_v23 = vpop.f32.mrb[127].mxu1 }
 0x21d   :  { %v601_v37 = vsel %vm535_vm6, %v4149_v47, 0.0  ;;  %v209_v53 = vadd.s32 472, %v6150_v13  ;;  %v5909_v38 = vmul.f32 2.0, %v5819_v9  ;;  %3594 = vst [vmem:[#allocation12 + $0x720] sm:$0xff] %v3338_v54  ;;  %v5916_v22 = vmul.f32 2.0, %v5821_v24 }
 0x21e   :  { %3596 = vst [vmem:[#allocation12 + $0x730] sm:$0xff] %v3340_v46  ;;  %3595 = vst [vmem:[#allocation12 + $0x728] sm:$0xff] %v3339_v34  ;;  %v665_v3 = vadd.f32 %v601_v37, %v405_v55  ;;  %v5919_v2 = vmul.f32 2.0, %v5831_v63  ;;  %v5922_v30 = vmul.f32 2.0, %v5833_v6  ;;  %v210_v9 = vadd.s32 480, %v6150_v13  ;;  %v1417_v6 = vld [vmem:[#allocation11 + $0x750] sm:$0xff] }
 0x21f   :  { %3597 = vst [vmem:[#allocation12 + $0x738] sm:$0xff] %v3341_v5  ;;  %vm340_vm7 = vcmp.lt.s32.totalorder %v209_v53, %v4128_v40  ;;  %vm536_vm8 = vcmp.lt.s32.totalorder %v209_v53, %v4141_v44  ;;  %v5928_v51 = vmul.f32 2.0, %v5843_v49  ;;  %v5941_v15 = vmul.f32 2.0, %v5845_v29  ;;  %v1419_v46 = vld [vmem:[#allocation11 + $0x760] sm:$0xff] }
 0x220   :  { %v903_v16 = vmul.f32 %v665_v3, %v4143_v45  ;;  %v905_v24 = vmul.f32 %v665_v3, %v4163_v59  ;;  %v904_v63 = vmul.f32 %v665_v3, %v4177_v1  ;;  %v906_v17 = vmul.f32 %v665_v3, %v4186_v11 }
 0x221   :  { %v406_v12 = vsel %vm340_vm7, %v4138_v43, 0.0  ;;  %v602_v42 = vsel %vm536_vm8, %v4149_v47, 0.0  ;;  %vm341_vm9 = vcmp.lt.s32.totalorder %v210_v9, %v4128_v40  ;;  %vm537_vm10 = vcmp.lt.s32.totalorder %v210_v9, %v4141_v44  ;;  %v1421_v9 = vld [vmem:[#allocation11 + $0x770] sm:$0xff] }
 0x222   :  { %v1159_v49 = vadd.f32 1.0, %v903_v16  ;;  %v1161_v58 = vadd.f32 1.0, %v905_v24  ;;  %v1160_v19 = vadd.f32 1.0, %v904_v63  ;;  %v1162_v20 = vadd.f32 1.0, %v906_v17  ;;  %v1420_v16 = vld [vmem:[#allocation11 + $0x768] sm:$0xff] }
 0x223   :  { %v666_v36 = vadd.f32 %v602_v42, %v406_v12  ;;  %v407_v27 = vsel %vm341_vm9, %v4138_v43, 0.0  ;;  %v603_v14 = vsel %vm537_vm10, %v4149_v47, 0.0 }
 0x224   :  { %v1671_v31 = vmul.f32 %v1415_v61, %v1159_v49  ;;  %v1673_v48 = vmul.f32 %v1417_v6, %v1161_v58  ;;  %v1672_v57 = vmul.f32 %v1416_v10, %v1160_v19  ;;  %v1674_v32 = vmul.f32 %v1418_v26, %v1162_v20  ;;  %v1422_v61 = vld [vmem:[#allocation11 + $0x778] sm:$0xff]  ;;  %v1423_v58 = vld [vmem:[#allocation11 + $0x780] sm:$0xff] }
 0x225   :  { %v907_v54 = vmul.f32 %v666_v36, %v4143_v45  ;;  %v909_v34 = vmul.f32 %v666_v36, %v4163_v59  ;;  %v908_v5 = vmul.f32 %v666_v36, %v4177_v1  ;;  %v910_v55 = vmul.f32 %v666_v36, %v4186_v11 }
 0x226   :  { %v3342_v37 = vadd.f32 %v5866_v25, %v1671_v31  ;;  %v3344_v53 = vadd.f32 %v5869_v41, %v1673_v48  ;;  %v3343_v3 = vadd.f32 %v3087_v39, %v1672_v57  ;;  %v3345_v29 = vadd.f32 %v3089_v0, %v1674_v32  ;;  %v1425_v31 = vld [vmem:[#allocation11 + $0x790] sm:$0xff]  ;;  %v1424_v48 = vld [vmem:[#allocation11 + $0x788] sm:$0xff]  ;;  %v1426_v57 = vld [vmem:[#allocation11 + $0x798] sm:$0xff] }
 0x227   :  { %v1163_v24 = vadd.f32 1.0, %v907_v54  ;;  %v1165_v63 = vadd.f32 1.0, %v909_v34  ;;  %v1164_v17 = vadd.f32 1.0, %v908_v5  ;;  %v1166_v6 = vadd.f32 1.0, %v910_v55 }
 0x228   :  { %3598 = vst [vmem:[#allocation12 + $0x740] sm:$0xff] %v3342_v37  ;;  %3600 = vst [vmem:[#allocation12 + $0x750] sm:$0xff] %v3344_v53  ;;  %v667_v10 = vadd.f32 %v603_v14, %v407_v27  ;;  %v3095_v26 = vmul.f32 2.0, %v5852_v28  ;;  %v3097_v25 = vmul.f32 2.0, %v5854_v33  ;;  %v211_v41 = vadd.s32 488, %v6150_v13 }
 0x229   :  { %3599 = vst [vmem:[#allocation12 + $0x748] sm:$0xff] %v3343_v3  ;;  %3601 = vst [vmem:[#allocation12 + $0x758] sm:$0xff] %v3345_v29  ;;  %v1675_v39 = vmul.f32 %v1419_v46, %v1163_v24  ;;  %v1677_v0 = vmul.f32 %v1421_v9, %v1165_v63  ;;  %v1676_v12 = vmul.f32 %v1420_v16, %v1164_v17  ;;  %v3099_v3 = vmul.f32 2.0, %v5875_v50 }
 0x22a   :  { %v1678_v42 = vmul.f32 %v1422_v61, %v1166_v6  ;;  %v911_v49 = vmul.f32 %v667_v10, %v4143_v45  ;;  %v913_v19 = vmul.f32 %v667_v10, %v4163_v59  ;;  %v912_v20 = vmul.f32 %v667_v10, %v4177_v1  ;;  %v1427_v6 = vld [vmem:[#allocation11 + $0x7a0] sm:$0xff] }
 0x22b   :  { %v914_v36 = vmul.f32 %v667_v10, %v4186_v11  ;;  %v3346_v27 = vadd.f32 %v5909_v38, %v1675_v39  ;;  %v3348_v28 = vadd.f32 %v5916_v22, %v1677_v0  ;;  %v3347_v33 = vadd.f32 %v5919_v2, %v1676_v12 }
 0x22c   :  { %v3349_v14 = vadd.f32 %v5922_v30, %v1678_v42  ;;  %v1167_v32 = vadd.f32 1.0, %v911_v49  ;;  %v1169_v54 = vadd.f32 1.0, %v913_v19  ;;  %v1168_v46 = vadd.f32 1.0, %v912_v20 }
 0x22d   :  { %v1170_v34 = vadd.f32 1.0, %v914_v36  ;;  %3602 = vst [vmem:[#allocation12 + $0x760] sm:$0xff] %v3346_v27  ;;  %3604 = vst [vmem:[#allocation12 + $0x770] sm:$0xff] %v3348_v28  ;;  %vm342_vm11 = vcmp.lt.s32.totalorder %v211_v41, %v4128_v40  ;;  %vm538_vm12 = vcmp.lt.s32.totalorder %v211_v41, %v4141_v44  ;;  %v3098_v38 = vmul.f32 2.0, %v5871_v35  ;;  %v1430_v41 = vld [vmem:[#allocation11 + $0x7b8] sm:$0xff] }
 0x22e   :  { %3603 = vst [vmem:[#allocation12 + $0x768] sm:$0xff] %v3347_v33  ;;  %3605 = vst [vmem:[#allocation12 + $0x778] sm:$0xff] %v3349_v14  ;;  %v3100_v22 = vmul.f32 2.0, %v5873_v7  ;;  %v1679_v2 = vmul.f32 %v1423_v58, %v1167_v32  ;;  %v1681_v30 = vmul.f32 %v1425_v31, %v1169_v54  ;;  %v1680_v5 = vmul.f32 %v1424_v48, %v1168_v46  ;;  %v1431_v32 = vld [vmem:[#allocation11 + $0x7c0] sm:$0xff]  ;;  %v1432_v46 = vld [vmem:[#allocation11 + $0x7c8] sm:$0xff] }
 0x22f   :  { %v1682_v55 = vmul.f32 %v1426_v57, %v1170_v34  ;;  %v408_v37 = vsel %vm342_vm11, %v4138_v43, 0.0  ;;  %v604_v53 = vsel %vm538_vm12, %v4149_v47, 0.0  ;;  %v3101_v29 = vmul.f32 2.0, %v5877_v62 }
 0x230   :  { %v3350_v9 = vadd.f32 %v5928_v51, %v1679_v2  ;;  %v3352_v16 = vadd.f32 %v5941_v15, %v1681_v30  ;;  %v3351_v61 = vadd.f32 %v3095_v26, %v1680_v5  ;;  %v668_v24 = vadd.f32 %v604_v53, %v408_v37  ;;  %v1437_v2 = vld [vmem:[#allocation11 + $0x7f0] sm:$0xff] }
 0x231   :  { %v3353_v35 = vadd.f32 %v3097_v25, %v1682_v55  ;;  %v212_v7 = vadd.s32 496, %v6150_v13  ;;  %v5972_v63 = vmul.f32 2.0, %v5883_v4  ;;  %v5975_v17 = vmul.f32 2.0, %v5885_v56  ;;  %v1429_v25 = vld [vmem:[#allocation11 + $0x7b0] sm:$0xff] }
 0x232   :  { %3606 = vst [vmem:[#allocation12 + $0x780] sm:$0xff] %v3350_v9  ;;  %3608 = vst [vmem:[#allocation12 + $0x790] sm:$0xff] %v3352_v16  ;;  %v5978_v50 = vmul.f32 2.0, %v5891_v60  ;;  %v5981_v62 = vmul.f32 2.0, %v5893_v21  ;;  %v213_v51 = vadd.s32 504, %v6150_v13  ;;  %v5985_v15 = vmul.f32 2.0, %v5901_v8 }
 0x233   :  { %3607 = vst [vmem:[#allocation12 + $0x788] sm:$0xff] %v3351_v61  ;;  %3609 = vst [vmem:[#allocation12 + $0x798] sm:$0xff] %v3353_v35  ;;  %v915_v4 = vmul.f32 %v668_v24, %v4143_v45  ;;  %v917_v56 = vmul.f32 %v668_v24, %v4163_v59  ;;  %v916_v10 = vmul.f32 %v668_v24, %v4177_v1  ;;  %v1428_v60 = vld [vmem:[#allocation11 + $0x7a8] sm:$0xff]  ;;  %v3107_v28 = vmul.f32 2.0, %v5911_v18  ;;  %v1438_v9 = vld [vmem:[#allocation11 + $0x7f8] sm:$0xff] }
 0x234   :  { %v918_v26 = vmul.f32 %v668_v24, %v4186_v11  ;;  %vm343_vm13 = vcmp.lt.s32.totalorder %v212_v7, %v4128_v40  ;;  %vm539_vm14 = vcmp.lt.s32.totalorder %v212_v7, %v4141_v44  ;;  %vm344_vm15 = vcmp.lt.s32.totalorder %v213_v51, %v4128_v40 }
 0x235   :  { %vm540_vm1 = vcmp.lt.s32.totalorder %v213_v51, %v4141_v44  ;;  %v1171_v13 = vadd.f32 1.0, %v915_v4  ;;  %v1173_v21 = vadd.f32 1.0, %v917_v56  ;;  %v1172_v8 = vadd.f32 1.0, %v916_v10 }
 0x236   :  { %v1174_v39 = vadd.f32 1.0, %v918_v26  ;;  %v409_v0 = vsel %vm343_vm13, %v4138_v43, 0.0  ;;  %v605_v12 = vsel %vm539_vm14, %v4149_v47, 0.0  ;;  %v410_v42 = vsel %vm344_vm15, %v4138_v43, 0.0 }
 0x237   :  { %v606_v49 = vsel %vm540_vm1, %v4149_v47, 0.0  ;;  %v1683_v58 = vmul.f32 %v1427_v6, %v1171_v13  ;;  %v1685_v19 = vmul.f32 %v1429_v25, %v1173_v21  ;;  %v1684_v20 = vmul.f32 %v1428_v60, %v1172_v8  ;;  %v1433_v47 = vld [vmem:[#allocation11 + $0x7d0] sm:$0xff] }
 0x238   :  { %v1686_v36 = vmul.f32 %v1430_v41, %v1174_v39  ;;  %v669_v27 = vadd.f32 %v605_v12, %v409_v0  ;;  %v670_v40 = vadd.f32 %v606_v49, %v410_v42  ;;  %v3108_v44 = vmul.f32 2.0, %v5903_v52  ;;  %v1434_v52 = vld [vmem:[#allocation11 + $0x7d8] sm:$0xff] }
 0x239   :  { %v3354_v33 = vadd.f32 %v3098_v38, %v1683_v58  ;;  %v3356_v14 = vadd.f32 %v3100_v22, %v1685_v19  ;;  %v3355_v31 = vadd.f32 %v3099_v3, %v1684_v20  ;;  %v1435_v38 = vld [vmem:[#allocation11 + $0x7e0] sm:$0xff]  ;;  %v3109_v21 = vmul.f32 2.0, %v5913_v23 }
 0x23a   :  { %v3357_v48 = vadd.f32 %v3101_v29, %v1686_v36  ;;  %v919_v57 = vmul.f32 %v669_v27, %v4143_v45  ;;  %v921_v43 = vmul.f32 %v669_v27, %v4163_v59  ;;  %v920_v54 = vmul.f32 %v669_v27, %v4177_v1  ;;  %v1436_v29 = vld [vmem:[#allocation11 + $0x7e8] sm:$0xff] }
 0x23b   :  { %v922_v34 = vmul.f32 %v669_v27, %v4186_v11  ;;  %3610 = vst [vmem:[#allocation12 + $0x7a0] sm:$0xff] %v3354_v33  ;;  %3612 = vst [vmem:[#allocation12 + $0x7b0] sm:$0xff] %v3356_v14  ;;  %v923_v18 = vmul.f32 %v670_v40, %v4143_v45  ;;  %v925_v22 = vmul.f32 %v670_v40, %v4163_v59 }
 0x23c   :  { %3611 = vst [vmem:[#allocation12 + $0x7a8] sm:$0xff] %v3355_v31  ;;  %3613 = vst [vmem:[#allocation12 + $0x7b8] sm:$0xff] %v3357_v48  ;;  %v924_v30 = vmul.f32 %v670_v40, %v4177_v1  ;;  %v926_v5 = vmul.f32 %v670_v40, %v4186_v11  ;;  %v1175_v55 = vadd.f32 1.0, %v919_v57  ;;  %v1177_v37 = vadd.f32 1.0, %v921_v43 }
 0x23d   :  { %v1176_v53 = vadd.f32 1.0, %v920_v54  ;;  %v1178_v3 = vadd.f32 1.0, %v922_v34  ;;  %v1179_v16 = vadd.f32 1.0, %v923_v18  ;;  %v1181_v61 = vadd.f32 1.0, %v925_v22 }
 0x23e   :  { %v1180_v35 = vadd.f32 1.0, %v924_v30  ;;  %v1182_v24 = vadd.f32 1.0, %v926_v5  ;;  %v1687_v7 = vmul.f32 %v1431_v32, %v1175_v55  ;;  %v1689_v45 = vmul.f32 %v1433_v47, %v1177_v37 }
 0x23f   :  { %v1688_v51 = vmul.f32 %v1432_v46, %v1176_v53  ;;  %v1690_v4 = vmul.f32 %v1434_v52, %v1178_v3  ;;  %v1691_v59 = vmul.f32 %v1435_v38, %v1179_v16  ;;  %v1693_v6 = vmul.f32 %v1437_v2, %v1181_v61 }
 0x240   :  { %v1692_v56 = vmul.f32 %v1436_v29, %v1180_v35  ;;  %v1694_v1 = vmul.f32 %v1438_v9, %v1182_v24  ;;  %v3358_v11 = vadd.f32 %v5972_v63, %v1687_v7  ;;  %v3360_v10 = vadd.f32 %v5975_v17, %v1689_v45 }
 0x241   :  { %v3359_v26 = vadd.f32 %v5978_v50, %v1688_v51  ;;  %v3361_v25 = vadd.f32 %v5981_v62, %v1690_v4  ;;  %v3362_v60 = vadd.f32 %v5985_v15, %v1691_v59  ;;  %v3364_v41 = vadd.f32 %v3108_v44, %v1693_v6 }
 0x242   :  { %v3363_v13 = vadd.f32 %v3107_v28, %v1692_v56  ;;  %3614 = vst [vmem:[#allocation12 + $0x7c0] sm:$0xff] %v3358_v11  ;;  %3616 = vst [vmem:[#allocation12 + $0x7d0] sm:$0xff] %v3360_v10  ;;  %v3365_v63 = vadd.f32 %v3109_v21, %v1694_v1 }
 0x243   :  { %3615 = vst [vmem:[#allocation12 + $0x7c8] sm:$0xff] %v3359_v26  ;;  %3617 = vst [vmem:[#allocation12 + $0x7d8] sm:$0xff] %v3361_v25 }
 0x244   :  { %3618 = vst [vmem:[#allocation12 + $0x7e0] sm:$0xff] %v3362_v60  ;;  %3620 = vst [vmem:[#allocation12 + $0x7f0] sm:$0xff] %v3364_v41 }
 0x245   :  { %3619 = vst [vmem:[#allocation12 + $0x7e8] sm:$0xff] %v3363_v13  ;;  %3621 = vst [vmem:[#allocation12 + $0x7f8] sm:$0xff] %v3365_v63 }
 0x246   :  { %3866 = shalt.err (!%p3863_p4)
}
 0x247   :  { %s3867_s3 = scalar_lea.hbm %s6037_s7, 32768 }
 0x248   :  { %p3868_p5 = scmp.ne.s32.totalorder %s6037_s7, %s3867_s3  ;;  %p3871_p6 = scmp.lt.u32.totalorder %s3867_s3, %s6037_s7 }
 0x24a   :  { %p3873_p7 = pnand %p3871_p6, %p3868_p5 }
 0x24c   :  { %3876 = shalt.err (!%p3873_p7)
}
 0x24d   :  { %3633 = dma.vmem_to_hbm [thread:$0]  %s3628_s15, 32768, %s6037_s7, [#allocation4], %s3892_s27, %s3892_s27, %s3893_s28  }
 0x24e   :  { %3885 = dma.done.wait [#allocation4], 32768  }
 0x24f   :  { %3886 = vsyncadd [#allocation4], 4294934528 }
 0x250   :  { %3637 = vsyncpa [#allocation3], 1 }
 0x251   :  { %3638 = vsyncpa [#allocation4], 1 }
 0x252   :  { %3639 = vsyncpa [#allocation5], 1 }
 0x253   :  { %3640 = vsyncpa [#allocation7], 1 }
 0x254   :  { %3641 = vsyncpa [#allocation10], 1 }

</bundles_post_ra>
